<compile_context>
chip_gen: v7x
topology: tpu7x:2x2x1
jax: 0.10.0
libtpu: 0.0.40
codegen_flags: <defaults>
</compile_context>

<pallas_src>
import functools

import jax
import jax.numpy as jnp
from jax import lax
from jax.experimental import pallas as pl
from jax.experimental.pallas import tpu as pltpu


_VMEM = pl.BlockSpec(memory_space=pltpu.MemorySpace.VMEM)
_TM_CAP = 512  # row-tile cap; per-step footprint stays well under v7x's 64 MiB VMEM


def _pick_tm(b, lh, cap=_TM_CAP):
    """Row tile = k*lh (k | b) so tiles align to batch elements; multiple of 8
    (or the full array); prefers >= 2 grid steps when b >= 2 (v7x megacore)."""
    m = b * lh
    kmax = max(1, min(b, cap // max(lh, 1)))
    for k in range(kmax, 0, -1):
        if b % k:
            continue
        tm = k * lh
        if tm != m and tm % 8 != 0:
            continue
        if b >= 2 and m // tm < 2:
            continue
        return tm
    return lh if (lh % 8 == 0 and b >= 2) else m


# ----------------------------------------------------------------------------
# Fused Inception1D block kernel.
# Per output time-step t (stride 2): he=x[2t], ho=x[2t+1]; the 2t-1 / 2t-2 /
# 2t+2 taps are in-kernel one-row shifts of he/ho, zeroed (conv) or -inf'd
# (maxpool) at the t==0 / t==lh-1 boundaries (PyTorch zero / -inf padding).
# ----------------------------------------------------------------------------
def _inception_kernel(*args, lh, has_pre):
    xe_ref, xo_ref = args[0], args[1]
    i = 2
    if has_pre:
        pre_w_ref, pre_b_ref = args[2:4]
        i = 4
    (w0_ref, b0_ref,
     w1a_ref, b1a_ref, w1b_ref, b1b_ref, s1_ref, t1_ref,
     w2a_ref, b2a_ref, w2b_ref, b2b_ref, s2_ref, t2_ref,
     w3_ref, b3_ref,
     o_ref) = args[i:]

    f32, bf16 = jnp.float32, jnp.bfloat16
    tm = xe_ref.shape[0]
    row = pl.program_id(0) * tm + lax.broadcasted_iota(jnp.int32, (tm, 1), 0)
    t = row % lh
    first = t == 0            # rows whose x[2t-1] / x[2t-2] taps are padding
    last = t == lh - 1        # rows whose x[2t+2] tap is padding

    def dot(a, w):
        return jnp.dot(a, w, preferred_element_type=f32)

    if has_pre:
        # Fused conv1 (kernel_size=1, C_in=3) as a single MXU dot per phase.
        he_f = dot(xe_ref[...], pre_w_ref[...]) + pre_b_ref[...]
        ho_f = dot(xo_ref[...], pre_w_ref[...]) + pre_b_ref[...]
        he_b = he_f.astype(bf16)
        ho_b = ho_f.astype(bf16)
    else:
        he_b = xe_ref[...]
        ho_b = xo_ref[...]
        he_f = he_b.astype(f32)
        ho_f = ho_b.astype(f32)

    c_in = he_f.shape[1]
    zrow = jnp.zeros((1, c_in), f32)
    sd_o = jnp.concatenate([zrow, ho_f[:-1, :]], axis=0)   # row t -> x[2t-1]
    sd_e = jnp.concatenate([zrow, he_f[:-1, :]], axis=0)   # row t -> x[2t-2]
    su_e = jnp.concatenate([he_f[1:, :], zrow], axis=0)    # row t -> x[2t+2]

    hom_b = jnp.where(first, 0.0, sd_o).astype(bf16)
    hem_b = jnp.where(first, 0.0, sd_e).astype(bf16)
    hep_b = jnp.where(last, 0.0, su_e).astype(bf16)

    # branch 0: 1x1 conv (stride 2) -> ReLU
    y0 = jnp.maximum(dot(he_b, w0_ref[...]) + b0_ref[...], 0.0)
    c0 = y0.shape[1]
    o_ref[:, 0:c0] = y0.astype(o_ref.dtype)

    # branch 1: 3-tap conv (pad 1, stride 2) -> ReLU -> 1x1 conv -> ReLU -> BN affine
    h1 = (dot(hom_b, w1a_ref[0]) + dot(he_b, w1a_ref[1]) + dot(ho_b, w1a_ref[2])
          + b1a_ref[...])
    h1 = jnp.maximum(h1, 0.0).astype(bf16)
    y1 = jnp.maximum(dot(h1, w1b_ref[...]) + b1b_ref[...], 0.0)
    y1 = y1 * s1_ref[...] + t1_ref[...]
    c1 = y1.shape[1]
    o_ref[:, c0:c0 + c1] = y1.astype(o_ref.dtype)

    # branch 2: 5-tap conv (pad 2, stride 2) -> ReLU -> 1x1 conv -> ReLU -> BN affine
    h2 = (dot(hem_b, w2a_ref[0]) + dot(hom_b, w2a_ref[1]) + dot(he_b, w2a_ref[2])
          + dot(ho_b, w2a_ref[3]) + dot(hep_b, w2a_ref[4]) + b2a_ref[...])
    h2 = jnp.maximum(h2, 0.0).astype(bf16)
    y2 = jnp.maximum(dot(h2, w2b_ref[...]) + b2b_ref[...], 0.0)
    y2 = y2 * s2_ref[...] + t2_ref[...]
    c2 = y2.shape[1]
    o_ref[:, c0 + c1:c0 + c1 + c2] = y2.astype(o_ref.dtype)

    # branch 3: MaxPool1d(k=3, pad=1, stride=2) -> 1x1 conv -> ReLU
    pool = jnp.maximum(jnp.maximum(jnp.where(first, -jnp.inf, sd_o), he_f), ho_f)
    y3 = jnp.maximum(dot(pool.astype(bf16), w3_ref[...]) + b3_ref[...], 0.0)
    c3 = y3.shape[1]
    o_ref[:, c0 + c1 + c2:c0 + c1 + c2 + c3] = y3.astype(o_ref.dtype)


def _tail_kernel(ya_ref, yb_ref, w_ref, b_ref, o_ref):
    """Fused AvgPool1d(2) (final length 2 -> 1) + 1x1 logits conv."""
    mean = (ya_ref[...].astype(jnp.float32) + yb_ref[...].astype(jnp.float32)) * 0.5
    o_ref[...] = (jnp.dot(mean.astype(jnp.bfloat16), w_ref[...],
                          preferred_element_type=jnp.float32) + b_ref[...])


# ----------------------------------------------------------------------------
# Wrappers (only cheap slicing / pooling glue lives outside the kernels).
# ----------------------------------------------------------------------------
def _rep_spec(arr):
    zeros = (0,) * arr.ndim
    return pl.BlockSpec(arr.shape, lambda i: zeros)


def _inception_block(xe, xo, bp, *, lh, pre=None):
    """One fused Inception1D block.
    xe/xo: flattened (B*lh, C_in) even/odd stride-2 phases -> (B*lh, C_out)."""
    m, c_in = xe.shape
    b = m // lh
    c_total = (bp["w0"].shape[-1] + bp["w1b"].shape[-1]
               + bp["w2b"].shape[-1] + bp["w3"].shape[-1])
    tm = _pick_tm(b, lh)

    pre_args = [] if pre is None else [pre[0], pre[1]]
    weight_args = [bp["w0"], bp["b0"],
                   bp["w1a"], bp["b1a"], bp["w1b"], bp["b1b"], bp["s1"], bp["t1"],
                   bp["w2a"], bp["b2a"], bp["w2b"], bp["b2b"], bp["s2"], bp["t2"],
                   bp["w3"], bp["b3"]]

    slab_spec = pl.BlockSpec((tm, c_in), lambda i: (i, 0))
    return pl.pallas_call(
        functools.partial(_inception_kernel, lh=lh, has_pre=pre is not None),
        grid=(m // tm,),
        out_shape=jax.ShapeDtypeStruct((m, c_total), jnp.bfloat16),
        in_specs=[slab_spec, slab_spec]
                 + [_rep_spec(a) for a in pre_args + weight_args],
        out_specs=pl.BlockSpec((tm, c_total), lambda i: (i, 0)),
        compiler_params=pltpu.CompilerParams(
            dimension_semantics=("parallel",),
            vmem_limit_bytes=32 * 1024 * 1024),
    )(xe, xo, *pre_args, *weight_args)


def _pool_split(y2d, b, lh):
    """MaxPool1d(2,2) fused with the NEXT block's stride-2 even/odd phase
    split, in one XLA reshape+max (no intermediate pooled activation)."""
    m, c = y2d.shape
    assert lh % 4 == 0
    r = y2d.reshape(b, lh // 4, 4, c)
    xe = jnp.maximum(r[:, :, 0, :], r[:, :, 1, :]).reshape(b * (lh // 4), c)
    xo = jnp.maximum(r[:, :, 2, :], r[:, :, 3, :]).reshape(b * (lh // 4), c)
    return xe, xo


def _avgpool_logits(ya, yb, w, b):
    bsz = ya.shape[0]
    nc = w.shape[-1]
    return pl.pallas_call(
        _tail_kernel,
        out_shape=jax.ShapeDtypeStruct((bsz, nc), jnp.float32),
        in_specs=[_VMEM] * 4,
        out_specs=_VMEM,
    )(ya, yb, w, b)


def imu_network(x_ncl, kp):
    """x_ncl: (B, 3, L) float32 (PyTorch NCL).  Returns (B, num_class) f32 logits."""
    x = jnp.transpose(x_ncl, (0, 2, 1)).astype(jnp.bfloat16)      # NCL -> NLC
    b, l, c = x.shape
    lh1 = l // 2
    xe = x[:, 0::2, :].reshape(b * lh1, c)
    xo = x[:, 1::2, :].reshape(b * lh1, c)

    y = _inception_block(xe, xo, kp["block1"], lh=lh1, pre=kp["conv1"])  # conv1 fused
    xe, xo = _pool_split(y, b, lh1)                                      # maxpool1 + split
    lh2 = lh1 // 4
    y = _inception_block(xe, xo, kp["block2"], lh=lh2)
    xe, xo = _pool_split(y, b, lh2)                                      # maxpool2 + split
    lh3 = lh2 // 4
    y = _inception_block(xe, xo, kp["block3"], lh=lh3)

    assert lh3 == 2, "final temporal length must be 2 before AvgPool1d(2)+squeeze(2)"
    y = y.reshape(b, lh3, -1)
    return _avgpool_logits(y[:, 0, :], y[:, 1, :], kp["logits_w"], kp["logits_b"])


# ----------------------------------------------------------------------------
# Deterministic synthetic parameters (PyTorch layout) + one-time kernel prep.
# ----------------------------------------------------------------------------
def _conv_p(key, c_out, c_in, k):
    k1, k2 = jax.random.split(key)
    fan = float(c_in * k)
    w = jax.random.normal(k1, (c_out, c_in, k), jnp.float32) * (fan ** -0.5)
    b = jax.random.normal(k2, (c_out,), jnp.float32) * 0.01
    return w, b


def _bn_p(key, c):
    k1, k2, k3, k4 = jax.random.split(key, 4)
    gamma = 1.0 + 0.1 * jax.random.normal(k1, (c,), jnp.float32)
    beta = 0.1 * jax.random.normal(k2, (c,), jnp.float32)
    mean = 0.1 * jax.random.normal(k3, (c,), jnp.float32)
    var = jnp.abs(jax.random.normal(k4, (c,), jnp.float32)) + 1.0
    return (gamma, beta, mean, var, 1e-5)


def _inception_params(key, c_in, oc):
    ks = jax.random.split(key, 8)
    p = {}
    p["b0_w"], p["b0_b"] = _conv_p(ks[0], oc[0], c_in, 1)
    p["b1a_w"], p["b1a_b"] = _conv_p(ks[1], oc[1], c_in, 3)
    p["b1b_w"], p["b1b_b"] = _conv_p(ks[2], oc[2], oc[1], 1)
    p["bn1"] = _bn_p(ks[3], oc[2])
    p["b2a_w"], p["b2a_b"] = _conv_p(ks[4], oc[3], c_in, 5)
    p["b2b_w"], p["b2b_b"] = _conv_p(ks[5], oc[4], oc[3], 1)
    p["bn2"] = _bn_p(ks[6], oc[4])
    p["b3b_w"], p["b3b_b"] = _conv_p(ks[7], oc[5], c_in, 1)
    return p


def make_params(key, num_class):
    ks = jax.random.split(key, 5)
    params = {}
    params["conv1_w"], params["conv1_b"] = _conv_p(ks[0], 64, 3, 1)
    params["block1"] = _inception_params(ks[1], 64, [64, 32, 64, 32, 64, 64])
    params["block2"] = _inception_params(ks[2], 256, [64, 32, 64, 32, 64, 64])
    params["block3"] = _inception_params(ks[3], 256, [128, 64, 128, 64, 128, 128])
    params["logits_w"], params["logits_b"] = _conv_p(ks[4], num_class, 512, 1)
    return params


def _prep_conv(w, b):
    """Torch (C_out, C_in, k) -> (k, C_in, C_out) bf16 + (1, C_out) f32."""
    wk = jnp.transpose(w, (2, 1, 0)).astype(jnp.bfloat16)
    return wk, b.reshape(1, -1).astype(jnp.float32)


def _prep_conv1x1(w, b):
    wk, bb = _prep_conv(w, b)
    return wk[0], bb          # (C_in, C_out) bf16, (1, C_out) f32


def _prep_bn(bn):
    gamma, beta, mean, var, eps = bn
    s = gamma / jnp.sqrt(var + eps)
    return (s.reshape(1, -1).astype(jnp.float32),
            (beta - mean * s).reshape(1, -1).astype(jnp.float32))


def _prep_block(p):
    """Natural-width kernel-ready params (no column padding)."""
    w0, b0 = _prep_conv1x1(p["b0_w"], p["b0_b"])
    w1a, b1a = _prep_conv(p["b1a_w"], p["b1a_b"])
    w1b, b1b = _prep_conv1x1(p["b1b_w"], p["b1b_b"])
    s1, t1 = _prep_bn(p["bn1"])
    w2a, b2a = _prep_conv(p["b2a_w"], p["b2a_b"])
    w2b, b2b = _prep_conv1x1(p["b2b_w"], p["b2b_b"])
    s2, t2 = _prep_bn(p["bn2"])
    w3, b3 = _prep_conv1x1(p["b3b_w"], p["b3b_b"])
    return dict(w0=w0, b0=b0,
                w1a=w1a, b1a=b1a, w1b=w1b, b1b=b1b, s1=s1, t1=t1,
                w2a=w2a, b2a=b2a, w2b=w2b, b2b=b2b, s2=s2, t2=t2,
                w3=w3, b3=b3)


def prepare_kernel_params(params):
    """One-time weight transpose / BN fold (outside the jitted forward)."""
    kp = {}
    kp["conv1"] = _prep_conv1x1(params["conv1_w"], params["conv1_b"])  # (3,64), (1,64)
    kp["block1"] = _prep_block(params["block1"])
    kp["block2"] = _prep_block(params["block2"])
    kp["block3"] = _prep_block(params["block3"])
    kp["logits_w"], kp["logits_b"] = _prep_conv1x1(params["logits_w"],
                                                   params["logits_b"])
    return kp


# ----------------------------------------------------------------------------
if __name__ == "__main__":
    NUM_CLASS = 10
    B, C_IN, L = 2, 3, 64      # L=64 -> final temporal length 1 (squeeze(2) valid)

    root = jax.random.PRNGKey(0)
    k_params, k_x = jax.random.split(root)
    params = make_params(k_params, NUM_CLASS)
    kparams = prepare_kernel_params(params)
    x = jax.random.normal(k_x, (B, C_IN, L), jnp.float32)   # PyTorch NCL input

    fwd = jax.jit(imu_network)
    logits = fwd(x, kparams)
    jax.block_until_ready(logits)

    assert logits.shape == (B, NUM_CLASS), logits.shape
    assert logits.dtype == jnp.float32
    print("KERNEL_OK")
</pallas_src>

<mosaic_0001>
module attributes {stable_mosaic.version = 11 : i64} {
  func.func @_inception_kernel(%arg0: i32, %arg1: memref<32x3xbf16, #tpu.memory_space<vmem>>, %arg2: memref<32x3xbf16, #tpu.memory_space<vmem>>, %arg3: memref<3x64xbf16, #tpu.memory_space<vmem>>, %arg4: memref<1x64xf32, #tpu.memory_space<vmem>>, %arg5: memref<64x64xbf16, #tpu.memory_space<vmem>>, %arg6: memref<1x64xf32, #tpu.memory_space<vmem>>, %arg7: memref<3x64x32xbf16, #tpu.memory_space<vmem>>, %arg8: memref<1x32xf32, #tpu.memory_space<vmem>>, %arg9: memref<32x64xbf16, #tpu.memory_space<vmem>>, %arg10: memref<1x64xf32, #tpu.memory_space<vmem>>, %arg11: memref<1x64xf32, #tpu.memory_space<vmem>>, %arg12: memref<1x64xf32, #tpu.memory_space<vmem>>, %arg13: memref<5x64x32xbf16, #tpu.memory_space<vmem>>, %arg14: memref<1x32xf32, #tpu.memory_space<vmem>>, %arg15: memref<32x64xbf16, #tpu.memory_space<vmem>>, %arg16: memref<1x64xf32, #tpu.memory_space<vmem>>, %arg17: memref<1x64xf32, #tpu.memory_space<vmem>>, %arg18: memref<1x64xf32, #tpu.memory_space<vmem>>, %arg19: memref<64x64xbf16, #tpu.memory_space<vmem>>, %arg20: memref<1x64xf32, #tpu.memory_space<vmem>>, %arg21: memref<32x256xbf16, #tpu.memory_space<vmem>>) attributes {dimension_semantics = [#tpu.dimension_semantics<parallel>], iteration_bounds = array<i64: 2>, scalar_prefetch = 0 : i64, scratch_operands = 0 : i64, tpu.core_type = #tpu.core_type<tc>, window_params = [{transform_indices = @transform_0, window_bounds = array<i64: 32, 3>}, {transform_indices = @transform_1, window_bounds = array<i64: 32, 3>}, {pipeline_mode = #tpu.pipeline_mode<synchronous>, transform_indices = @transform_2, window_bounds = array<i64: 3, 64>}, {pipeline_mode = #tpu.pipeline_mode<synchronous>, transform_indices = @transform_3, window_bounds = array<i64: 1, 64>}, {pipeline_mode = #tpu.pipeline_mode<synchronous>, transform_indices = @transform_4, window_bounds = array<i64: 64, 64>}, {pipeline_mode = #tpu.pipeline_mode<synchronous>, transform_indices = @transform_5, window_bounds = array<i64: 1, 64>}, {pipeline_mode = #tpu.pipeline_mode<synchronous>, transform_indices = @transform_6, window_bounds = array<i64: 3, 64, 32>}, {pipeline_mode = #tpu.pipeline_mode<synchronous>, transform_indices = @transform_7, window_bounds = array<i64: 1, 32>}, {pipeline_mode = #tpu.pipeline_mode<synchronous>, transform_indices = @transform_8, window_bounds = array<i64: 32, 64>}, {pipeline_mode = #tpu.pipeline_mode<synchronous>, transform_indices = @transform_9, window_bounds = array<i64: 1, 64>}, {pipeline_mode = #tpu.pipeline_mode<synchronous>, transform_indices = @transform_10, window_bounds = array<i64: 1, 64>}, {pipeline_mode = #tpu.pipeline_mode<synchronous>, transform_indices = @transform_11, window_bounds = array<i64: 1, 64>}, {pipeline_mode = #tpu.pipeline_mode<synchronous>, transform_indices = @transform_12, window_bounds = array<i64: 5, 64, 32>}, {pipeline_mode = #tpu.pipeline_mode<synchronous>, transform_indices = @transform_13, window_bounds = array<i64: 1, 32>}, {pipeline_mode = #tpu.pipeline_mode<synchronous>, transform_indices = @transform_14, window_bounds = array<i64: 32, 64>}, {pipeline_mode = #tpu.pipeline_mode<synchronous>, transform_indices = @transform_15, window_bounds = array<i64: 1, 64>}, {pipeline_mode = #tpu.pipeline_mode<synchronous>, transform_indices = @transform_16, window_bounds = array<i64: 1, 64>}, {pipeline_mode = #tpu.pipeline_mode<synchronous>, transform_indices = @transform_17, window_bounds = array<i64: 1, 64>}, {pipeline_mode = #tpu.pipeline_mode<synchronous>, transform_indices = @transform_18, window_bounds = array<i64: 64, 64>}, {pipeline_mode = #tpu.pipeline_mode<synchronous>, transform_indices = @transform_19, window_bounds = array<i64: 1, 64>}, {transform_indices = @transform_20, window_bounds = array<i64: 32, 256>}]} {
    %c32_i32 = arith.constant 32 : i32
    %0 = arith.muli %arg0, %c32_i32 : i32
    %1 = tpu.iota {dimensions = array<i32: 0>} : vector<32x1xi32>
    %2 = vector.broadcast %0 : i32 to vector<32x1xi32>
    %3 = arith.addi %2, %1 : vector<32x1xi32>
    %c32_i32_0 = arith.constant 32 : i32
    %c0_i32 = arith.constant 0 : i32
    %4 = arith.cmpi eq, %c32_i32_0, %c0_i32 : i32
    %c1_i32 = arith.constant 1 : i32
    %5 = arith.select %4, %c1_i32, %c32_i32_0 : i32
    %6 = vector.broadcast %5 : i32 to vector<32x1xi32>
    %7 = arith.remsi %3, %6 : vector<32x1xi32>
    %c0_i32_1 = arith.constant 0 : i32
    %8 = vector.broadcast %c0_i32_1 : i32 to vector<32x1xi32>
    %9 = arith.cmpi ne, %7, %8 : vector<32x1xi32>
    %c0_i32_2 = arith.constant 0 : i32
    %10 = vector.broadcast %c0_i32_2 : i32 to vector<32x1xi32>
    %11 = arith.cmpi slt, %7, %10 : vector<32x1xi32>
    %c0_i32_3 = arith.constant 0 : i32
    %12 = arith.cmpi slt, %5, %c0_i32_3 : i32
    %13 = vector.broadcast %12 : i1 to vector<32x1xi1>
    %14 = vector.broadcast %13 : vector<32x1xi1> to vector<32x1xi1>
    %15 = arith.xori %11, %14 : vector<32x1xi1>
    %16 = arith.andi %15, %9 : vector<32x1xi1>
    %17 = vector.broadcast %5 : i32 to vector<32x1xi32>
    %18 = arith.addi %7, %17 : vector<32x1xi32>
    %19 = arith.select %16, %18, %7 : vector<32x1xi1>, vector<32x1xi32>
    %c0_i32_4 = arith.constant 0 : i32
    %20 = vector.broadcast %c0_i32_4 : i32 to vector<32x1xi32>
    %21 = arith.cmpi eq, %19, %20 : vector<32x1xi32>
    %c31_i32 = arith.constant 31 : i32
    %22 = vector.broadcast %c31_i32 : i32 to vector<32x1xi32>
    %23 = arith.cmpi eq, %19, %22 : vector<32x1xi32>
    %c0 = arith.constant 0 : index
    %c0_5 = arith.constant 0 : index
    %24 = vector.load %arg1[%c0, %c0_5] : memref<32x3xbf16, #tpu.memory_space<vmem>>, vector<32x3xbf16>
    %c0_6 = arith.constant 0 : index
    %c0_7 = arith.constant 0 : index
    %25 = vector.load %arg3[%c0_6, %c0_7] : memref<3x64xbf16, #tpu.memory_space<vmem>>, vector<3x64xbf16>
    %cst = arith.constant dense<0.000000e+00> : vector<32x64xf32>
    %26 = tpu.matmul %24, %25, %cst {dimension_numbers = #tpu.dot_dimension_numbers<[1], [0], [0], [1], [0, 0, 1, 1], [], []>} : vector<32x3xbf16>, vector<3x64xbf16>, vector<32x64xf32> -> vector<32x64xf32>
    %c0_8 = arith.constant 0 : index
    %c0_9 = arith.constant 0 : index
    %27 = vector.load %arg4[%c0_8, %c0_9] : memref<1x64xf32, #tpu.memory_space<vmem>>, vector<1x64xf32>
    %28 = vector.broadcast %27 : vector<1x64xf32> to vector<32x64xf32>
    %29 = arith.addf %26, %28 : vector<32x64xf32>
    %c0_10 = arith.constant 0 : index
    %c0_11 = arith.constant 0 : index
    %30 = vector.load %arg2[%c0_10, %c0_11] : memref<32x3xbf16, #tpu.memory_space<vmem>>, vector<32x3xbf16>
    %c0_12 = arith.constant 0 : index
    %c0_13 = arith.constant 0 : index
    %31 = vector.load %arg3[%c0_12, %c0_13] : memref<3x64xbf16, #tpu.memory_space<vmem>>, vector<3x64xbf16>
    %cst_14 = arith.constant dense<0.000000e+00> : vector<32x64xf32>
    %32 = tpu.matmul %30, %31, %cst_14 {dimension_numbers = #tpu.dot_dimension_numbers<[1], [0], [0], [1], [0, 0, 1, 1], [], []>} : vector<32x3xbf16>, vector<3x64xbf16>, vector<32x64xf32> -> vector<32x64xf32>
    %c0_15 = arith.constant 0 : index
    %c0_16 = arith.constant 0 : index
    %33 = vector.load %arg4[%c0_15, %c0_16] : memref<1x64xf32, #tpu.memory_space<vmem>>, vector<1x64xf32>
    %34 = vector.broadcast %33 : vector<1x64xf32> to vector<32x64xf32>
    %35 = arith.addf %32, %34 : vector<32x64xf32>
    %36 = arith.truncf %29 : vector<32x64xf32> to vector<32x64xbf16>
    %37 = arith.truncf %35 : vector<32x64xf32> to vector<32x64xbf16>
    %cst_17 = arith.constant 0.000000e+00 : f32
    %38 = vector.broadcast %cst_17 : f32 to vector<1x64xf32>
    %39 = vector.extract_strided_slice %35 {offsets = [0, 0], sizes = [31, 64], strides = [1, 1]} : vector<32x64xf32> to vector<31x64xf32>
    %40 = tpu.concatenate %38, %39 in 0 : vector<1x64xf32>, vector<31x64xf32> -> vector<32x64xf32>
    %41 = vector.extract_strided_slice %29 {offsets = [0, 0], sizes = [31, 64], strides = [1, 1]} : vector<32x64xf32> to vector<31x64xf32>
    %42 = tpu.concatenate %38, %41 in 0 : vector<1x64xf32>, vector<31x64xf32> -> vector<32x64xf32>
    %43 = vector.extract_strided_slice %29 {offsets = [1, 0], sizes = [31, 64], strides = [1, 1]} : vector<32x64xf32> to vector<31x64xf32>
    %44 = tpu.concatenate %43, %38 in 0 : vector<31x64xf32>, vector<1x64xf32> -> vector<32x64xf32>
    %cst_18 = arith.constant 0.000000e+00 : f32
    %45 = vector.shape_cast %21 : vector<32x1xi1> to vector<32x1xi1>
    %46 = vector.broadcast %45 : vector<32x1xi1> to vector<32x64xi1>
    %47 = vector.broadcast %cst_18 : f32 to vector<32x64xf32>
    %48 = arith.select %46, %47, %40 : vector<32x64xi1>, vector<32x64xf32>
    %49 = arith.truncf %48 : vector<32x64xf32> to vector<32x64xbf16>
    %cst_19 = arith.constant 0.000000e+00 : f32
    %50 = vector.shape_cast %21 : vector<32x1xi1> to vector<32x1xi1>
    %51 = vector.broadcast %50 : vector<32x1xi1> to vector<32x64xi1>
    %52 = vector.broadcast %cst_19 : f32 to vector<32x64xf32>
    %53 = arith.select %51, %52, %42 : vector<32x64xi1>, vector<32x64xf32>
    %54 = arith.truncf %53 : vector<32x64xf32> to vector<32x64xbf16>
    %cst_20 = arith.constant 0.000000e+00 : f32
    %55 = vector.shape_cast %23 : vector<32x1xi1> to vector<32x1xi1>
    %56 = vector.broadcast %55 : vector<32x1xi1> to vector<32x64xi1>
    %57 = vector.broadcast %cst_20 : f32 to vector<32x64xf32>
    %58 = arith.select %56, %57, %44 : vector<32x64xi1>, vector<32x64xf32>
    %59 = arith.truncf %58 : vector<32x64xf32> to vector<32x64xbf16>
    %c0_21 = arith.constant 0 : index
    %c0_22 = arith.constant 0 : index
    %60 = vector.load %arg5[%c0_21, %c0_22] : memref<64x64xbf16, #tpu.memory_space<vmem>>, vector<64x64xbf16>
    %cst_23 = arith.constant dense<0.000000e+00> : vector<32x64xf32>
    %61 = tpu.matmul %36, %60, %cst_23 {dimension_numbers = #tpu.dot_dimension_numbers<[1], [0], [0], [1], [0, 0, 1, 1], [], []>} : vector<32x64xbf16>, vector<64x64xbf16>, vector<32x64xf32> -> vector<32x64xf32>
    %c0_24 = arith.constant 0 : index
    %c0_25 = arith.constant 0 : index
    %62 = vector.load %arg6[%c0_24, %c0_25] : memref<1x64xf32, #tpu.memory_space<vmem>>, vector<1x64xf32>
    %63 = vector.broadcast %62 : vector<1x64xf32> to vector<32x64xf32>
    %64 = arith.addf %61, %63 : vector<32x64xf32>
    %cst_26 = arith.constant 0.000000e+00 : f32
    %65 = vector.broadcast %cst_26 : f32 to vector<32x64xf32>
    %66 = arith.maximumf %64, %65 : vector<32x64xf32>
    %67 = arith.truncf %66 : vector<32x64xf32> to vector<32x64xbf16>
    %c0_27 = arith.constant 0 : index
    %c0_28 = arith.constant 0 : index
    %68 = vector.load %arg21[%c0_27, %c0_28] : memref<32x256xbf16, #tpu.memory_space<vmem>>, vector<32x64xbf16>
    tpu.vector_store %arg21[%c0_27, %c0_28], %67 {strides = array<i32>} : memref<32x256xbf16, #tpu.memory_space<vmem>>, vector<32x64xbf16>,
    %c0_29 = arith.constant 0 : index
    %c0_30 = arith.constant 0 : index
    %c0_31 = arith.constant 0 : index
    %69 = vector.load %arg7[%c0_29, %c0_30, %c0_31] : memref<3x64x32xbf16, #tpu.memory_space<vmem>>, vector<1x64x32xbf16>
    %70 = vector.shape_cast %69 : vector<1x64x32xbf16> to vector<64x32xbf16>
    %cst_32 = arith.constant dense<0.000000e+00> : vector<32x32xf32>
    %71 = tpu.matmul %49, %70, %cst_32 {dimension_numbers = #tpu.dot_dimension_numbers<[1], [0], [0], [1], [0, 0, 1, 1], [], []>} : vector<32x64xbf16>, vector<64x32xbf16>, vector<32x32xf32> -> vector<32x32xf32>
    %c1 = arith.constant 1 : index
    %c0_33 = arith.constant 0 : index
    %c0_34 = arith.constant 0 : index
    %72 = vector.load %arg7[%c1, %c0_33, %c0_34] : memref<3x64x32xbf16, #tpu.memory_space<vmem>>, vector<1x64x32xbf16>
    %73 = vector.shape_cast %72 : vector<1x64x32xbf16> to vector<64x32xbf16>
    %cst_35 = arith.constant dense<0.000000e+00> : vector<32x32xf32>
    %74 = tpu.matmul %36, %73, %cst_35 {dimension_numbers = #tpu.dot_dimension_numbers<[1], [0], [0], [1], [0, 0, 1, 1], [], []>} : vector<32x64xbf16>, vector<64x32xbf16>, vector<32x32xf32> -> vector<32x32xf32>
    %75 = arith.addf %71, %74 : vector<32x32xf32>
    %c2 = arith.constant 2 : index
    %c0_36 = arith.constant 0 : index
    %c0_37 = arith.constant 0 : index
    %76 = vector.load %arg7[%c2, %c0_36, %c0_37] : memref<3x64x32xbf16, #tpu.memory_space<vmem>>, vector<1x64x32xbf16>
    %77 = vector.shape_cast %76 : vector<1x64x32xbf16> to vector<64x32xbf16>
    %cst_38 = arith.constant dense<0.000000e+00> : vector<32x32xf32>
    %78 = tpu.matmul %37, %77, %cst_38 {dimension_numbers = #tpu.dot_dimension_numbers<[1], [0], [0], [1], [0, 0, 1, 1], [], []>} : vector<32x64xbf16>, vector<64x32xbf16>, vector<32x32xf32> -> vector<32x32xf32>
    %79 = arith.addf %75, %78 : vector<32x32xf32>
    %c0_39 = arith.constant 0 : index
    %c0_40 = arith.constant 0 : index
    %80 = vector.load %arg8[%c0_39, %c0_40] : memref<1x32xf32, #tpu.memory_space<vmem>>, vector<1x32xf32>
    %81 = vector.broadcast %80 : vector<1x32xf32> to vector<32x32xf32>
    %82 = arith.addf %79, %81 : vector<32x32xf32>
    %cst_41 = arith.constant 0.000000e+00 : f32
    %83 = vector.broadcast %cst_41 : f32 to vector<32x32xf32>
    %84 = arith.maximumf %82, %83 : vector<32x32xf32>
    %85 = arith.truncf %84 : vector<32x32xf32> to vector<32x32xbf16>
    %c0_42 = arith.constant 0 : index
    %c0_43 = arith.constant 0 : index
    %86 = vector.load %arg9[%c0_42, %c0_43] : memref<32x64xbf16, #tpu.memory_space<vmem>>, vector<32x64xbf16>
    %cst_44 = arith.constant dense<0.000000e+00> : vector<32x64xf32>
    %87 = tpu.matmul %85, %86, %cst_44 {dimension_numbers = #tpu.dot_dimension_numbers<[1], [0], [0], [1], [0, 0, 1, 1], [], []>} : vector<32x32xbf16>, vector<32x64xbf16>, vector<32x64xf32> -> vector<32x64xf32>
    %c0_45 = arith.constant 0 : index
    %c0_46 = arith.constant 0 : index
    %88 = vector.load %arg10[%c0_45, %c0_46] : memref<1x64xf32, #tpu.memory_space<vmem>>, vector<1x64xf32>
    %89 = vector.broadcast %88 : vector<1x64xf32> to vector<32x64xf32>
    %90 = arith.addf %87, %89 : vector<32x64xf32>
    %cst_47 = arith.constant 0.000000e+00 : f32
    %91 = vector.broadcast %cst_47 : f32 to vector<32x64xf32>
    %92 = arith.maximumf %90, %91 : vector<32x64xf32>
    %c0_48 = arith.constant 0 : index
    %c0_49 = arith.constant 0 : index
    %93 = vector.load %arg11[%c0_48, %c0_49] : memref<1x64xf32, #tpu.memory_space<vmem>>, vector<1x64xf32>
    %94 = vector.broadcast %93 : vector<1x64xf32> to vector<32x64xf32>
    %95 = arith.mulf %92, %94 : vector<32x64xf32>
    %c0_50 = arith.constant 0 : index
    %c0_51 = arith.constant 0 : index
    %96 = vector.load %arg12[%c0_50, %c0_51] : memref<1x64xf32, #tpu.memory_space<vmem>>, vector<1x64xf32>
    %97 = vector.broadcast %96 : vector<1x64xf32> to vector<32x64xf32>
    %98 = arith.addf %95, %97 : vector<32x64xf32>
    %99 = arith.truncf %98 : vector<32x64xf32> to vector<32x64xbf16>
    %c0_52 = arith.constant 0 : index
    %c64 = arith.constant 64 : index
    %100 = vector.load %arg21[%c0_52, %c64] : memref<32x256xbf16, #tpu.memory_space<vmem>>, vector<32x64xbf16>
    tpu.vector_store %arg21[%c0_52, %c64], %99 {strides = array<i32>} : memref<32x256xbf16, #tpu.memory_space<vmem>>, vector<32x64xbf16>,
    %c0_53 = arith.constant 0 : index
    %c0_54 = arith.constant 0 : index
    %c0_55 = arith.constant 0 : index
    %101 = vector.load %arg13[%c0_53, %c0_54, %c0_55] : memref<5x64x32xbf16, #tpu.memory_space<vmem>>, vector<1x64x32xbf16>
    %102 = vector.shape_cast %101 : vector<1x64x32xbf16> to vector<64x32xbf16>
    %cst_56 = arith.constant dense<0.000000e+00> : vector<32x32xf32>
    %103 = tpu.matmul %54, %102, %cst_56 {dimension_numbers = #tpu.dot_dimension_numbers<[1], [0], [0], [1], [0, 0, 1, 1], [], []>} : vector<32x64xbf16>, vector<64x32xbf16>, vector<32x32xf32> -> vector<32x32xf32>
    %c1_57 = arith.constant 1 : index
    %c0_58 = arith.constant 0 : index
    %c0_59 = arith.constant 0 : index
    %104 = vector.load %arg13[%c1_57, %c0_58, %c0_59] : memref<5x64x32xbf16, #tpu.memory_space<vmem>>, vector<1x64x32xbf16>
    %105 = vector.shape_cast %104 : vector<1x64x32xbf16> to vector<64x32xbf16>
    %cst_60 = arith.constant dense<0.000000e+00> : vector<32x32xf32>
    %106 = tpu.matmul %49, %105, %cst_60 {dimension_numbers = #tpu.dot_dimension_numbers<[1], [0], [0], [1], [0, 0, 1, 1], [], []>} : vector<32x64xbf16>, vector<64x32xbf16>, vector<32x32xf32> -> vector<32x32xf32>
    %107 = arith.addf %103, %106 : vector<32x32xf32>
    %c2_61 = arith.constant 2 : index
    %c0_62 = arith.constant 0 : index
    %c0_63 = arith.constant 0 : index
    %108 = vector.load %arg13[%c2_61, %c0_62, %c0_63] : memref<5x64x32xbf16, #tpu.memory_space<vmem>>, vector<1x64x32xbf16>
    %109 = vector.shape_cast %108 : vector<1x64x32xbf16> to vector<64x32xbf16>
    %cst_64 = arith.constant dense<0.000000e+00> : vector<32x32xf32>
    %110 = tpu.matmul %36, %109, %cst_64 {dimension_numbers = #tpu.dot_dimension_numbers<[1], [0], [0], [1], [0, 0, 1, 1], [], []>} : vector<32x64xbf16>, vector<64x32xbf16>, vector<32x32xf32> -> vector<32x32xf32>
    %111 = arith.addf %107, %110 : vector<32x32xf32>
    %c3 = arith.constant 3 : index
    %c0_65 = arith.constant 0 : index
    %c0_66 = arith.constant 0 : index
    %112 = vector.load %arg13[%c3, %c0_65, %c0_66] : memref<5x64x32xbf16, #tpu.memory_space<vmem>>, vector<1x64x32xbf16>
    %113 = vector.shape_cast %112 : vector<1x64x32xbf16> to vector<64x32xbf16>
    %cst_67 = arith.constant dense<0.000000e+00> : vector<32x32xf32>
    %114 = tpu.matmul %37, %113, %cst_67 {dimension_numbers = #tpu.dot_dimension_numbers<[1], [0], [0], [1], [0, 0, 1, 1], [], []>} : vector<32x64xbf16>, vector<64x32xbf16>, vector<32x32xf32> -> vector<32x32xf32>
    %115 = arith.addf %111, %114 : vector<32x32xf32>
    %c4 = arith.constant 4 : index
    %c0_68 = arith.constant 0 : index
    %c0_69 = arith.constant 0 : index
    %116 = vector.load %arg13[%c4, %c0_68, %c0_69] : memref<5x64x32xbf16, #tpu.memory_space<vmem>>, vector<1x64x32xbf16>
    %117 = vector.shape_cast %116 : vector<1x64x32xbf16> to vector<64x32xbf16>
    %cst_70 = arith.constant dense<0.000000e+00> : vector<32x32xf32>
    %118 = tpu.matmul %59, %117, %cst_70 {dimension_numbers = #tpu.dot_dimension_numbers<[1], [0], [0], [1], [0, 0, 1, 1], [], []>} : vector<32x64xbf16>, vector<64x32xbf16>, vector<32x32xf32> -> vector<32x32xf32>
    %119 = arith.addf %115, %118 : vector<32x32xf32>
    %c0_71 = arith.constant 0 : index
    %c0_72 = arith.constant 0 : index
    %120 = vector.load %arg14[%c0_71, %c0_72] : memref<1x32xf32, #tpu.memory_space<vmem>>, vector<1x32xf32>
    %121 = vector.broadcast %120 : vector<1x32xf32> to vector<32x32xf32>
    %122 = arith.addf %119, %121 : vector<32x32xf32>
    %cst_73 = arith.constant 0.000000e+00 : f32
    %123 = vector.broadcast %cst_73 : f32 to vector<32x32xf32>
    %124 = arith.maximumf %122, %123 : vector<32x32xf32>
    %125 = arith.truncf %124 : vector<32x32xf32> to vector<32x32xbf16>
    %c0_74 = arith.constant 0 : index
    %c0_75 = arith.constant 0 : index
    %126 = vector.load %arg15[%c0_74, %c0_75] : memref<32x64xbf16, #tpu.memory_space<vmem>>, vector<32x64xbf16>
    %cst_76 = arith.constant dense<0.000000e+00> : vector<32x64xf32>
    %127 = tpu.matmul %125, %126, %cst_76 {dimension_numbers = #tpu.dot_dimension_numbers<[1], [0], [0], [1], [0, 0, 1, 1], [], []>} : vector<32x32xbf16>, vector<32x64xbf16>, vector<32x64xf32> -> vector<32x64xf32>
    %c0_77 = arith.constant 0 : index
    %c0_78 = arith.constant 0 : index
    %128 = vector.load %arg16[%c0_77, %c0_78] : memref<1x64xf32, #tpu.memory_space<vmem>>, vector<1x64xf32>
    %129 = vector.broadcast %128 : vector<1x64xf32> to vector<32x64xf32>
    %130 = arith.addf %127, %129 : vector<32x64xf32>
    %cst_79 = arith.constant 0.000000e+00 : f32
    %131 = vector.broadcast %cst_79 : f32 to vector<32x64xf32>
    %132 = arith.maximumf %130, %131 : vector<32x64xf32>
    %c0_80 = arith.constant 0 : index
    %c0_81 = arith.constant 0 : index
    %133 = vector.load %arg17[%c0_80, %c0_81] : memref<1x64xf32, #tpu.memory_space<vmem>>, vector<1x64xf32>
    %134 = vector.broadcast %133 : vector<1x64xf32> to vector<32x64xf32>
    %135 = arith.mulf %132, %134 : vector<32x64xf32>
    %c0_82 = arith.constant 0 : index
    %c0_83 = arith.constant 0 : index
    %136 = vector.load %arg18[%c0_82, %c0_83] : memref<1x64xf32, #tpu.memory_space<vmem>>, vector<1x64xf32>
    %137 = vector.broadcast %136 : vector<1x64xf32> to vector<32x64xf32>
    %138 = arith.addf %135, %137 : vector<32x64xf32>
    %139 = arith.truncf %138 : vector<32x64xf32> to vector<32x64xbf16>
    %c0_84 = arith.constant 0 : index
    %c128 = arith.constant 128 : index
    %140 = vector.load %arg21[%c0_84, %c128] : memref<32x256xbf16, #tpu.memory_space<vmem>>, vector<32x64xbf16>
    tpu.vector_store %arg21[%c0_84, %c128], %139 {strides = array<i32>} : memref<32x256xbf16, #tpu.memory_space<vmem>>, vector<32x64xbf16>,
    %cst_85 = arith.constant 0xFF800000 : f32
    %141 = vector.shape_cast %21 : vector<32x1xi1> to vector<32x1xi1>
    %142 = vector.broadcast %141 : vector<32x1xi1> to vector<32x64xi1>
    %143 = vector.broadcast %cst_85 : f32 to vector<32x64xf32>
    %144 = arith.select %142, %143, %40 : vector<32x64xi1>, vector<32x64xf32>
    %145 = arith.maximumf %144, %29 : vector<32x64xf32>
    %146 = arith.maximumf %145, %35 : vector<32x64xf32>
    %147 = arith.truncf %146 : vector<32x64xf32> to vector<32x64xbf16>
    %c0_86 = arith.constant 0 : index
    %c0_87 = arith.constant 0 : index
    %148 = vector.load %arg19[%c0_86, %c0_87] : memref<64x64xbf16, #tpu.memory_space<vmem>>, vector<64x64xbf16>
    %cst_88 = arith.constant dense<0.000000e+00> : vector<32x64xf32>
    %149 = tpu.matmul %147, %148, %cst_88 {dimension_numbers = #tpu.dot_dimension_numbers<[1], [0], [0], [1], [0, 0, 1, 1], [], []>} : vector<32x64xbf16>, vector<64x64xbf16>, vector<32x64xf32> -> vector<32x64xf32>
    %c0_89 = arith.constant 0 : index
    %c0_90 = arith.constant 0 : index
    %150 = vector.load %arg20[%c0_89, %c0_90] : memref<1x64xf32, #tpu.memory_space<vmem>>, vector<1x64xf32>
    %151 = vector.broadcast %150 : vector<1x64xf32> to vector<32x64xf32>
    %152 = arith.addf %149, %151 : vector<32x64xf32>
    %cst_91 = arith.constant 0.000000e+00 : f32
    %153 = vector.broadcast %cst_91 : f32 to vector<32x64xf32>
    %154 = arith.maximumf %152, %153 : vector<32x64xf32>
    %155 = arith.truncf %154 : vector<32x64xf32> to vector<32x64xbf16>
    %c0_92 = arith.constant 0 : index
    %c192 = arith.constant 192 : index
    %156 = vector.load %arg21[%c0_92, %c192] : memref<32x256xbf16, #tpu.memory_space<vmem>>, vector<32x64xbf16>
    tpu.vector_store %arg21[%c0_92, %c192], %155 {strides = array<i32>} : memref<32x256xbf16, #tpu.memory_space<vmem>>, vector<32x64xbf16>,
    return
  }
  func.func @transform_0(%arg0: i32) -> (i32, i32) {
    %c0_i32 = arith.constant 0 : i32
    %c0_i32_0 = arith.constant 0 : i32
    return %arg0, %c0_i32 : i32, i32
  }
  func.func @transform_1(%arg0: i32) -> (i32, i32) {
    %c0_i32 = arith.constant 0 : i32
    %c0_i32_0 = arith.constant 0 : i32
    return %arg0, %c0_i32 : i32, i32
  }
  func.func @transform_2(%arg0: i32) -> (i32, i32) {
    %c0_i32 = arith.constant 0 : i32
    %c0_i32_0 = arith.constant 0 : i32
    %c0_i32_1 = arith.constant 0 : i32
    return %c0_i32, %c0_i32_0 : i32, i32
  }
  func.func @transform_3(%arg0: i32) -> (i32, i32) {
    %c0_i32 = arith.constant 0 : i32
    %c0_i32_0 = arith.constant 0 : i32
    %c0_i32_1 = arith.constant 0 : i32
    return %c0_i32, %c0_i32_0 : i32, i32
  }
  func.func @transform_4(%arg0: i32) -> (i32, i32) {
    %c0_i32 = arith.constant 0 : i32
    %c0_i32_0 = arith.constant 0 : i32
    %c0_i32_1 = arith.constant 0 : i32
    return %c0_i32, %c0_i32_0 : i32, i32
  }
  func.func @transform_5(%arg0: i32) -> (i32, i32) {
    %c0_i32 = arith.constant 0 : i32
    %c0_i32_0 = arith.constant 0 : i32
    %c0_i32_1 = arith.constant 0 : i32
    return %c0_i32, %c0_i32_0 : i32, i32
  }
  func.func @transform_6(%arg0: i32) -> (i32, i32, i32) {
    %c0_i32 = arith.constant 0 : i32
    %c0_i32_0 = arith.constant 0 : i32
    %c0_i32_1 = arith.constant 0 : i32
    %c0_i32_2 = arith.constant 0 : i32
    return %c0_i32, %c0_i32_0, %c0_i32_1 : i32, i32, i32
  }
  func.func @transform_7(%arg0: i32) -> (i32, i32) {
    %c0_i32 = arith.constant 0 : i32
    %c0_i32_0 = arith.constant 0 : i32
    %c0_i32_1 = arith.constant 0 : i32
    return %c0_i32, %c0_i32_0 : i32, i32
  }
  func.func @transform_8(%arg0: i32) -> (i32, i32) {
    %c0_i32 = arith.constant 0 : i32
    %c0_i32_0 = arith.constant 0 : i32
    %c0_i32_1 = arith.constant 0 : i32
    return %c0_i32, %c0_i32_0 : i32, i32
  }
  func.func @transform_9(%arg0: i32) -> (i32, i32) {
    %c0_i32 = arith.constant 0 : i32
    %c0_i32_0 = arith.constant 0 : i32
    %c0_i32_1 = arith.constant 0 : i32
    return %c0_i32, %c0_i32_0 : i32, i32
  }
  func.func @transform_10(%arg0: i32) -> (i32, i32) {
    %c0_i32 = arith.constant 0 : i32
    %c0_i32_0 = arith.constant 0 : i32
    %c0_i32_1 = arith.constant 0 : i32
    return %c0_i32, %c0_i32_0 : i32, i32
  }
  func.func @transform_11(%arg0: i32) -> (i32, i32) {
    %c0_i32 = arith.constant 0 : i32
    %c0_i32_0 = arith.constant 0 : i32
    %c0_i32_1 = arith.constant 0 : i32
    return %c0_i32, %c0_i32_0 : i32, i32
  }
  func.func @transform_12(%arg0: i32) -> (i32, i32, i32) {
    %c0_i32 = arith.constant 0 : i32
    %c0_i32_0 = arith.constant 0 : i32
    %c0_i32_1 = arith.constant 0 : i32
    %c0_i32_2 = arith.constant 0 : i32
    return %c0_i32, %c0_i32_0, %c0_i32_1 : i32, i32, i32
  }
  func.func @transform_13(%arg0: i32) -> (i32, i32) {
    %c0_i32 = arith.constant 0 : i32
    %c0_i32_0 = arith.constant 0 : i32
    %c0_i32_1 = arith.constant 0 : i32
    return %c0_i32, %c0_i32_0 : i32, i32
  }
  func.func @transform_14(%arg0: i32) -> (i32, i32) {
    %c0_i32 = arith.constant 0 : i32
    %c0_i32_0 = arith.constant 0 : i32
    %c0_i32_1 = arith.constant 0 : i32
    return %c0_i32, %c0_i32_0 : i32, i32
  }
  func.func @transform_15(%arg0: i32) -> (i32, i32) {
    %c0_i32 = arith.constant 0 : i32
    %c0_i32_0 = arith.constant 0 : i32
    %c0_i32_1 = arith.constant 0 : i32
    return %c0_i32, %c0_i32_0 : i32, i32
  }
  func.func @transform_16(%arg0: i32) -> (i32, i32) {
    %c0_i32 = arith.constant 0 : i32
    %c0_i32_0 = arith.constant 0 : i32
    %c0_i32_1 = arith.constant 0 : i32
    return %c0_i32, %c0_i32_0 : i32, i32
  }
  func.func @transform_17(%arg0: i32) -> (i32, i32) {
    %c0_i32 = arith.constant 0 : i32
    %c0_i32_0 = arith.constant 0 : i32
    %c0_i32_1 = arith.constant 0 : i32
    return %c0_i32, %c0_i32_0 : i32, i32
  }
  func.func @transform_18(%arg0: i32) -> (i32, i32) {
    %c0_i32 = arith.constant 0 : i32
    %c0_i32_0 = arith.constant 0 : i32
    %c0_i32_1 = arith.constant 0 : i32
    return %c0_i32, %c0_i32_0 : i32, i32
  }
  func.func @transform_19(%arg0: i32) -> (i32, i32) {
    %c0_i32 = arith.constant 0 : i32
    %c0_i32_0 = arith.constant 0 : i32
    %c0_i32_1 = arith.constant 0 : i32
    return %c0_i32, %c0_i32_0 : i32, i32
  }
  func.func @transform_20(%arg0: i32) -> (i32, i32) {
    %c0_i32 = arith.constant 0 : i32
    %c0_i32_0 = arith.constant 0 : i32
    return %arg0, %c0_i32 : i32, i32
  }
}

module attributes {stable_mosaic.version = 11 : i64} {
  func.func @_inception_kernel(%arg0: i32, %arg1: memref<8x256xbf16, #tpu.memory_space<vmem>>, %arg2: memref<8x256xbf16, #tpu.memory_space<vmem>>, %arg3: memref<256x64xbf16, #tpu.memory_space<vmem>>, %arg4: memref<1x64xf32, #tpu.memory_space<vmem>>, %arg5: memref<3x256x32xbf16, #tpu.memory_space<vmem>>, %arg6: memref<1x32xf32, #tpu.memory_space<vmem>>, %arg7: memref<32x64xbf16, #tpu.memory_space<vmem>>, %arg8: memref<1x64xf32, #tpu.memory_space<vmem>>, %arg9: memref<1x64xf32, #tpu.memory_space<vmem>>, %arg10: memref<1x64xf32, #tpu.memory_space<vmem>>, %arg11: memref<5x256x32xbf16, #tpu.memory_space<vmem>>, %arg12: memref<1x32xf32, #tpu.memory_space<vmem>>, %arg13: memref<32x64xbf16, #tpu.memory_space<vmem>>, %arg14: memref<1x64xf32, #tpu.memory_space<vmem>>, %arg15: memref<1x64xf32, #tpu.memory_space<vmem>>, %arg16: memref<1x64xf32, #tpu.memory_space<vmem>>, %arg17: memref<256x64xbf16, #tpu.memory_space<vmem>>, %arg18: memref<1x64xf32, #tpu.memory_space<vmem>>, %arg19: memref<8x256xbf16, #tpu.memory_space<vmem>>) attributes {dimension_semantics = [#tpu.dimension_semantics<parallel>], iteration_bounds = array<i64: 2>, scalar_prefetch = 0 : i64, scratch_operands = 0 : i64, tpu.core_type = #tpu.core_type<tc>, window_params = [{transform_indices = @transform_0, window_bounds = array<i64: 8, 256>}, {transform_indices = @transform_1, window_bounds = array<i64: 8, 256>}, {pipeline_mode = #tpu.pipeline_mode<synchronous>, transform_indices = @transform_2, window_bounds = array<i64: 256, 64>}, {pipeline_mode = #tpu.pipeline_mode<synchronous>, transform_indices = @transform_3, window_bounds = array<i64: 1, 64>}, {pipeline_mode = #tpu.pipeline_mode<synchronous>, transform_indices = @transform_4, window_bounds = array<i64: 3, 256, 32>}, {pipeline_mode = #tpu.pipeline_mode<synchronous>, transform_indices = @transform_5, window_bounds = array<i64: 1, 32>}, {pipeline_mode = #tpu.pipeline_mode<synchronous>, transform_indices = @transform_6, window_bounds = array<i64: 32, 64>}, {pipeline_mode = #tpu.pipeline_mode<synchronous>, transform_indices = @transform_7, window_bounds = array<i64: 1, 64>}, {pipeline_mode = #tpu.pipeline_mode<synchronous>, transform_indices = @transform_8, window_bounds = array<i64: 1, 64>}, {pipeline_mode = #tpu.pipeline_mode<synchronous>, transform_indices = @transform_9, window_bounds = array<i64: 1, 64>}, {pipeline_mode = #tpu.pipeline_mode<synchronous>, transform_indices = @transform_10, window_bounds = array<i64: 5, 256, 32>}, {pipeline_mode = #tpu.pipeline_mode<synchronous>, transform_indices = @transform_11, window_bounds = array<i64: 1, 32>}, {pipeline_mode = #tpu.pipeline_mode<synchronous>, transform_indices = @transform_12, window_bounds = array<i64: 32, 64>}, {pipeline_mode = #tpu.pipeline_mode<synchronous>, transform_indices = @transform_13, window_bounds = array<i64: 1, 64>}, {pipeline_mode = #tpu.pipeline_mode<synchronous>, transform_indices = @transform_14, window_bounds = array<i64: 1, 64>}, {pipeline_mode = #tpu.pipeline_mode<synchronous>, transform_indices = @transform_15, window_bounds = array<i64: 1, 64>}, {pipeline_mode = #tpu.pipeline_mode<synchronous>, transform_indices = @transform_16, window_bounds = array<i64: 256, 64>}, {pipeline_mode = #tpu.pipeline_mode<synchronous>, transform_indices = @transform_17, window_bounds = array<i64: 1, 64>}, {transform_indices = @transform_18, window_bounds = array<i64: 8, 256>}]} {
    %c8_i32 = arith.constant 8 : i32
    %0 = arith.muli %arg0, %c8_i32 : i32
    %1 = tpu.iota {dimensions = array<i32: 0>} : vector<8x1xi32>
    %2 = vector.broadcast %0 : i32 to vector<8x1xi32>
    %3 = arith.addi %2, %1 : vector<8x1xi32>
    %c8_i32_0 = arith.constant 8 : i32
    %c0_i32 = arith.constant 0 : i32
    %4 = arith.cmpi eq, %c8_i32_0, %c0_i32 : i32
    %c1_i32 = arith.constant 1 : i32
    %5 = arith.select %4, %c1_i32, %c8_i32_0 : i32
    %6 = vector.broadcast %5 : i32 to vector<8x1xi32>
    %7 = arith.remsi %3, %6 : vector<8x1xi32>
    %c0_i32_1 = arith.constant 0 : i32
    %8 = vector.broadcast %c0_i32_1 : i32 to vector<8x1xi32>
    %9 = arith.cmpi ne, %7, %8 : vector<8x1xi32>
    %c0_i32_2 = arith.constant 0 : i32
    %10 = vector.broadcast %c0_i32_2 : i32 to vector<8x1xi32>
    %11 = arith.cmpi slt, %7, %10 : vector<8x1xi32>
    %c0_i32_3 = arith.constant 0 : i32
    %12 = arith.cmpi slt, %5, %c0_i32_3 : i32
    %13 = vector.broadcast %12 : i1 to vector<8x1xi1>
    %14 = vector.broadcast %13 : vector<8x1xi1> to vector<8x1xi1>
    %15 = arith.xori %11, %14 : vector<8x1xi1>
    %16 = arith.andi %15, %9 : vector<8x1xi1>
    %17 = vector.broadcast %5 : i32 to vector<8x1xi32>
    %18 = arith.addi %7, %17 : vector<8x1xi32>
    %19 = arith.select %16, %18, %7 : vector<8x1xi1>, vector<8x1xi32>
    %c0_i32_4 = arith.constant 0 : i32
    %20 = vector.broadcast %c0_i32_4 : i32 to vector<8x1xi32>
    %21 = arith.cmpi eq, %19, %20 : vector<8x1xi32>
    %c7_i32 = arith.constant 7 : i32
    %22 = vector.broadcast %c7_i32 : i32 to vector<8x1xi32>
    %23 = arith.cmpi eq, %19, %22 : vector<8x1xi32>
    %c0 = arith.constant 0 : index
    %c0_5 = arith.constant 0 : index
    %24 = vector.load %arg1[%c0, %c0_5] : memref<8x256xbf16, #tpu.memory_space<vmem>>, vector<8x256xbf16>
    %c0_6 = arith.constant 0 : index
    %c0_7 = arith.constant 0 : index
    %25 = vector.load %arg2[%c0_6, %c0_7] : memref<8x256xbf16, #tpu.memory_space<vmem>>, vector<8x256xbf16>
    %26 = arith.extf %24 : vector<8x256xbf16> to vector<8x256xf32>
    %27 = arith.extf %25 : vector<8x256xbf16> to vector<8x256xf32>
    %cst = arith.constant 0.000000e+00 : f32
    %28 = vector.broadcast %cst : f32 to vector<1x256xf32>
    %29 = vector.extract_strided_slice %27 {offsets = [0, 0], sizes = [7, 256], strides = [1, 1]} : vector<8x256xf32> to vector<7x256xf32>
    %30 = tpu.concatenate %28, %29 in 0 : vector<1x256xf32>, vector<7x256xf32> -> vector<8x256xf32>
    %31 = vector.extract_strided_slice %26 {offsets = [0, 0], sizes = [7, 256], strides = [1, 1]} : vector<8x256xf32> to vector<7x256xf32>
    %32 = tpu.concatenate %28, %31 in 0 : vector<1x256xf32>, vector<7x256xf32> -> vector<8x256xf32>
    %33 = vector.extract_strided_slice %26 {offsets = [1, 0], sizes = [7, 256], strides = [1, 1]} : vector<8x256xf32> to vector<7x256xf32>
    %34 = tpu.concatenate %33, %28 in 0 : vector<7x256xf32>, vector<1x256xf32> -> vector<8x256xf32>
    %cst_8 = arith.constant 0.000000e+00 : f32
    %35 = vector.shape_cast %21 : vector<8x1xi1> to vector<8x1xi1>
    %36 = vector.broadcast %35 : vector<8x1xi1> to vector<8x256xi1>
    %37 = vector.broadcast %cst_8 : f32 to vector<8x256xf32>
    %38 = arith.select %36, %37, %30 : vector<8x256xi1>, vector<8x256xf32>
    %39 = arith.truncf %38 : vector<8x256xf32> to vector<8x256xbf16>
    %cst_9 = arith.constant 0.000000e+00 : f32
    %40 = vector.shape_cast %21 : vector<8x1xi1> to vector<8x1xi1>
    %41 = vector.broadcast %40 : vector<8x1xi1> to vector<8x256xi1>
    %42 = vector.broadcast %cst_9 : f32 to vector<8x256xf32>
    %43 = arith.select %41, %42, %32 : vector<8x256xi1>, vector<8x256xf32>
    %44 = arith.truncf %43 : vector<8x256xf32> to vector<8x256xbf16>
    %cst_10 = arith.constant 0.000000e+00 : f32
    %45 = vector.shape_cast %23 : vector<8x1xi1> to vector<8x1xi1>
    %46 = vector.broadcast %45 : vector<8x1xi1> to vector<8x256xi1>
    %47 = vector.broadcast %cst_10 : f32 to vector<8x256xf32>
    %48 = arith.select %46, %47, %34 : vector<8x256xi1>, vector<8x256xf32>
    %49 = arith.truncf %48 : vector<8x256xf32> to vector<8x256xbf16>
    %c0_11 = arith.constant 0 : index
    %c0_12 = arith.constant 0 : index
    %50 = vector.load %arg3[%c0_11, %c0_12] : memref<256x64xbf16, #tpu.memory_space<vmem>>, vector<256x64xbf16>
    %cst_13 = arith.constant dense<0.000000e+00> : vector<8x64xf32>
    %51 = tpu.matmul %24, %50, %cst_13 {dimension_numbers = #tpu.dot_dimension_numbers<[1], [0], [0], [1], [0, 0, 1, 1], [], []>} : vector<8x256xbf16>, vector<256x64xbf16>, vector<8x64xf32> -> vector<8x64xf32>
    %c0_14 = arith.constant 0 : index
    %c0_15 = arith.constant 0 : index
    %52 = vector.load %arg4[%c0_14, %c0_15] : memref<1x64xf32, #tpu.memory_space<vmem>>, vector<1x64xf32>
    %53 = vector.broadcast %52 : vector<1x64xf32> to vector<8x64xf32>
    %54 = arith.addf %51, %53 : vector<8x64xf32>
    %cst_16 = arith.constant 0.000000e+00 : f32
    %55 = vector.broadcast %cst_16 : f32 to vector<8x64xf32>
    %56 = arith.maximumf %54, %55 : vector<8x64xf32>
    %57 = arith.truncf %56 : vector<8x64xf32> to vector<8x64xbf16>
    %c0_17 = arith.constant 0 : index
    %c0_18 = arith.constant 0 : index
    %58 = vector.load %arg19[%c0_17, %c0_18] : memref<8x256xbf16, #tpu.memory_space<vmem>>, vector<8x64xbf16>
    tpu.vector_store %arg19[%c0_17, %c0_18], %57 {strides = array<i32>} : memref<8x256xbf16, #tpu.memory_space<vmem>>, vector<8x64xbf16>,
    %c0_19 = arith.constant 0 : index
    %c0_20 = arith.constant 0 : index
    %c0_21 = arith.constant 0 : index
    %59 = vector.load %arg5[%c0_19, %c0_20, %c0_21] : memref<3x256x32xbf16, #tpu.memory_space<vmem>>, vector<1x256x32xbf16>
    %60 = vector.shape_cast %59 : vector<1x256x32xbf16> to vector<256x32xbf16>
    %cst_22 = arith.constant dense<0.000000e+00> : vector<8x32xf32>
    %61 = tpu.matmul %39, %60, %cst_22 {dimension_numbers = #tpu.dot_dimension_numbers<[1], [0], [0], [1], [0, 0, 1, 1], [], []>} : vector<8x256xbf16>, vector<256x32xbf16>, vector<8x32xf32> -> vector<8x32xf32>
    %c1 = arith.constant 1 : index
    %c0_23 = arith.constant 0 : index
    %c0_24 = arith.constant 0 : index
    %62 = vector.load %arg5[%c1, %c0_23, %c0_24] : memref<3x256x32xbf16, #tpu.memory_space<vmem>>, vector<1x256x32xbf16>
    %63 = vector.shape_cast %62 : vector<1x256x32xbf16> to vector<256x32xbf16>
    %cst_25 = arith.constant dense<0.000000e+00> : vector<8x32xf32>
    %64 = tpu.matmul %24, %63, %cst_25 {dimension_numbers = #tpu.dot_dimension_numbers<[1], [0], [0], [1], [0, 0, 1, 1], [], []>} : vector<8x256xbf16>, vector<256x32xbf16>, vector<8x32xf32> -> vector<8x32xf32>
    %65 = arith.addf %61, %64 : vector<8x32xf32>
    %c2 = arith.constant 2 : index
    %c0_26 = arith.constant 0 : index
    %c0_27 = arith.constant 0 : index
    %66 = vector.load %arg5[%c2, %c0_26, %c0_27] : memref<3x256x32xbf16, #tpu.memory_space<vmem>>, vector<1x256x32xbf16>
    %67 = vector.shape_cast %66 : vector<1x256x32xbf16> to vector<256x32xbf16>
    %cst_28 = arith.constant dense<0.000000e+00> : vector<8x32xf32>
    %68 = tpu.matmul %25, %67, %cst_28 {dimension_numbers = #tpu.dot_dimension_numbers<[1], [0], [0], [1], [0, 0, 1, 1], [], []>} : vector<8x256xbf16>, vector<256x32xbf16>, vector<8x32xf32> -> vector<8x32xf32>
    %69 = arith.addf %65, %68 : vector<8x32xf32>
    %c0_29 = arith.constant 0 : index
    %c0_30 = arith.constant 0 : index
    %70 = vector.load %arg6[%c0_29, %c0_30] : memref<1x32xf32, #tpu.memory_space<vmem>>, vector<1x32xf32>
    %71 = vector.broadcast %70 : vector<1x32xf32> to vector<8x32xf32>
    %72 = arith.addf %69, %71 : vector<8x32xf32>
    %cst_31 = arith.constant 0.000000e+00 : f32
    %73 = vector.broadcast %cst_31 : f32 to vector<8x32xf32>
    %74 = arith.maximumf %72, %73 : vector<8x32xf32>
    %75 = arith.truncf %74 : vector<8x32xf32> to vector<8x32xbf16>
    %c0_32 = arith.constant 0 : index
    %c0_33 = arith.constant 0 : index
    %76 = vector.load %arg7[%c0_32, %c0_33] : memref<32x64xbf16, #tpu.memory_space<vmem>>, vector<32x64xbf16>
    %cst_34 = arith.constant dense<0.000000e+00> : vector<8x64xf32>
    %77 = tpu.matmul %75, %76, %cst_34 {dimension_numbers = #tpu.dot_dimension_numbers<[1], [0], [0], [1], [0, 0, 1, 1], [], []>} : vector<8x32xbf16>, vector<32x64xbf16>, vector<8x64xf32> -> vector<8x64xf32>
    %c0_35 = arith.constant 0 : index
    %c0_36 = arith.constant 0 : index
    %78 = vector.load %arg8[%c0_35, %c0_36] : memref<1x64xf32, #tpu.memory_space<vmem>>, vector<1x64xf32>
    %79 = vector.broadcast %78 : vector<1x64xf32> to vector<8x64xf32>
    %80 = arith.addf %77, %79 : vector<8x64xf32>
    %cst_37 = arith.constant 0.000000e+00 : f32
    %81 = vector.broadcast %cst_37 : f32 to vector<8x64xf32>
    %82 = arith.maximumf %80, %81 : vector<8x64xf32>
    %c0_38 = arith.constant 0 : index
    %c0_39 = arith.constant 0 : index
    %83 = vector.load %arg9[%c0_38, %c0_39] : memref<1x64xf32, #tpu.memory_space<vmem>>, vector<1x64xf32>
    %84 = vector.broadcast %83 : vector<1x64xf32> to vector<8x64xf32>
    %85 = arith.mulf %82, %84 : vector<8x64xf32>
    %c0_40 = arith.constant 0 : index
    %c0_41 = arith.constant 0 : index
    %86 = vector.load %arg10[%c0_40, %c0_41] : memref<1x64xf32, #tpu.memory_space<vmem>>, vector<1x64xf32>
    %87 = vector.broadcast %86 : vector<1x64xf32> to vector<8x64xf32>
    %88 = arith.addf %85, %87 : vector<8x64xf32>
    %89 = arith.truncf %88 : vector<8x64xf32> to vector<8x64xbf16>
    %c0_42 = arith.constant 0 : index
    %c64 = arith.constant 64 : index
    %90 = vector.load %arg19[%c0_42, %c64] : memref<8x256xbf16, #tpu.memory_space<vmem>>, vector<8x64xbf16>
    tpu.vector_store %arg19[%c0_42, %c64], %89 {strides = array<i32>} : memref<8x256xbf16, #tpu.memory_space<vmem>>, vector<8x64xbf16>,
    %c0_43 = arith.constant 0 : index
    %c0_44 = arith.constant 0 : index
    %c0_45 = arith.constant 0 : index
    %91 = vector.load %arg11[%c0_43, %c0_44, %c0_45] : memref<5x256x32xbf16, #tpu.memory_space<vmem>>, vector<1x256x32xbf16>
    %92 = vector.shape_cast %91 : vector<1x256x32xbf16> to vector<256x32xbf16>
    %cst_46 = arith.constant dense<0.000000e+00> : vector<8x32xf32>
    %93 = tpu.matmul %44, %92, %cst_46 {dimension_numbers = #tpu.dot_dimension_numbers<[1], [0], [0], [1], [0, 0, 1, 1], [], []>} : vector<8x256xbf16>, vector<256x32xbf16>, vector<8x32xf32> -> vector<8x32xf32>
    %c1_47 = arith.constant 1 : index
    %c0_48 = arith.constant 0 : index
    %c0_49 = arith.constant 0 : index
    %94 = vector.load %arg11[%c1_47, %c0_48, %c0_49] : memref<5x256x32xbf16, #tpu.memory_space<vmem>>, vector<1x256x32xbf16>
    %95 = vector.shape_cast %94 : vector<1x256x32xbf16> to vector<256x32xbf16>
    %cst_50 = arith.constant dense<0.000000e+00> : vector<8x32xf32>
    %96 = tpu.matmul %39, %95, %cst_50 {dimension_numbers = #tpu.dot_dimension_numbers<[1], [0], [0], [1], [0, 0, 1, 1], [], []>} : vector<8x256xbf16>, vector<256x32xbf16>, vector<8x32xf32> -> vector<8x32xf32>
    %97 = arith.addf %93, %96 : vector<8x32xf32>
    %c2_51 = arith.constant 2 : index
    %c0_52 = arith.constant 0 : index
    %c0_53 = arith.constant 0 : index
    %98 = vector.load %arg11[%c2_51, %c0_52, %c0_53] : memref<5x256x32xbf16, #tpu.memory_space<vmem>>, vector<1x256x32xbf16>
    %99 = vector.shape_cast %98 : vector<1x256x32xbf16> to vector<256x32xbf16>
    %cst_54 = arith.constant dense<0.000000e+00> : vector<8x32xf32>
    %100 = tpu.matmul %24, %99, %cst_54 {dimension_numbers = #tpu.dot_dimension_numbers<[1], [0], [0], [1], [0, 0, 1, 1], [], []>} : vector<8x256xbf16>, vector<256x32xbf16>, vector<8x32xf32> -> vector<8x32xf32>
    %101 = arith.addf %97, %100 : vector<8x32xf32>
    %c3 = arith.constant 3 : index
    %c0_55 = arith.constant 0 : index
    %c0_56 = arith.constant 0 : index
    %102 = vector.load %arg11[%c3, %c0_55, %c0_56] : memref<5x256x32xbf16, #tpu.memory_space<vmem>>, vector<1x256x32xbf16>
    %103 = vector.shape_cast %102 : vector<1x256x32xbf16> to vector<256x32xbf16>
    %cst_57 = arith.constant dense<0.000000e+00> : vector<8x32xf32>
    %104 = tpu.matmul %25, %103, %cst_57 {dimension_numbers = #tpu.dot_dimension_numbers<[1], [0], [0], [1], [0, 0, 1, 1], [], []>} : vector<8x256xbf16>, vector<256x32xbf16>, vector<8x32xf32> -> vector<8x32xf32>
    %105 = arith.addf %101, %104 : vector<8x32xf32>
    %c4 = arith.constant 4 : index
    %c0_58 = arith.constant 0 : index
    %c0_59 = arith.constant 0 : index
    %106 = vector.load %arg11[%c4, %c0_58, %c0_59] : memref<5x256x32xbf16, #tpu.memory_space<vmem>>, vector<1x256x32xbf16>
    %107 = vector.shape_cast %106 : vector<1x256x32xbf16> to vector<256x32xbf16>
    %cst_60 = arith.constant dense<0.000000e+00> : vector<8x32xf32>
    %108 = tpu.matmul %49, %107, %cst_60 {dimension_numbers = #tpu.dot_dimension_numbers<[1], [0], [0], [1], [0, 0, 1, 1], [], []>} : vector<8x256xbf16>, vector<256x32xbf16>, vector<8x32xf32> -> vector<8x32xf32>
    %109 = arith.addf %105, %108 : vector<8x32xf32>
    %c0_61 = arith.constant 0 : index
    %c0_62 = arith.constant 0 : index
    %110 = vector.load %arg12[%c0_61, %c0_62] : memref<1x32xf32, #tpu.memory_space<vmem>>, vector<1x32xf32>
    %111 = vector.broadcast %110 : vector<1x32xf32> to vector<8x32xf32>
    %112 = arith.addf %109, %111 : vector<8x32xf32>
    %cst_63 = arith.constant 0.000000e+00 : f32
    %113 = vector.broadcast %cst_63 : f32 to vector<8x32xf32>
    %114 = arith.maximumf %112, %113 : vector<8x32xf32>
    %115 = arith.truncf %114 : vector<8x32xf32> to vector<8x32xbf16>
    %c0_64 = arith.constant 0 : index
    %c0_65 = arith.constant 0 : index
    %116 = vector.load %arg13[%c0_64, %c0_65] : memref<32x64xbf16, #tpu.memory_space<vmem>>, vector<32x64xbf16>
    %cst_66 = arith.constant dense<0.000000e+00> : vector<8x64xf32>
    %117 = tpu.matmul %115, %116, %cst_66 {dimension_numbers = #tpu.dot_dimension_numbers<[1], [0], [0], [1], [0, 0, 1, 1], [], []>} : vector<8x32xbf16>, vector<32x64xbf16>, vector<8x64xf32> -> vector<8x64xf32>
    %c0_67 = arith.constant 0 : index
    %c0_68 = arith.constant 0 : index
    %118 = vector.load %arg14[%c0_67, %c0_68] : memref<1x64xf32, #tpu.memory_space<vmem>>, vector<1x64xf32>
    %119 = vector.broadcast %118 : vector<1x64xf32> to vector<8x64xf32>
    %120 = arith.addf %117, %119 : vector<8x64xf32>
    %cst_69 = arith.constant 0.000000e+00 : f32
    %121 = vector.broadcast %cst_69 : f32 to vector<8x64xf32>
    %122 = arith.maximumf %120, %121 : vector<8x64xf32>
    %c0_70 = arith.constant 0 : index
    %c0_71 = arith.constant 0 : index
    %123 = vector.load %arg15[%c0_70, %c0_71] : memref<1x64xf32, #tpu.memory_space<vmem>>, vector<1x64xf32>
    %124 = vector.broadcast %123 : vector<1x64xf32> to vector<8x64xf32>
    %125 = arith.mulf %122, %124 : vector<8x64xf32>
    %c0_72 = arith.constant 0 : index
    %c0_73 = arith.constant 0 : index
    %126 = vector.load %arg16[%c0_72, %c0_73] : memref<1x64xf32, #tpu.memory_space<vmem>>, vector<1x64xf32>
    %127 = vector.broadcast %126 : vector<1x64xf32> to vector<8x64xf32>
    %128 = arith.addf %125, %127 : vector<8x64xf32>
    %129 = arith.truncf %128 : vector<8x64xf32> to vector<8x64xbf16>
    %c0_74 = arith.constant 0 : index
    %c128 = arith.constant 128 : index
    %130 = vector.load %arg19[%c0_74, %c128] : memref<8x256xbf16, #tpu.memory_space<vmem>>, vector<8x64xbf16>
    tpu.vector_store %arg19[%c0_74, %c128], %129 {strides = array<i32>} : memref<8x256xbf16, #tpu.memory_space<vmem>>, vector<8x64xbf16>,
    %cst_75 = arith.constant 0xFF800000 : f32
    %131 = vector.shape_cast %21 : vector<8x1xi1> to vector<8x1xi1>
    %132 = vector.broadcast %131 : vector<8x1xi1> to vector<8x256xi1>
    %133 = vector.broadcast %cst_75 : f32 to vector<8x256xf32>
    %134 = arith.select %132, %133, %30 : vector<8x256xi1>, vector<8x256xf32>
    %135 = arith.maximumf %134, %26 : vector<8x256xf32>
    %136 = arith.maximumf %135, %27 : vector<8x256xf32>
    %137 = arith.truncf %136 : vector<8x256xf32> to vector<8x256xbf16>
    %c0_76 = arith.constant 0 : index
    %c0_77 = arith.constant 0 : index
    %138 = vector.load %arg17[%c0_76, %c0_77] : memref<256x64xbf16, #tpu.memory_space<vmem>>, vector<256x64xbf16>
    %cst_78 = arith.constant dense<0.000000e+00> : vector<8x64xf32>
    %139 = tpu.matmul %137, %138, %cst_78 {dimension_numbers = #tpu.dot_dimension_numbers<[1], [0], [0], [1], [0, 0, 1, 1], [], []>} : vector<8x256xbf16>, vector<256x64xbf16>, vector<8x64xf32> -> vector<8x64xf32>
    %c0_79 = arith.constant 0 : index
    %c0_80 = arith.constant 0 : index
    %140 = vector.load %arg18[%c0_79, %c0_80] : memref<1x64xf32, #tpu.memory_space<vmem>>, vector<1x64xf32>
    %141 = vector.broadcast %140 : vector<1x64xf32> to vector<8x64xf32>
    %142 = arith.addf %139, %141 : vector<8x64xf32>
    %cst_81 = arith.constant 0.000000e+00 : f32
    %143 = vector.broadcast %cst_81 : f32 to vector<8x64xf32>
    %144 = arith.maximumf %142, %143 : vector<8x64xf32>
    %145 = arith.truncf %144 : vector<8x64xf32> to vector<8x64xbf16>
    %c0_82 = arith.constant 0 : index
    %c192 = arith.constant 192 : index
    %146 = vector.load %arg19[%c0_82, %c192] : memref<8x256xbf16, #tpu.memory_space<vmem>>, vector<8x64xbf16>
    tpu.vector_store %arg19[%c0_82, %c192], %145 {strides = array<i32>} : memref<8x256xbf16, #tpu.memory_space<vmem>>, vector<8x64xbf16>,
    return
  }
  func.func @transform_0(%arg0: i32) -> (i32, i32) {
    %c0_i32 = arith.constant 0 : i32
    %c0_i32_0 = arith.constant 0 : i32
    return %arg0, %c0_i32 : i32, i32
  }
  func.func @transform_1(%arg0: i32) -> (i32, i32) {
    %c0_i32 = arith.constant 0 : i32
    %c0_i32_0 = arith.constant 0 : i32
    return %arg0, %c0_i32 : i32, i32
  }
  func.func @transform_2(%arg0: i32) -> (i32, i32) {
    %c0_i32 = arith.constant 0 : i32
    %c0_i32_0 = arith.constant 0 : i32
    %c0_i32_1 = arith.constant 0 : i32
    return %c0_i32, %c0_i32_0 : i32, i32
  }
  func.func @transform_3(%arg0: i32) -> (i32, i32) {
    %c0_i32 = arith.constant 0 : i32
    %c0_i32_0 = arith.constant 0 : i32
    %c0_i32_1 = arith.constant 0 : i32
    return %c0_i32, %c0_i32_0 : i32, i32
  }
  func.func @transform_4(%arg0: i32) -> (i32, i32, i32) {
    %c0_i32 = arith.constant 0 : i32
    %c0_i32_0 = arith.constant 0 : i32
    %c0_i32_1 = arith.constant 0 : i32
    %c0_i32_2 = arith.constant 0 : i32
    return %c0_i32, %c0_i32_0, %c0_i32_1 : i32, i32, i32
  }
  func.func @transform_5(%arg0: i32) -> (i32, i32) {
    %c0_i32 = arith.constant 0 : i32
    %c0_i32_0 = arith.constant 0 : i32
    %c0_i32_1 = arith.constant 0 : i32
    return %c0_i32, %c0_i32_0 : i32, i32
  }
  func.func @transform_6(%arg0: i32) -> (i32, i32) {
    %c0_i32 = arith.constant 0 : i32
    %c0_i32_0 = arith.constant 0 : i32
    %c0_i32_1 = arith.constant 0 : i32
    return %c0_i32, %c0_i32_0 : i32, i32
  }
  func.func @transform_7(%arg0: i32) -> (i32, i32) {
    %c0_i32 = arith.constant 0 : i32
    %c0_i32_0 = arith.constant 0 : i32
    %c0_i32_1 = arith.constant 0 : i32
    return %c0_i32, %c0_i32_0 : i32, i32
  }
  func.func @transform_8(%arg0: i32) -> (i32, i32) {
    %c0_i32 = arith.constant 0 : i32
    %c0_i32_0 = arith.constant 0 : i32
    %c0_i32_1 = arith.constant 0 : i32
    return %c0_i32, %c0_i32_0 : i32, i32
  }
  func.func @transform_9(%arg0: i32) -> (i32, i32) {
    %c0_i32 = arith.constant 0 : i32
    %c0_i32_0 = arith.constant 0 : i32
    %c0_i32_1 = arith.constant 0 : i32
    return %c0_i32, %c0_i32_0 : i32, i32
  }
  func.func @transform_10(%arg0: i32) -> (i32, i32, i32) {
    %c0_i32 = arith.constant 0 : i32
    %c0_i32_0 = arith.constant 0 : i32
    %c0_i32_1 = arith.constant 0 : i32
    %c0_i32_2 = arith.constant 0 : i32
    return %c0_i32, %c0_i32_0, %c0_i32_1 : i32, i32, i32
  }
  func.func @transform_11(%arg0: i32) -> (i32, i32) {
    %c0_i32 = arith.constant 0 : i32
    %c0_i32_0 = arith.constant 0 : i32
    %c0_i32_1 = arith.constant 0 : i32
    return %c0_i32, %c0_i32_0 : i32, i32
  }
  func.func @transform_12(%arg0: i32) -> (i32, i32) {
    %c0_i32 = arith.constant 0 : i32
    %c0_i32_0 = arith.constant 0 : i32
    %c0_i32_1 = arith.constant 0 : i32
    return %c0_i32, %c0_i32_0 : i32, i32
  }
  func.func @transform_13(%arg0: i32) -> (i32, i32) {
    %c0_i32 = arith.constant 0 : i32
    %c0_i32_0 = arith.constant 0 : i32
    %c0_i32_1 = arith.constant 0 : i32
    return %c0_i32, %c0_i32_0 : i32, i32
  }
  func.func @transform_14(%arg0: i32) -> (i32, i32) {
    %c0_i32 = arith.constant 0 : i32
    %c0_i32_0 = arith.constant 0 : i32
    %c0_i32_1 = arith.constant 0 : i32
    return %c0_i32, %c0_i32_0 : i32, i32
  }
  func.func @transform_15(%arg0: i32) -> (i32, i32) {
    %c0_i32 = arith.constant 0 : i32
    %c0_i32_0 = arith.constant 0 : i32
    %c0_i32_1 = arith.constant 0 : i32
    return %c0_i32, %c0_i32_0 : i32, i32
  }
  func.func @transform_16(%arg0: i32) -> (i32, i32) {
    %c0_i32 = arith.constant 0 : i32
    %c0_i32_0 = arith.constant 0 : i32
    %c0_i32_1 = arith.constant 0 : i32
    return %c0_i32, %c0_i32_0 : i32, i32
  }
  func.func @transform_17(%arg0: i32) -> (i32, i32) {
    %c0_i32 = arith.constant 0 : i32
    %c0_i32_0 = arith.constant 0 : i32
    %c0_i32_1 = arith.constant 0 : i32
    return %c0_i32, %c0_i32_0 : i32, i32
  }
  func.func @transform_18(%arg0: i32) -> (i32, i32) {
    %c0_i32 = arith.constant 0 : i32
    %c0_i32_0 = arith.constant 0 : i32
    return %arg0, %c0_i32 : i32, i32
  }
}

module attributes {stable_mosaic.version = 11 : i64} {
  func.func @_inception_kernel(%arg0: i32, %arg1: memref<4x256xbf16, #tpu.memory_space<vmem>>, %arg2: memref<4x256xbf16, #tpu.memory_space<vmem>>, %arg3: memref<256x128xbf16, #tpu.memory_space<vmem>>, %arg4: memref<1x128xf32, #tpu.memory_space<vmem>>, %arg5: memref<3x256x64xbf16, #tpu.memory_space<vmem>>, %arg6: memref<1x64xf32, #tpu.memory_space<vmem>>, %arg7: memref<64x128xbf16, #tpu.memory_space<vmem>>, %arg8: memref<1x128xf32, #tpu.memory_space<vmem>>, %arg9: memref<1x128xf32, #tpu.memory_space<vmem>>, %arg10: memref<1x128xf32, #tpu.memory_space<vmem>>, %arg11: memref<5x256x64xbf16, #tpu.memory_space<vmem>>, %arg12: memref<1x64xf32, #tpu.memory_space<vmem>>, %arg13: memref<64x128xbf16, #tpu.memory_space<vmem>>, %arg14: memref<1x128xf32, #tpu.memory_space<vmem>>, %arg15: memref<1x128xf32, #tpu.memory_space<vmem>>, %arg16: memref<1x128xf32, #tpu.memory_space<vmem>>, %arg17: memref<256x128xbf16, #tpu.memory_space<vmem>>, %arg18: memref<1x128xf32, #tpu.memory_space<vmem>>, %arg19: memref<4x512xbf16, #tpu.memory_space<vmem>>) attributes {dimension_semantics = [#tpu.dimension_semantics<parallel>], iteration_bounds = array<i64: 1>, scalar_prefetch = 0 : i64, scratch_operands = 0 : i64, tpu.core_type = #tpu.core_type<tc>, window_params = [{transform_indices = @transform_0, window_bounds = array<i64: 4, 256>}, {transform_indices = @transform_1, window_bounds = array<i64: 4, 256>}, {pipeline_mode = #tpu.pipeline_mode<synchronous>, transform_indices = @transform_2, window_bounds = array<i64: 256, 128>}, {pipeline_mode = #tpu.pipeline_mode<synchronous>, transform_indices = @transform_3, window_bounds = array<i64: 1, 128>}, {pipeline_mode = #tpu.pipeline_mode<synchronous>, transform_indices = @transform_4, window_bounds = array<i64: 3, 256, 64>}, {pipeline_mode = #tpu.pipeline_mode<synchronous>, transform_indices = @transform_5, window_bounds = array<i64: 1, 64>}, {pipeline_mode = #tpu.pipeline_mode<synchronous>, transform_indices = @transform_6, window_bounds = array<i64: 64, 128>}, {pipeline_mode = #tpu.pipeline_mode<synchronous>, transform_indices = @transform_7, window_bounds = array<i64: 1, 128>}, {pipeline_mode = #tpu.pipeline_mode<synchronous>, transform_indices = @transform_8, window_bounds = array<i64: 1, 128>}, {pipeline_mode = #tpu.pipeline_mode<synchronous>, transform_indices = @transform_9, window_bounds = array<i64: 1, 128>}, {pipeline_mode = #tpu.pipeline_mode<synchronous>, transform_indices = @transform_10, window_bounds = array<i64: 5, 256, 64>}, {pipeline_mode = #tpu.pipeline_mode<synchronous>, transform_indices = @transform_11, window_bounds = array<i64: 1, 64>}, {pipeline_mode = #tpu.pipeline_mode<synchronous>, transform_indices = @transform_12, window_bounds = array<i64: 64, 128>}, {pipeline_mode = #tpu.pipeline_mode<synchronous>, transform_indices = @transform_13, window_bounds = array<i64: 1, 128>}, {pipeline_mode = #tpu.pipeline_mode<synchronous>, transform_indices = @transform_14, window_bounds = array<i64: 1, 128>}, {pipeline_mode = #tpu.pipeline_mode<synchronous>, transform_indices = @transform_15, window_bounds = array<i64: 1, 128>}, {pipeline_mode = #tpu.pipeline_mode<synchronous>, transform_indices = @transform_16, window_bounds = array<i64: 256, 128>}, {pipeline_mode = #tpu.pipeline_mode<synchronous>, transform_indices = @transform_17, window_bounds = array<i64: 1, 128>}, {transform_indices = @transform_18, window_bounds = array<i64: 4, 512>}]} {
    %c4_i32 = arith.constant 4 : i32
    %0 = arith.muli %arg0, %c4_i32 : i32
    %1 = tpu.iota {dimensions = array<i32: 0>} : vector<4x1xi32>
    %2 = vector.broadcast %0 : i32 to vector<4x1xi32>
    %3 = arith.addi %2, %1 : vector<4x1xi32>
    %c2_i32 = arith.constant 2 : i32
    %c0_i32 = arith.constant 0 : i32
    %4 = arith.cmpi eq, %c2_i32, %c0_i32 : i32
    %c1_i32 = arith.constant 1 : i32
    %5 = arith.select %4, %c1_i32, %c2_i32 : i32
    %6 = vector.broadcast %5 : i32 to vector<4x1xi32>
    %7 = arith.remsi %3, %6 : vector<4x1xi32>
    %c0_i32_0 = arith.constant 0 : i32
    %8 = vector.broadcast %c0_i32_0 : i32 to vector<4x1xi32>
    %9 = arith.cmpi ne, %7, %8 : vector<4x1xi32>
    %c0_i32_1 = arith.constant 0 : i32
    %10 = vector.broadcast %c0_i32_1 : i32 to vector<4x1xi32>
    %11 = arith.cmpi slt, %7, %10 : vector<4x1xi32>
    %c0_i32_2 = arith.constant 0 : i32
    %12 = arith.cmpi slt, %5, %c0_i32_2 : i32
    %13 = vector.broadcast %12 : i1 to vector<4x1xi1>
    %14 = vector.broadcast %13 : vector<4x1xi1> to vector<4x1xi1>
    %15 = arith.xori %11, %14 : vector<4x1xi1>
    %16 = arith.andi %15, %9 : vector<4x1xi1>
    %17 = vector.broadcast %5 : i32 to vector<4x1xi32>
    %18 = arith.addi %7, %17 : vector<4x1xi32>
    %19 = arith.select %16, %18, %7 : vector<4x1xi1>, vector<4x1xi32>
    %c0_i32_3 = arith.constant 0 : i32
    %20 = vector.broadcast %c0_i32_3 : i32 to vector<4x1xi32>
    %21 = arith.cmpi eq, %19, %20 : vector<4x1xi32>
    %c1_i32_4 = arith.constant 1 : i32
    %22 = vector.broadcast %c1_i32_4 : i32 to vector<4x1xi32>
    %23 = arith.cmpi eq, %19, %22 : vector<4x1xi32>
    %c0 = arith.constant 0 : index
    %c0_5 = arith.constant 0 : index
    %24 = vector.load %arg1[%c0, %c0_5] : memref<4x256xbf16, #tpu.memory_space<vmem>>, vector<4x256xbf16>
    %c0_6 = arith.constant 0 : index
    %c0_7 = arith.constant 0 : index
    %25 = vector.load %arg2[%c0_6, %c0_7] : memref<4x256xbf16, #tpu.memory_space<vmem>>, vector<4x256xbf16>
    %26 = arith.extf %24 : vector<4x256xbf16> to vector<4x256xf32>
    %27 = arith.extf %25 : vector<4x256xbf16> to vector<4x256xf32>
    %cst = arith.constant 0.000000e+00 : f32
    %28 = vector.broadcast %cst : f32 to vector<1x256xf32>
    %29 = vector.extract_strided_slice %27 {offsets = [0, 0], sizes = [3, 256], strides = [1, 1]} : vector<4x256xf32> to vector<3x256xf32>
    %30 = tpu.concatenate %28, %29 in 0 : vector<1x256xf32>, vector<3x256xf32> -> vector<4x256xf32>
    %31 = vector.extract_strided_slice %26 {offsets = [0, 0], sizes = [3, 256], strides = [1, 1]} : vector<4x256xf32> to vector<3x256xf32>
    %32 = tpu.concatenate %28, %31 in 0 : vector<1x256xf32>, vector<3x256xf32> -> vector<4x256xf32>
    %33 = vector.extract_strided_slice %26 {offsets = [1, 0], sizes = [3, 256], strides = [1, 1]} : vector<4x256xf32> to vector<3x256xf32>
    %34 = tpu.concatenate %33, %28 in 0 : vector<3x256xf32>, vector<1x256xf32> -> vector<4x256xf32>
    %cst_8 = arith.constant 0.000000e+00 : f32
    %35 = vector.shape_cast %21 : vector<4x1xi1> to vector<4x1xi1>
    %36 = vector.broadcast %35 : vector<4x1xi1> to vector<4x256xi1>
    %37 = vector.broadcast %cst_8 : f32 to vector<4x256xf32>
    %38 = arith.select %36, %37, %30 : vector<4x256xi1>, vector<4x256xf32>
    %39 = arith.truncf %38 : vector<4x256xf32> to vector<4x256xbf16>
    %cst_9 = arith.constant 0.000000e+00 : f32
    %40 = vector.shape_cast %21 : vector<4x1xi1> to vector<4x1xi1>
    %41 = vector.broadcast %40 : vector<4x1xi1> to vector<4x256xi1>
    %42 = vector.broadcast %cst_9 : f32 to vector<4x256xf32>
    %43 = arith.select %41, %42, %32 : vector<4x256xi1>, vector<4x256xf32>
    %44 = arith.truncf %43 : vector<4x256xf32> to vector<4x256xbf16>
    %cst_10 = arith.constant 0.000000e+00 : f32
    %45 = vector.shape_cast %23 : vector<4x1xi1> to vector<4x1xi1>
    %46 = vector.broadcast %45 : vector<4x1xi1> to vector<4x256xi1>
    %47 = vector.broadcast %cst_10 : f32 to vector<4x256xf32>
    %48 = arith.select %46, %47, %34 : vector<4x256xi1>, vector<4x256xf32>
    %49 = arith.truncf %48 : vector<4x256xf32> to vector<4x256xbf16>
    %c0_11 = arith.constant 0 : index
    %c0_12 = arith.constant 0 : index
    %50 = vector.load %arg3[%c0_11, %c0_12] : memref<256x128xbf16, #tpu.memory_space<vmem>>, vector<256x128xbf16>
    %cst_13 = arith.constant dense<0.000000e+00> : vector<4x128xf32>
    %51 = tpu.matmul %24, %50, %cst_13 {dimension_numbers = #tpu.dot_dimension_numbers<[1], [0], [0], [1], [0, 0, 1, 1], [], []>} : vector<4x256xbf16>, vector<256x128xbf16>, vector<4x128xf32> -> vector<4x128xf32>
    %c0_14 = arith.constant 0 : index
    %c0_15 = arith.constant 0 : index
    %52 = vector.load %arg4[%c0_14, %c0_15] : memref<1x128xf32, #tpu.memory_space<vmem>>, vector<1x128xf32>
    %53 = vector.broadcast %52 : vector<1x128xf32> to vector<4x128xf32>
    %54 = arith.addf %51, %53 : vector<4x128xf32>
    %cst_16 = arith.constant 0.000000e+00 : f32
    %55 = vector.broadcast %cst_16 : f32 to vector<4x128xf32>
    %56 = arith.maximumf %54, %55 : vector<4x128xf32>
    %57 = arith.truncf %56 : vector<4x128xf32> to vector<4x128xbf16>
    %c0_17 = arith.constant 0 : index
    %c0_18 = arith.constant 0 : index
    %58 = vector.load %arg19[%c0_17, %c0_18] : memref<4x512xbf16, #tpu.memory_space<vmem>>, vector<4x128xbf16>
    tpu.vector_store %arg19[%c0_17, %c0_18], %57 {strides = array<i32>} : memref<4x512xbf16, #tpu.memory_space<vmem>>, vector<4x128xbf16>,
    %c0_19 = arith.constant 0 : index
    %c0_20 = arith.constant 0 : index
    %c0_21 = arith.constant 0 : index
    %59 = vector.load %arg5[%c0_19, %c0_20, %c0_21] : memref<3x256x64xbf16, #tpu.memory_space<vmem>>, vector<1x256x64xbf16>
    %60 = vector.shape_cast %59 : vector<1x256x64xbf16> to vector<256x64xbf16>
    %cst_22 = arith.constant dense<0.000000e+00> : vector<4x64xf32>
    %61 = tpu.matmul %39, %60, %cst_22 {dimension_numbers = #tpu.dot_dimension_numbers<[1], [0], [0], [1], [0, 0, 1, 1], [], []>} : vector<4x256xbf16>, vector<256x64xbf16>, vector<4x64xf32> -> vector<4x64xf32>
    %c1 = arith.constant 1 : index
    %c0_23 = arith.constant 0 : index
    %c0_24 = arith.constant 0 : index
    %62 = vector.load %arg5[%c1, %c0_23, %c0_24] : memref<3x256x64xbf16, #tpu.memory_space<vmem>>, vector<1x256x64xbf16>
    %63 = vector.shape_cast %62 : vector<1x256x64xbf16> to vector<256x64xbf16>
    %cst_25 = arith.constant dense<0.000000e+00> : vector<4x64xf32>
    %64 = tpu.matmul %24, %63, %cst_25 {dimension_numbers = #tpu.dot_dimension_numbers<[1], [0], [0], [1], [0, 0, 1, 1], [], []>} : vector<4x256xbf16>, vector<256x64xbf16>, vector<4x64xf32> -> vector<4x64xf32>
    %65 = arith.addf %61, %64 : vector<4x64xf32>
    %c2 = arith.constant 2 : index
    %c0_26 = arith.constant 0 : index
    %c0_27 = arith.constant 0 : index
    %66 = vector.load %arg5[%c2, %c0_26, %c0_27] : memref<3x256x64xbf16, #tpu.memory_space<vmem>>, vector<1x256x64xbf16>
    %67 = vector.shape_cast %66 : vector<1x256x64xbf16> to vector<256x64xbf16>
    %cst_28 = arith.constant dense<0.000000e+00> : vector<4x64xf32>
    %68 = tpu.matmul %25, %67, %cst_28 {dimension_numbers = #tpu.dot_dimension_numbers<[1], [0], [0], [1], [0, 0, 1, 1], [], []>} : vector<4x256xbf16>, vector<256x64xbf16>, vector<4x64xf32> -> vector<4x64xf32>
    %69 = arith.addf %65, %68 : vector<4x64xf32>
    %c0_29 = arith.constant 0 : index
    %c0_30 = arith.constant 0 : index
    %70 = vector.load %arg6[%c0_29, %c0_30] : memref<1x64xf32, #tpu.memory_space<vmem>>, vector<1x64xf32>
    %71 = vector.broadcast %70 : vector<1x64xf32> to vector<4x64xf32>
    %72 = arith.addf %69, %71 : vector<4x64xf32>
    %cst_31 = arith.constant 0.000000e+00 : f32
    %73 = vector.broadcast %cst_31 : f32 to vector<4x64xf32>
    %74 = arith.maximumf %72, %73 : vector<4x64xf32>
    %75 = arith.truncf %74 : vector<4x64xf32> to vector<4x64xbf16>
    %c0_32 = arith.constant 0 : index
    %c0_33 = arith.constant 0 : index
    %76 = vector.load %arg7[%c0_32, %c0_33] : memref<64x128xbf16, #tpu.memory_space<vmem>>, vector<64x128xbf16>
    %cst_34 = arith.constant dense<0.000000e+00> : vector<4x128xf32>
    %77 = tpu.matmul %75, %76, %cst_34 {dimension_numbers = #tpu.dot_dimension_numbers<[1], [0], [0], [1], [0, 0, 1, 1], [], []>} : vector<4x64xbf16>, vector<64x128xbf16>, vector<4x128xf32> -> vector<4x128xf32>
    %c0_35 = arith.constant 0 : index
    %c0_36 = arith.constant 0 : index
    %78 = vector.load %arg8[%c0_35, %c0_36] : memref<1x128xf32, #tpu.memory_space<vmem>>, vector<1x128xf32>
    %79 = vector.broadcast %78 : vector<1x128xf32> to vector<4x128xf32>
    %80 = arith.addf %77, %79 : vector<4x128xf32>
    %cst_37 = arith.constant 0.000000e+00 : f32
    %81 = vector.broadcast %cst_37 : f32 to vector<4x128xf32>
    %82 = arith.maximumf %80, %81 : vector<4x128xf32>
    %c0_38 = arith.constant 0 : index
    %c0_39 = arith.constant 0 : index
    %83 = vector.load %arg9[%c0_38, %c0_39] : memref<1x128xf32, #tpu.memory_space<vmem>>, vector<1x128xf32>
    %84 = vector.broadcast %83 : vector<1x128xf32> to vector<4x128xf32>
    %85 = arith.mulf %82, %84 : vector<4x128xf32>
    %c0_40 = arith.constant 0 : index
    %c0_41 = arith.constant 0 : index
    %86 = vector.load %arg10[%c0_40, %c0_41] : memref<1x128xf32, #tpu.memory_space<vmem>>, vector<1x128xf32>
    %87 = vector.broadcast %86 : vector<1x128xf32> to vector<4x128xf32>
    %88 = arith.addf %85, %87 : vector<4x128xf32>
    %89 = arith.truncf %88 : vector<4x128xf32> to vector<4x128xbf16>
    %c0_42 = arith.constant 0 : index
    %c128 = arith.constant 128 : index
    %90 = vector.load %arg19[%c0_42, %c128] : memref<4x512xbf16, #tpu.memory_space<vmem>>, vector<4x128xbf16>
    tpu.vector_store %arg19[%c0_42, %c128], %89 {strides = array<i32>} : memref<4x512xbf16, #tpu.memory_space<vmem>>, vector<4x128xbf16>,
    %c0_43 = arith.constant 0 : index
    %c0_44 = arith.constant 0 : index
    %c0_45 = arith.constant 0 : index
    %91 = vector.load %arg11[%c0_43, %c0_44, %c0_45] : memref<5x256x64xbf16, #tpu.memory_space<vmem>>, vector<1x256x64xbf16>
    %92 = vector.shape_cast %91 : vector<1x256x64xbf16> to vector<256x64xbf16>
    %cst_46 = arith.constant dense<0.000000e+00> : vector<4x64xf32>
    %93 = tpu.matmul %44, %92, %cst_46 {dimension_numbers = #tpu.dot_dimension_numbers<[1], [0], [0], [1], [0, 0, 1, 1], [], []>} : vector<4x256xbf16>, vector<256x64xbf16>, vector<4x64xf32> -> vector<4x64xf32>
    %c1_47 = arith.constant 1 : index
    %c0_48 = arith.constant 0 : index
    %c0_49 = arith.constant 0 : index
    %94 = vector.load %arg11[%c1_47, %c0_48, %c0_49] : memref<5x256x64xbf16, #tpu.memory_space<vmem>>, vector<1x256x64xbf16>
    %95 = vector.shape_cast %94 : vector<1x256x64xbf16> to vector<256x64xbf16>
    %cst_50 = arith.constant dense<0.000000e+00> : vector<4x64xf32>
    %96 = tpu.matmul %39, %95, %cst_50 {dimension_numbers = #tpu.dot_dimension_numbers<[1], [0], [0], [1], [0, 0, 1, 1], [], []>} : vector<4x256xbf16>, vector<256x64xbf16>, vector<4x64xf32> -> vector<4x64xf32>
    %97 = arith.addf %93, %96 : vector<4x64xf32>
    %c2_51 = arith.constant 2 : index
    %c0_52 = arith.constant 0 : index
    %c0_53 = arith.constant 0 : index
    %98 = vector.load %arg11[%c2_51, %c0_52, %c0_53] : memref<5x256x64xbf16, #tpu.memory_space<vmem>>, vector<1x256x64xbf16>
    %99 = vector.shape_cast %98 : vector<1x256x64xbf16> to vector<256x64xbf16>
    %cst_54 = arith.constant dense<0.000000e+00> : vector<4x64xf32>
    %100 = tpu.matmul %24, %99, %cst_54 {dimension_numbers = #tpu.dot_dimension_numbers<[1], [0], [0], [1], [0, 0, 1, 1], [], []>} : vector<4x256xbf16>, vector<256x64xbf16>, vector<4x64xf32> -> vector<4x64xf32>
    %101 = arith.addf %97, %100 : vector<4x64xf32>
    %c3 = arith.constant 3 : index
    %c0_55 = arith.constant 0 : index
    %c0_56 = arith.constant 0 : index
    %102 = vector.load %arg11[%c3, %c0_55, %c0_56] : memref<5x256x64xbf16, #tpu.memory_space<vmem>>, vector<1x256x64xbf16>
    %103 = vector.shape_cast %102 : vector<1x256x64xbf16> to vector<256x64xbf16>
    %cst_57 = arith.constant dense<0.000000e+00> : vector<4x64xf32>
    %104 = tpu.matmul %25, %103, %cst_57 {dimension_numbers = #tpu.dot_dimension_numbers<[1], [0], [0], [1], [0, 0, 1, 1], [], []>} : vector<4x256xbf16>, vector<256x64xbf16>, vector<4x64xf32> -> vector<4x64xf32>
    %105 = arith.addf %101, %104 : vector<4x64xf32>
    %c4 = arith.constant 4 : index
    %c0_58 = arith.constant 0 : index
    %c0_59 = arith.constant 0 : index
    %106 = vector.load %arg11[%c4, %c0_58, %c0_59] : memref<5x256x64xbf16, #tpu.memory_space<vmem>>, vector<1x256x64xbf16>
    %107 = vector.shape_cast %106 : vector<1x256x64xbf16> to vector<256x64xbf16>
    %cst_60 = arith.constant dense<0.000000e+00> : vector<4x64xf32>
    %108 = tpu.matmul %49, %107, %cst_60 {dimension_numbers = #tpu.dot_dimension_numbers<[1], [0], [0], [1], [0, 0, 1, 1], [], []>} : vector<4x256xbf16>, vector<256x64xbf16>, vector<4x64xf32> -> vector<4x64xf32>
    %109 = arith.addf %105, %108 : vector<4x64xf32>
    %c0_61 = arith.constant 0 : index
    %c0_62 = arith.constant 0 : index
    %110 = vector.load %arg12[%c0_61, %c0_62] : memref<1x64xf32, #tpu.memory_space<vmem>>, vector<1x64xf32>
    %111 = vector.broadcast %110 : vector<1x64xf32> to vector<4x64xf32>
    %112 = arith.addf %109, %111 : vector<4x64xf32>
    %cst_63 = arith.constant 0.000000e+00 : f32
    %113 = vector.broadcast %cst_63 : f32 to vector<4x64xf32>
    %114 = arith.maximumf %112, %113 : vector<4x64xf32>
    %115 = arith.truncf %114 : vector<4x64xf32> to vector<4x64xbf16>
    %c0_64 = arith.constant 0 : index
    %c0_65 = arith.constant 0 : index
    %116 = vector.load %arg13[%c0_64, %c0_65] : memref<64x128xbf16, #tpu.memory_space<vmem>>, vector<64x128xbf16>
    %cst_66 = arith.constant dense<0.000000e+00> : vector<4x128xf32>
    %117 = tpu.matmul %115, %116, %cst_66 {dimension_numbers = #tpu.dot_dimension_numbers<[1], [0], [0], [1], [0, 0, 1, 1], [], []>} : vector<4x64xbf16>, vector<64x128xbf16>, vector<4x128xf32> -> vector<4x128xf32>
    %c0_67 = arith.constant 0 : index
    %c0_68 = arith.constant 0 : index
    %118 = vector.load %arg14[%c0_67, %c0_68] : memref<1x128xf32, #tpu.memory_space<vmem>>, vector<1x128xf32>
    %119 = vector.broadcast %118 : vector<1x128xf32> to vector<4x128xf32>
    %120 = arith.addf %117, %119 : vector<4x128xf32>
    %cst_69 = arith.constant 0.000000e+00 : f32
    %121 = vector.broadcast %cst_69 : f32 to vector<4x128xf32>
    %122 = arith.maximumf %120, %121 : vector<4x128xf32>
    %c0_70 = arith.constant 0 : index
    %c0_71 = arith.constant 0 : index
    %123 = vector.load %arg15[%c0_70, %c0_71] : memref<1x128xf32, #tpu.memory_space<vmem>>, vector<1x128xf32>
    %124 = vector.broadcast %123 : vector<1x128xf32> to vector<4x128xf32>
    %125 = arith.mulf %122, %124 : vector<4x128xf32>
    %c0_72 = arith.constant 0 : index
    %c0_73 = arith.constant 0 : index
    %126 = vector.load %arg16[%c0_72, %c0_73] : memref<1x128xf32, #tpu.memory_space<vmem>>, vector<1x128xf32>
    %127 = vector.broadcast %126 : vector<1x128xf32> to vector<4x128xf32>
    %128 = arith.addf %125, %127 : vector<4x128xf32>
    %129 = arith.truncf %128 : vector<4x128xf32> to vector<4x128xbf16>
    %c0_74 = arith.constant 0 : index
    %c256 = arith.constant 256 : index
    %130 = vector.load %arg19[%c0_74, %c256] : memref<4x512xbf16, #tpu.memory_space<vmem>>, vector<4x128xbf16>
    tpu.vector_store %arg19[%c0_74, %c256], %129 {strides = array<i32>} : memref<4x512xbf16, #tpu.memory_space<vmem>>, vector<4x128xbf16>,
    %cst_75 = arith.constant 0xFF800000 : f32
    %131 = vector.shape_cast %21 : vector<4x1xi1> to vector<4x1xi1>
    %132 = vector.broadcast %131 : vector<4x1xi1> to vector<4x256xi1>
    %133 = vector.broadcast %cst_75 : f32 to vector<4x256xf32>
    %134 = arith.select %132, %133, %30 : vector<4x256xi1>, vector<4x256xf32>
    %135 = arith.maximumf %134, %26 : vector<4x256xf32>
    %136 = arith.maximumf %135, %27 : vector<4x256xf32>
    %137 = arith.truncf %136 : vector<4x256xf32> to vector<4x256xbf16>
    %c0_76 = arith.constant 0 : index
    %c0_77 = arith.constant 0 : index
    %138 = vector.load %arg17[%c0_76, %c0_77] : memref<256x128xbf16, #tpu.memory_space<vmem>>, vector<256x128xbf16>
    %cst_78 = arith.constant dense<0.000000e+00> : vector<4x128xf32>
    %139 = tpu.matmul %137, %138, %cst_78 {dimension_numbers = #tpu.dot_dimension_numbers<[1], [0], [0], [1], [0, 0, 1, 1], [], []>} : vector<4x256xbf16>, vector<256x128xbf16>, vector<4x128xf32> -> vector<4x128xf32>
    %c0_79 = arith.constant 0 : index
    %c0_80 = arith.constant 0 : index
    %140 = vector.load %arg18[%c0_79, %c0_80] : memref<1x128xf32, #tpu.memory_space<vmem>>, vector<1x128xf32>
    %141 = vector.broadcast %140 : vector<1x128xf32> to vector<4x128xf32>
    %142 = arith.addf %139, %141 : vector<4x128xf32>
    %cst_81 = arith.constant 0.000000e+00 : f32
    %143 = vector.broadcast %cst_81 : f32 to vector<4x128xf32>
    %144 = arith.maximumf %142, %143 : vector<4x128xf32>
    %145 = arith.truncf %144 : vector<4x128xf32> to vector<4x128xbf16>
    %c0_82 = arith.constant 0 : index
    %c384 = arith.constant 384 : index
    %146 = vector.load %arg19[%c0_82, %c384] : memref<4x512xbf16, #tpu.memory_space<vmem>>, vector<4x128xbf16>
    tpu.vector_store %arg19[%c0_82, %c384], %145 {strides = array<i32>} : memref<4x512xbf16, #tpu.memory_space<vmem>>, vector<4x128xbf16>,
    return
  }
  func.func @transform_0(%arg0: i32) -> (i32, i32) {
    %c0_i32 = arith.constant 0 : i32
    %c0_i32_0 = arith.constant 0 : i32
    return %arg0, %c0_i32 : i32, i32
  }
  func.func @transform_1(%arg0: i32) -> (i32, i32) {
    %c0_i32 = arith.constant 0 : i32
    %c0_i32_0 = arith.constant 0 : i32
    return %arg0, %c0_i32 : i32, i32
  }
  func.func @transform_2(%arg0: i32) -> (i32, i32) {
    %c0_i32 = arith.constant 0 : i32
    %c0_i32_0 = arith.constant 0 : i32
    %c0_i32_1 = arith.constant 0 : i32
    return %c0_i32, %c0_i32_0 : i32, i32
  }
  func.func @transform_3(%arg0: i32) -> (i32, i32) {
    %c0_i32 = arith.constant 0 : i32
    %c0_i32_0 = arith.constant 0 : i32
    %c0_i32_1 = arith.constant 0 : i32
    return %c0_i32, %c0_i32_0 : i32, i32
  }
  func.func @transform_4(%arg0: i32) -> (i32, i32, i32) {
    %c0_i32 = arith.constant 0 : i32
    %c0_i32_0 = arith.constant 0 : i32
    %c0_i32_1 = arith.constant 0 : i32
    %c0_i32_2 = arith.constant 0 : i32
    return %c0_i32, %c0_i32_0, %c0_i32_1 : i32, i32, i32
  }
  func.func @transform_5(%arg0: i32) -> (i32, i32) {
    %c0_i32 = arith.constant 0 : i32
    %c0_i32_0 = arith.constant 0 : i32
    %c0_i32_1 = arith.constant 0 : i32
    return %c0_i32, %c0_i32_0 : i32, i32
  }
  func.func @transform_6(%arg0: i32) -> (i32, i32) {
    %c0_i32 = arith.constant 0 : i32
    %c0_i32_0 = arith.constant 0 : i32
    %c0_i32_1 = arith.constant 0 : i32
    return %c0_i32, %c0_i32_0 : i32, i32
  }
  func.func @transform_7(%arg0: i32) -> (i32, i32) {
    %c0_i32 = arith.constant 0 : i32
    %c0_i32_0 = arith.constant 0 : i32
    %c0_i32_1 = arith.constant 0 : i32
    return %c0_i32, %c0_i32_0 : i32, i32
  }
  func.func @transform_8(%arg0: i32) -> (i32, i32) {
    %c0_i32 = arith.constant 0 : i32
    %c0_i32_0 = arith.constant 0 : i32
    %c0_i32_1 = arith.constant 0 : i32
    return %c0_i32, %c0_i32_0 : i32, i32
  }
  func.func @transform_9(%arg0: i32) -> (i32, i32) {
    %c0_i32 = arith.constant 0 : i32
    %c0_i32_0 = arith.constant 0 : i32
    %c0_i32_1 = arith.constant 0 : i32
    return %c0_i32, %c0_i32_0 : i32, i32
  }
  func.func @transform_10(%arg0: i32) -> (i32, i32, i32) {
    %c0_i32 = arith.constant 0 : i32
    %c0_i32_0 = arith.constant 0 : i32
    %c0_i32_1 = arith.constant 0 : i32
    %c0_i32_2 = arith.constant 0 : i32
    return %c0_i32, %c0_i32_0, %c0_i32_1 : i32, i32, i32
  }
  func.func @transform_11(%arg0: i32) -> (i32, i32) {
    %c0_i32 = arith.constant 0 : i32
    %c0_i32_0 = arith.constant 0 : i32
    %c0_i32_1 = arith.constant 0 : i32
    return %c0_i32, %c0_i32_0 : i32, i32
  }
  func.func @transform_12(%arg0: i32) -> (i32, i32) {
    %c0_i32 = arith.constant 0 : i32
    %c0_i32_0 = arith.constant 0 : i32
    %c0_i32_1 = arith.constant 0 : i32
    return %c0_i32, %c0_i32_0 : i32, i32
  }
  func.func @transform_13(%arg0: i32) -> (i32, i32) {
    %c0_i32 = arith.constant 0 : i32
    %c0_i32_0 = arith.constant 0 : i32
    %c0_i32_1 = arith.constant 0 : i32
    return %c0_i32, %c0_i32_0 : i32, i32
  }
  func.func @transform_14(%arg0: i32) -> (i32, i32) {
    %c0_i32 = arith.constant 0 : i32
    %c0_i32_0 = arith.constant 0 : i32
    %c0_i32_1 = arith.constant 0 : i32
    return %c0_i32, %c0_i32_0 : i32, i32
  }
  func.func @transform_15(%arg0: i32) -> (i32, i32) {
    %c0_i32 = arith.constant 0 : i32
    %c0_i32_0 = arith.constant 0 : i32
    %c0_i32_1 = arith.constant 0 : i32
    return %c0_i32, %c0_i32_0 : i32, i32
  }
  func.func @transform_16(%arg0: i32) -> (i32, i32) {
    %c0_i32 = arith.constant 0 : i32
    %c0_i32_0 = arith.constant 0 : i32
    %c0_i32_1 = arith.constant 0 : i32
    return %c0_i32, %c0_i32_0 : i32, i32
  }
  func.func @transform_17(%arg0: i32) -> (i32, i32) {
    %c0_i32 = arith.constant 0 : i32
    %c0_i32_0 = arith.constant 0 : i32
    %c0_i32_1 = arith.constant 0 : i32
    return %c0_i32, %c0_i32_0 : i32, i32
  }
  func.func @transform_18(%arg0: i32) -> (i32, i32) {
    %c0_i32 = arith.constant 0 : i32
    %c0_i32_0 = arith.constant 0 : i32
    return %arg0, %c0_i32 : i32, i32
  }
}

module attributes {stable_mosaic.version = 11 : i64} {
  func.func @_tail_kernel(%arg0: memref<2x512xbf16, #tpu.memory_space<vmem>>, %arg1: memref<2x512xbf16, #tpu.memory_space<vmem>>, %arg2: memref<512x10xbf16, #tpu.memory_space<vmem>>, %arg3: memref<1x10xf32, #tpu.memory_space<vmem>>, %arg4: memref<2x10xf32, #tpu.memory_space<vmem>>) attributes {dimension_semantics = [], scalar_prefetch = 0 : i64, scratch_operands = 0 : i64, tpu.core_type = #tpu.core_type<tc>} {
    %c0 = arith.constant 0 : index
    %c0_0 = arith.constant 0 : index
    %0 = vector.load %arg0[%c0, %c0_0] : memref<2x512xbf16, #tpu.memory_space<vmem>>, vector<2x512xbf16>
    %1 = arith.extf %0 : vector<2x512xbf16> to vector<2x512xf32>
    %c0_1 = arith.constant 0 : index
    %c0_2 = arith.constant 0 : index
    %2 = vector.load %arg1[%c0_1, %c0_2] : memref<2x512xbf16, #tpu.memory_space<vmem>>, vector<2x512xbf16>
    %3 = arith.extf %2 : vector<2x512xbf16> to vector<2x512xf32>
    %4 = arith.addf %1, %3 : vector<2x512xf32>
    %cst = arith.constant 5.000000e-01 : f32
    %5 = vector.broadcast %cst : f32 to vector<2x512xf32>
    %6 = arith.mulf %4, %5 : vector<2x512xf32>
    %7 = arith.truncf %6 : vector<2x512xf32> to vector<2x512xbf16>
    %c0_3 = arith.constant 0 : index
    %c0_4 = arith.constant 0 : index
    %8 = vector.load %arg2[%c0_3, %c0_4] : memref<512x10xbf16, #tpu.memory_space<vmem>>, vector<512x10xbf16>
    %cst_5 = arith.constant dense<0.000000e+00> : vector<2x10xf32>
    %9 = tpu.matmul %7, %8, %cst_5 {dimension_numbers = #tpu.dot_dimension_numbers<[1], [0], [0], [1], [0, 0, 1, 1], [], []>} : vector<2x512xbf16>, vector<512x10xbf16>, vector<2x10xf32> -> vector<2x10xf32>
    %c0_6 = arith.constant 0 : index
    %c0_7 = arith.constant 0 : index
    %10 = vector.load %arg3[%c0_6, %c0_7] : memref<1x10xf32, #tpu.memory_space<vmem>>, vector<1x10xf32>
    %11 = vector.broadcast %10 : vector<1x10xf32> to vector<2x10xf32>
    %12 = arith.addf %9, %11 : vector<2x10xf32>
    %c0_8 = arith.constant 0 : index
    %c0_9 = arith.constant 0 : index
    %13 = vector.load %arg4[%c0_8, %c0_9] : memref<2x10xf32, #tpu.memory_space<vmem>>, vector<2x10xf32>
    tpu.vector_store %arg4[%c0_8, %c0_9], %12 {strides = array<i32>} : memref<2x10xf32, #tpu.memory_space<vmem>>, vector<2x10xf32>,
    return
  }
}

</mosaic_0001>

<bundles_post_ra>
// kernel: imu_network.4
= control target key start
LH: loop header
LB: loop body
LE: loop exit
PB: predicated region body
PF: predicated region fallthrough
CT: control target
= control target key end

     0   :  { %s3316_s0 = inlined_call_operand.vmem [shape: bf16[64,3], index: 0, kind: input, shape index: {}]   ;;  %s3317_s1 = inlined_call_operand.vmem [shape: bf16[64,3], index: 1, kind: input, shape index: {}]   ;;  %s3318_s2 = inlined_call_operand.vmem [shape: bf16[3,64], index: 2, kind: input, shape index: {}]   ;;  %s3319_s3 = inlined_call_operand.vmem [shape: f32[1,64], index: 3, kind: input, shape index: {}]   ;;  %s3320_s4 = inlined_call_operand.vmem [shape: bf16[64,64], index: 4, kind: input, shape index: {}]   ;;  %s3321_s5 = inlined_call_operand.vmem [shape: f32[1,64], index: 5, kind: input, shape index: {}]   ;;  %s3322_s6 = inlined_call_operand.vmem [shape: bf16[3,64,32], index: 6, kind: input, shape index: {}]   ;;  %s3323_s7 = inlined_call_operand.vmem [shape: f32[1,32], index: 7, kind: input, shape index: {}]   ;;  %s3324_s8 = inlined_call_operand.vmem [shape: bf16[32,64], index: 8, kind: input, shape index: {}]   ;;  %s3325_s9 = inlined_call_operand.vmem [shape: f32[1,64], index: 9, kind: input, shape index: {}]   ;;  %s3326_s10 = inlined_call_operand.vmem [shape: f32[1,64], index: 10, kind: input, shape index: {}]   ;;  %s3327_s11 = inlined_call_operand.vmem [shape: f32[1,64], index: 11, kind: input, shape index: {}]   ;;  %s3328_s12 = inlined_call_operand.vmem [shape: bf16[5,64,32], index: 12, kind: input, shape index: {}]   ;;  %s3329_s13 = inlined_call_operand.vmem [shape: f32[1,32], index: 13, kind: input, shape index: {}]   ;;  %s3330_s14 = inlined_call_operand.vmem [shape: bf16[32,64], index: 14, kind: input, shape index: {}]   ;;  %s3331_s15 = inlined_call_operand.vmem [shape: f32[1,64], index: 15, kind: input, shape index: {}]   ;;  %s3332_s16 = inlined_call_operand.vmem [shape: f32[1,64], index: 16, kind: input, shape index: {}]   ;;  %s3333_s17 = inlined_call_operand.vmem [shape: f32[1,64], index: 17, kind: input, shape index: {}]   ;;  %s3334_s18 = inlined_call_operand.vmem [shape: bf16[64,64], index: 18, kind: input, shape index: {}]   ;;  %s3335_s19 = inlined_call_operand.vmem [shape: f32[1,64], index: 19, kind: input, shape index: {}]   ;;  %s3336_s20 = inlined_call_operand.vmem [shape: bf16[64,256], index: 20, kind: output, shape index: {}]  }
   0x1   :  { %3338 = sst [smem:[#allocation2_spill]] %s3316_s0 }
   0x2   :  { %3339 = sst [smem:[#allocation3_spill]] %s3317_s1  ;;  %s2884_s1 = smov 0  }
   0x3   :  { %3340 = sst [smem:[#allocation4_spill]] %s3318_s2 }
   0x4   :  { %3341 = sst [smem:[#allocation5_spill]] %s3319_s3 }
   0x5   :  { %3342 = sst [smem:[#allocation6_spill]] %s3320_s4 }
   0x6 LB: > { %s2278_s22 = sadd.s32 4294967295, %s2775_s1   ;;  %p2282_p0 = scmp.ge.s32.totalorder %s2775_s1, 1  ;;  %s2775_s1 = sphi %s2884_s1, %s30_s1  }
   0x7   : > { %p574_p1 = scmp.lt.s32.totalorder %s2775_s1, 3 }
   0x9   : > { %p575_p2 = pnand %p2282_p0, %p574_p1 }
   0xa   : > { %s3343_s2 = sld [smem:[#allocation4_spill]] (!%p575_p2)  ;;  %vm754_vm0 = vcmask (!%p575_p2), 1040384   ;;  %vm755_vm1 = vcmask (!%p575_p2), 1041408   ;;  %s2283_s25 = sshll.u32 (!%p575_p2), %s2278_s22, 2  ;;  %v2777_v1 = vmov (!%p575_p2), 65535   ;;  %vm747_vm2 = vcmask (!%p575_p2), 23552  }
   0xb   : > { %578 = sbr.rel (%p575_p2) target bundleno = 1178 (0x49a), region = 100  ;;  %v756_v2 = vsel (!%p575_p2), %vm754_vm0, 4294967295, %v2777_v1  ;;  %p639_p3 = scmp.lt.s32.totalorder (!%p575_p2), %s2283_s25, 7  ;;  %v2922_v13 = vld [vmem:[%s3322_s6 + $0x20] sm:$0xff] (!%p575_p2)   ;;  %v659_v14 = vlaneseq (!%p575_p2) }
   0xc   : > { %v757_v3 = vsel (!%p575_p2), %vm755_vm1, %v756_v2, 0  ;;  %s3344_s27 = sld [smem:[#allocation6_spill]] (!%p575_p2)  ;;  %s3345_s30 = sld [smem:[#allocation2_spill]] (!%p575_p2) }
   0xd   : > { %s3346_s24 = sld [smem:[#allocation3_spill]] (!%p575_p2)  ;;  %v660_v15 = vshrl.u32 (!%p575_p2), %v659_v14, 7  ;;  %s2290_s23 = sshll.u32 (!%p575_p2), %s2278_s22, 5 }
   0xe   : > { %v664_v16 = vstv (!%p575_p2), %s2290_s23  ;;  %s2778_s26 = smov (!%p575_p2), 64  }
   0xf   : > { %v663_v17 = vadd.s32 (!%p575_p2), 24, %v660_v15  ;;  %v662_v18 = vadd.s32 (!%p575_p2), 16, %v660_v15  ;;  %v661_v19 = vadd.s32 (!%p575_p2), 8, %v660_v15  ;;  %v665_v20 = vadd.s32 (!%p575_p2), %v664_v16, %v660_v15 }
  0x10   : > { %v729_v0 = vld [vmem:[%s3343_s2] sm:$0x3] (!%p575_p2) }
  0x11   : > { %v759_v4 = vand.u32 (!%p575_p2), %v757_v3, %v729_v0  ;;  %v668_v21 = vadd.s32 (!%p575_p2), %v664_v16, %v663_v17  ;;  %v667_v22 = vadd.s32 (!%p575_p2), %v664_v16, %v662_v18  ;;  %v666_v23 = vadd.s32 (!%p575_p2), %v664_v16, %v661_v19 }
  0x12   : > { %s3349_s25 = smov (!%p639_p3, %s2283_s25), 7  ;;  %v2725_v5 = vld [vmem:[%s3344_s27] sm:$0xff]   ;;  %v2726_v8 = vld [vmem:[%s3344_s27 + $0x8] sm:$0xff]   ;;  %v2727_v11 = vld [vmem:[%s3344_s27 + $0x10] sm:$0xff]   ;;  %v670_v24 = vsub.s32 0, %v665_v20  ;;  %vm669_vm3 = vcmp.lt.s32.totalorder %v665_v20, 0 }
  0x13   : > { %2539 = vmatprep.subr.bf16.mxu0 %v759_v4  ;;  %2545 = vmatprep.subr.bf16.mxu1 %v759_v4  ;;  %s2284_s28 = sshll.u32 %s3349_s25, 2  ;;  %v2728_v12 = vld [vmem:[%s3344_s27 + $0x18] sm:$0xff]   ;;  %v691_v25 = vsub.s32 0, %v668_v21  ;;  %v684_v26 = vsub.s32 0, %v667_v22  ;;  %v677_v27 = vsub.s32 0, %v666_v23  ;;  %vm690_vm4 = vcmp.lt.s32.totalorder %v668_v21, 0 }
  0x14   : > { %2540 = vmatpush3.bf16.msra.mxu0 %v759_v4  ;;  %2546 = vmatpush3.bf16.msra.mxu1 %v759_v4  ;;  %s642_s0 = scalar_lea.vmem %s3345_s30, %s2284_s28  ;;  %s648_s2 = scalar_lea.vmem %s3346_s24, %s2284_s28  ;;  %v2291_v28 = vmin.u32 %v670_v24, %v665_v20  ;;  %vm683_vm5 = vcmp.lt.s32.totalorder %v667_v22, 0  ;;  %vm676_vm6 = vcmp.lt.s32.totalorder %v666_v23, 0 }
  0x15   : > { %v2721_v6 = vld [vmem:[%s642_s0] sm:$0xff]   ;;  %2551 = vmatprep.subr.bf16.mxu1 %v2725_v5  ;;  %v2723_v9 = vld [vmem:[%s642_s0 + $0x8] sm:$0xff]   ;;  %v2294_v29 = vmin.u32 %v691_v25, %v668_v21  ;;  %v2293_v30 = vmin.u32 %v684_v26, %v667_v22  ;;  %v2292_v31 = vmin.u32 %v677_v27, %v666_v23  ;;  %s2448_s0 = sshll.u32 %s3349_s25, 3 }
  0x16   : > { %v2722_v7 = vld [vmem:[%s648_s2] sm:$0xff]   ;;  %2541 = vmatprep.mubr.msk.bf16.mxu0 %vm747_vm2, %v2721_v6  ;;  %v2724_v10 = vld [vmem:[%s648_s2 + $0x8] sm:$0xff]   ;;  %v673_v32 = vand.u32 31, %v2291_v28  ;;  %s3347_s2 = sld [smem:[#allocation5_spill]]  ;;  %s3125_s22 = scalar_lea.vmem %s3336_s20, %s2448_s0 }
  0x17   : > { %2547 = vmatprep.mubr.msk.bf16.mxu1 %vm747_vm2, %v2722_v7  ;;  %2542 = vmatmul.mubr.msk.bf16.vlgmr.msra.gmra.mrb[0].mxu0 %vm747_vm2, %v2723_v9  ;;  %v694_v33 = vand.u32 31, %v2294_v29  ;;  %v687_v34 = vand.u32 31, %v2293_v30  ;;  %v680_v35 = vand.u32 31, %v2292_v31 }
  0x18   : > { %2548 = vmatmul.mubr.msk.bf16.vlgmr.msra.gmra.mrb[0].mxu1 %vm747_vm2, %v2724_v10  ;;  %v674_v36 = vsub.s32 0, %v673_v32 }
  0x19   : > { %2552 = vmatpush3.bf16.msra.mxu1 %v2725_v5  ;;  %v695_v37 = vsub.s32 0, %v694_v33  ;;  %v688_v38 = vsub.s32 0, %v687_v34  ;;  %v681_v39 = vsub.s32 0, %v680_v35 }
  0x1a   : > { %2553 = vmatprep.subr.bf16.mxu1 %v2726_v8  ;;  %v675_v40 = vsel %vm669_vm3, %v674_v36, %v673_v32 }
  0x1b   : > { %v696_v41 = vsel %vm690_vm4, %v695_v37, %v694_v33  ;;  %v689_v42 = vsel %vm683_vm5, %v688_v38, %v687_v34  ;;  %vm697_vm7 = vcmp.ne.s32.totalorder %v675_v40, 0  ;;  %vm701_vm8 = vcmp.lt.s32.totalorder %v675_v40, 0 }
  0x1c   : > { %v682_v43 = vsel %vm676_vm6, %v681_v39, %v680_v35  ;;  %vm700_vm9 = vcmp.ne.s32.totalorder %v696_v41, 0  ;;  %vm704_vm10 = vcmp.lt.s32.totalorder %v696_v41, 0  ;;  %vm699_vm11 = vcmp.ne.s32.totalorder %v689_v42, 0  ;;  %vm705_vm13 = vmand %vm701_vm8, %vm697_vm7  ;;  %v2295_v48 = vld [vmem:[%s3347_s2] ss:$0 sm:$0xff] }
  0x1d   : > { %2554 = vmatpush3.bf16.msra.mxu1 %v2726_v8  ;;  %vm703_vm12 = vcmp.lt.s32.totalorder %v689_v42, 0  ;;  %vm698_vm14 = vcmp.ne.s32.totalorder %v682_v43, 0  ;;  %vm702_vm15 = vcmp.lt.s32.totalorder %v682_v43, 0  ;;  %v709_v44 = vadd.s32 32, %v675_v40  ;;  %vm708_vm1 = vmand %vm704_vm10, %vm700_vm9 }
  0x1e   : > { %2555 = vmatprep.subr.bf16.mxu1 %v2727_v11  ;;  %v712_v45 = vadd.s32 32, %v696_v41  ;;  %vm707_vm2 = vmand %vm703_vm12, %vm699_vm11  ;;  %v710_v46 = vadd.s32 32, %v682_v43  ;;  %v711_v47 = vadd.s32 32, %v689_v42  ;;  %vm915_vm5 = vcmask 1046528  }
  0x1f   : > { %vm706_vm3 = vmand %vm702_vm15, %vm698_vm14  ;;  %v2930_v49 = vsel %vm705_vm13, %v709_v44, %v675_v40  ;;  %vm1001_vm9 = vcmask 523264   ;;  %v2730_v40 = vld [vmem:[%s3322_s6 + $0x28] sm:$0xff]   ;;  %vm1383_vm14 = vcmask 261120   ;;  %vm1489_vm15 = vcmask 1043968  }
  0x20   : > { %v2932_v50 = vsel %vm708_vm1, %v712_v45, %v696_v41  ;;  %v2934_v51 = vsel %vm706_vm3, %v710_v46, %v682_v43  ;;  %v2936_v52 = vsel %vm707_vm2, %v711_v47, %v689_v42  ;;  %vm717_vm4 = vcmp.eq.s32.totalorder %v2930_v49, 0 }
  0x21   : > { %2556 = vmatpush3.bf16.msra.mxu1 %v2727_v11  ;;  %vm720_vm6 = vcmp.eq.s32.totalorder %v2932_v50, 0  ;;  %vm718_vm7 = vcmp.eq.s32.totalorder %v2934_v51, 0  ;;  %vm719_vm8 = vcmp.eq.s32.totalorder %v2936_v52, 0  ;;  %vm724_vm10 = vcmp.eq.s32.totalorder %v2932_v50, 31  ;;  %v2732_v50 = vld [vmem:[%s3322_s6 + $0x38] sm:$0xff]  }
  0x22   : > { %2557 = vmatprep.subr.bf16.mxu1 %v2728_v12  ;;  %vm721_vm11 = vcmp.eq.s32.totalorder %v2930_v49, 31  ;;  %vm723_vm12 = vcmp.eq.s32.totalorder %v2936_v52, 31  ;;  %vm722_vm13 = vcmp.eq.s32.totalorder %v2934_v51, 31  ;;  %v2733_v51 = vld [vmem:[%s3322_s6] sm:$0xff]  }
  0x25   : > { %2558 = vmatpush3.bf16.msra.mxu1 %v2728_v12 }
  0x26   : > { %2563 = vmatprep.subr.bf16.mxu1 %v2922_v13 }
  0xea   : > { %v2543_v53 = vpop.f32.mrb[0].mxu0 }
  0xeb   : > { %v2938_v54 = vadd.f32 %v2543_v53, %v2295_v48  ;;  %v2549_v55 = vpop.f32.mrb[0].mxu1  ;;  %v795_v56 = vpop.f32.mrb[1].mxu0 }
  0xec   : > { %v2942_v57 = vadd.f32 %v2549_v55, %v2295_v48  ;;  %v2944_v58 = vadd.f32 %v2295_v48, %v795_v56  ;;  %v864_v59 = vpop.f32.mrb[1].mxu1  ;;  %v2544_v60 = vpop.f32.mrb[2].mxu0 }
  0xed   : > { %v906_v61 = vrot.slane %v2938_v54, 7  ;;  %v919_v62 = vrot.slane %v2938_v54, 1  ;;  %v865_v63 = vadd.f32 %v2295_v48, %v864_v59  ;;  %v807_v0 = vadd.f32 %v2544_v60, %v2295_v48  ;;  %v2550_v1 = vpop.f32.mrb[2].mxu1  ;;  %v798_v2 = vpop.f32.mrb[3].mxu0 }
  0xee   : > { %v890_v3 = vrot.slane %v2942_v57, 7  ;;  %v903_v4 = vrot.slane %v2944_v58, 7  ;;  %v916_v5 = vrot.slane %v2944_v58, 1  ;;  %v876_v6 = vadd.f32 %v2550_v1, %v2295_v48  ;;  %v867_v7 = vpop.f32.mrb[3].mxu1 }
  0xef   : > { %v887_v8 = vrot.slane %v865_v63, 7  ;;  %v2954_v9 = vpack.c.bf16 %v807_v0, %v2938_v54  ;;  %v908_v10 = vrot.slane %v807_v0, 7  ;;  %v921_v11 = vrot.slane %v807_v0, 1 }
  0xf0   : > { %v2958_v12 = vpack.c.bf16 %v876_v6, %v2942_v57  ;;  %v892_v14 = vrot.slane %v876_v6, 7  ;;  %v799_v15 = vadd.f32 %v2295_v48, %v798_v2  ;;  %v868_v16 = vadd.f32 %v2295_v48, %v867_v7  ;;  %v2736_v7 = vld [vmem:[%s3322_s6 + $0x18] sm:$0xff]  }
  0xf1   : > { %v898_v17 = vsel %vm754_vm0, 0.0, %v887_v8  ;;  %v909_v18 = vsel %vm754_vm0, %v906_v61, %v908_v10  ;;  %v922_v19 = vsel %vm915_vm5, %v919_v62, %v921_v11  ;;  %v927_v20 = vsel %vm915_vm5, %v921_v11, 0.0  ;;  %v2738_v10 = vld [vmem:[%s3322_s6 + $0x48] sm:$0xff]   ;;  %v2739_v11 = vld [vmem:[%s3322_s6 + $0x50] sm:$0xff]  }
  0xf2   : > { %v936_v21 = vsel %vm717_vm4, 0.0, %v898_v17  ;;  %v2068_v22 = vsel %vm717_vm4, -inf, %v898_v17  ;;  %v893_v23 = vsel %vm754_vm0, %v890_v3, %v892_v14  ;;  %v2976_v24 = vsel %vm720_vm6, 0.0, %v909_v18  ;;  %v2740_v14 = vld [vmem:[%s3322_s6 + $0x58] sm:$0xff]   ;;  %v2743_v17 = vld [vmem:[%s3328_s12 + $0x20] sm:$0xff]  }
  0xf3   : > { %v2072_v25 = vmax.f32 %v2068_v22, %v2944_v58  ;;  %v939_v26 = vsel %vm720_vm6, 0.0, %v893_v23  ;;  %v2071_v27 = vsel %vm720_vm6, -inf, %v893_v23  ;;  %v904_v28 = vrot.slane %v799_v15, 7  ;;  %v2304_v18 = vld [vmem:[%s3321_s5] ss:$0 sm:$0xff] }
  0xf4   : > { %v2075_v29 = vmax.f32 %v2071_v27, %v807_v0  ;;  %v917_v30 = vrot.slane %v799_v15, 1  ;;  %v2983_v31 = vpack.c.bf16 %v868_v16, %v865_v63  ;;  %v888_v32 = vrot.slane %v868_v16, 7 }
  0xf5   : > { %v2985_v33 = vmax.f32 %v2072_v25, %v865_v63  ;;  %v907_v34 = vsel %vm754_vm0, %v904_v28, %v906_v61  ;;  %v2989_v35 = vpack.c.bf16 %v799_v15, %v2944_v58  ;;  %v905_v36 = vsel %vm754_vm0, %v903_v4, %v904_v28  ;;  %v2731_v61 = vld [vmem:[%s3322_s6 + $0x30] sm:$0xff]  }
  0xf6   : > { %v2992_v37 = vmax.f32 %v2075_v29, %v876_v6  ;;  %v889_v38 = vsel %vm754_vm0, %v887_v8, %v888_v32  ;;  %v891_v39 = vsel %vm754_vm0, %v888_v32, %v890_v3  ;;  %v914_v41 = vsel %vm754_vm0, 0.0, %v903_v4  ;;  %v2735_v6 = vld [vmem:[%s3322_s6 + $0x10] sm:$0xff]   ;;  %v2737_v8 = vld [vmem:[%s3322_s6 + $0x40] sm:$0xff]  }
  0xf7   : > { %v938_v42 = vsel %vm719_vm8, 0.0, %v891_v39  ;;  %v2069_v43 = vsel %vm718_vm7, -inf, %v889_v38  ;;  %v2070_v44 = vsel %vm719_vm8, -inf, %v891_v39  ;;  %2559 = vmatprep.mubr.msk.bf16.mxu1 %vm1001_vm9, %v2989_v35  ;;  %v937_v45 = vsel %vm718_vm7, 0.0, %v889_v38 }
  0xf8   : > { %v3010_v46 = vpack.c.bf16 %v939_v26, %v938_v42  ;;  %v2073_v47 = vmax.f32 %v2069_v43, %v799_v15  ;;  %v2074_v48 = vmax.f32 %v2070_v44, %v2938_v54  ;;  %2560 = vmatmul.mubr.msk.bf16.vlgmr.msra.gmra.mrb[4].mxu1 %vm1001_vm9, %v2954_v9  ;;  %v3015_v53 = vpack.c.bf16 %v937_v45, %v936_v21  ;;  %v2741_v15 = vld [vmem:[%s3324_s8] sm:$0xff]  }
  0xf9   : > { %2564 = vmatpush3.bf16.msra.mxu1 %v2922_v13  ;;  %2571 = vmatprep.mubr.msk.bf16.mxu1 %vm1001_vm9, %v2989_v35  ;;  %v3022_v55 = vsel %vm717_vm4, 0.0, %v914_v41  ;;  %v3026_v56 = vsel %vm718_vm7, 0.0, %v905_v36  ;;  %v3030_v58 = vsel %vm719_vm8, 0.0, %v907_v34  ;;  %v918_v59 = vsel %vm915_vm5, %v916_v5, %v917_v30  ;;  %v2734_v5 = vld [vmem:[%s3322_s6 + $0x8] sm:$0xff]  }
  0xfa   : > { %v3033_v60 = vmax.f32 %v2073_v47, %v868_v16  ;;  %v3036_v13 = vmax.f32 %v2074_v48, %v2942_v57  ;;  %2565 = vmatprep.subr.bf16.mxu1 %v2730_v40  ;;  %v946_v63 = vpack.c.bf16 %v3026_v56, %v3022_v55  ;;  %v947_v0 = vpack.c.bf16 %v2976_v24, %v3030_v58  ;;  %v2742_v16 = vld [vmem:[%s3324_s8 + $0x8] sm:$0xff]   ;;  %v2753_v56 = vld [vmem:[%s3328_s12 + $0x50] sm:$0xff]   ;;  %v2755_v24 = vld [vmem:[%s3328_s12 + $0x60] sm:$0xff]  }
  0xfb   : > { %v920_v1 = vsel %vm915_vm5, %v917_v30, %v919_v62  ;;  %v3050_v2 = vsel %vm721_vm11, 0.0, %v918_v59  ;;  %v3054_v57 = vsel %vm723_vm12, 0.0, %v922_v19  ;;  %v3058_v3 = vsel %vm724_vm10, 0.0, %v927_v20  ;;  %2599 = vmatprep.subr.bf16.mxu0 %v2741_v15  ;;  %v2752_v55 = vld [vmem:[%s3328_s12 + $0x48] sm:$0xff]   ;;  %v2757_v58 = vld [vmem:[%s3328_s12 + $0x70] sm:$0xff]  }
  0xfc   : > { %v2080_v4 = vpack.c.bf16 %v3033_v60, %v2985_v33  ;;  %v3064_v54 = vsel %vm722_vm13, 0.0, %v920_v1  ;;  %v961_v49 = vpack.c.bf16 %v3058_v3, %v3054_v57  ;;  %v2081_v62 = vpack.c.bf16 %v2992_v37, %v3036_v13  ;;  %2600 = vmatpush3.bf16.msra.mxu0 %v2741_v15  ;;  %v2750_v15 = vld [vmem:[%s3328_s12 + $0x18] sm:$0xff]   ;;  %v2350_v57 = vld [vmem:[%s3325_s9] ss:$0 sm:$0xff] }
  0xfd   : > { %2566 = vmatpush3.bf16.msra.mxu1 %v2730_v40  ;;  %v960_v52 = vpack.c.bf16 %v3064_v54, %v3050_v2  ;;  %2601 = vmatprep.subr.bf16.mxu0 %v2742_v16  ;;  %vm1077_vm0 = vcmask 519168   ;;  %v2349_v40 = vld [vmem:[%s3323_s7] ss:$0 sm:$0xff]  ;;  %v2764_v2 = vld [vmem:[%s3330_s14 + $0x8] sm:$0xff]  }
  0xfe   : > { %2567 = vmatprep.subr.bf16.mxu1 %v2731_v61  ;;  %v2765_v54 = vld [vmem:[%s3334_s18] sm:$0xff]  }
  0xff   : > { %v2429_v37 = vld [vmem:[%s3332_s16] ss:$0 sm:$0xff] }
 0x100   : > { %2602 = vmatpush3.bf16.msra.mxu0 %v2742_v16  ;;  %v2761_v16 = vld [vmem:[%s3328_s12 + $0x90] sm:$0xff]  }
 0x101   : > { %2568 = vmatpush3.bf16.msra.mxu1 %v2731_v61  ;;  %2607 = vmatprep.subr.bf16.mxu0 %v2743_v17 }
 0x102   : > { %2569 = vmatprep.subr.bf16.mxu1 %v2732_v50 }
 0x105   : > { %2570 = vmatpush3.bf16.msra.mxu1 %v2732_v50 }
 0x106   : > { %2575 = vmatprep.subr.bf16.mxu1 %v2733_v51 }
 0x108   : > { %2572 = vmatmul.mubr.msk.bf16.vlgmr.msra.gmra.mrb[8].mxu1 %vm1001_vm9, %v2954_v9 }
 0x109   : > { %2576 = vmatpush3.bf16.msra.mxu1 %v2733_v51  ;;  %2583 = vmatprep.mubr.msk.bf16.mxu1 %vm1001_vm9, %v3015_v53 }
 0x10a   : > { %2577 = vmatprep.subr.bf16.mxu1 %v2734_v5 }
 0x10d   : > { %2578 = vmatpush3.bf16.msra.mxu1 %v2734_v5 }
 0x10e   : > { %2579 = vmatprep.subr.bf16.mxu1 %v2735_v6 }
 0x111   : > { %2580 = vmatpush3.bf16.msra.mxu1 %v2735_v6 }
 0x112   : > { %2581 = vmatprep.subr.bf16.mxu1 %v2736_v7 }
 0x115   : > { %2582 = vmatpush3.bf16.msra.mxu1 %v2736_v7  ;;  %v2744_v7 = vld [vmem:[%s3328_s12 + $0x28] sm:$0xff]  }
 0x116   : > { %2587 = vmatprep.subr.bf16.mxu1 %v2737_v8 }
 0x118   : > { %2584 = vmatmul.mubr.msk.bf16.vlgmr.msra.gmra.mrb[8].mxu1 %vm1001_vm9, %v3010_v46 }
 0x119   : > { %2588 = vmatpush3.bf16.msra.mxu1 %v2737_v8  ;;  %2595 = vmatprep.mubr.msk.bf16.mxu1 %vm1001_vm9, %v2983_v31  ;;  %v2745_v8 = vld [vmem:[%s3328_s12 + $0x30] sm:$0xff]  }
 0x11a   : > { %2589 = vmatprep.subr.bf16.mxu1 %v2738_v10 }
 0x11d   : > { %2590 = vmatpush3.bf16.msra.mxu1 %v2738_v10  ;;  %v2746_v10 = vld [vmem:[%s3328_s12 + $0x38] sm:$0xff]  }
 0x11e   : > { %2591 = vmatprep.subr.bf16.mxu1 %v2739_v11 }
 0x121   : > { %2592 = vmatpush3.bf16.msra.mxu1 %v2739_v11  ;;  %v2747_v11 = vld [vmem:[%s3328_s12] sm:$0xff]  }
 0x122   : > { %2593 = vmatprep.subr.bf16.mxu1 %v2740_v14 }
 0x125   : > { %2594 = vmatpush3.bf16.msra.mxu1 %v2740_v14  ;;  %v2749_v14 = vld [vmem:[%s3328_s12 + $0x10] sm:$0xff]  }
 0x128   : > { %2596 = vmatmul.mubr.msk.bf16.vlgmr.msra.gmra.mrb[8].mxu1 %vm1001_vm9, %v2958_v12 }
 0x1cb   : > { %v2561_v19 = vpop.f32.mrb[4].mxu1 }
 0x1cc   : > { %v1051_v20 = vadd.f32 %v2561_v19, %v2304_v18  ;;  %v1042_v21 = vpop.f32.mrb[5].mxu1 }
 0x1cd   : > { %v1043_v22 = vadd.f32 %v2304_v18, %v1042_v21  ;;  %v2562_v23 = vpop.f32.mrb[6].mxu1 }
 0x1ce   : > { %v1054_v25 = vadd.f32 %v2562_v23, %v2304_v18  ;;  %v1045_v26 = vpop.f32.mrb[7].mxu1  ;;  %v1059_v29 = vmax.f32 %v1051_v20, 0.0 }
 0x1cf   : > { %v1057_v27 = vmax.f32 %v1043_v22, 0.0  ;;  %v1046_v28 = vadd.f32 %v2304_v18, %v1045_v26  ;;  %v2355_v18 = vld [vmem:[%s3326_s10] ss:$0 sm:$0xff] }
 0x1d0   : > { %v1060_v32 = vmax.f32 %v1054_v25, 0.0  ;;  %v2451_v38 = vpack.c.bf16 %v1059_v29, %v1059_v29 }
 0x1d1   : > { %v2449_v30 = vpack.c.bf16 %v1057_v27, %v1057_v27  ;;  %v1058_v34 = vmax.f32 %v1046_v28, 0.0  ;;  %v2356_v27 = vld [vmem:[%s3327_s11] ss:$0 sm:$0xff] }
 0x1d2   : > { %v2452_v39 = vpack.c.bf16 %v1060_v32, %v1060_v32  ;;  %1080 = vst.msk [vmem:[%s3125_s22 + $0x10] sm:$0xf] %vm1077_vm0, %v2451_v38 }
 0x1d3   : > { %1078 = vst.msk [vmem:[%s3125_s22] sm:$0xf] %vm1077_vm0, %v2449_v30  ;;  %v2450_v36 = vpack.c.bf16 %v1058_v34, %v1058_v34 }
 0x1d4   : > { %1081 = vst.msk [vmem:[%s3125_s22 + $0x18] sm:$0xf] %vm1077_vm0, %v2452_v39 }
 0x1d5   : > { %1079 = vst.msk [vmem:[%s3125_s22 + $0x8] sm:$0xf] %vm1077_vm0, %v2450_v36 }
 0x1fb   : > { %v2597_v41 = vpop.f32.mrb[8].mxu1 }
 0x1fc   : > { %v1352_v42 = vadd.f32 %v2597_v41, %v2349_v40  ;;  %v1324_v43 = vpop.f32.mrb[9].mxu1 }
 0x1fd   : > { %v1350_v44 = vadd.f32 %v2349_v40, %v1324_v43  ;;  %v2598_v45 = vpop.f32.mrb[10].mxu1 }
 0x1fe   : > { %v1353_v47 = vadd.f32 %v2598_v45, %v2349_v40  ;;  %v1327_v48 = vpop.f32.mrb[11].mxu1  ;;  %v1356_v61 = vmax.f32 %v1352_v42, 0.0  ;;  %v2423_v45 = vld [vmem:[%s3329_s13] ss:$0 sm:$0xff] }
 0x1ff   : > { %v1351_v59 = vadd.f32 %v2349_v40, %v1327_v48  ;;  %v1354_v50 = vmax.f32 %v1350_v44, 0.0 }
 0x200   : > { %v1357_v1 = vmax.f32 %v1353_v47, 0.0 }
 0x201   : > { %v1355_v51 = vmax.f32 %v1351_v59, 0.0 }
 0x202   : > { %v1359_v5 = vpack.c.bf16 %v1357_v1, %v1356_v61 }
 0x203   : > { %v1358_v6 = vpack.c.bf16 %v1355_v51, %v1354_v50 }
 0x205   : > { %2603 = vmatprep.mubr.msk.bf16.mxu0 %vm1383_vm14, %v1358_v6 }
 0x206   : > { %2604 = vmatmul.mubr.msk.bf16.vlgmr.msra.gmra.mrb[4].mxu0 %vm1383_vm14, %v1359_v5 }
 0x207   : > { %2608 = vmatpush3.bf16.msra.mxu0 %v2743_v17  ;;  %2615 = vmatprep.mubr.msk.bf16.mxu0 %vm1001_vm9, %v3015_v53  ;;  %v2748_v53 = vld [vmem:[%s3328_s12 + $0x8] sm:$0xff]   ;;  %v2762_v17 = vld [vmem:[%s3328_s12 + $0x98] sm:$0xff]  }
 0x208   : > { %2609 = vmatprep.subr.bf16.mxu0 %v2744_v7 }
 0x20b   : > { %2610 = vmatpush3.bf16.msra.mxu0 %v2744_v7 }
 0x20c   : > { %2611 = vmatprep.subr.bf16.mxu0 %v2745_v8 }
 0x20f   : > { %2612 = vmatpush3.bf16.msra.mxu0 %v2745_v8 }
 0x210   : > { %2613 = vmatprep.subr.bf16.mxu0 %v2746_v10 }
 0x213   : > { %2614 = vmatpush3.bf16.msra.mxu0 %v2746_v10 }
 0x214   : > { %2619 = vmatprep.subr.bf16.mxu0 %v2747_v11 }
 0x216   : > { %2616 = vmatmul.mubr.msk.bf16.vlgmr.msra.gmra.mrb[8].mxu0 %vm1001_vm9, %v3010_v46  ;;  %v2751_v46 = vld [vmem:[%s3328_s12 + $0x40] sm:$0xff]  }
 0x217   : > { %2620 = vmatpush3.bf16.msra.mxu0 %v2747_v11  ;;  %2627 = vmatprep.mubr.msk.bf16.mxu0 %vm1001_vm9, %v946_v63  ;;  %v2754_v63 = vld [vmem:[%s3328_s12 + $0x58] sm:$0xff]  }
 0x218   : > { %2621 = vmatprep.subr.bf16.mxu0 %v2748_v53 }
 0x21b   : > { %2622 = vmatpush3.bf16.msra.mxu0 %v2748_v53 }
 0x21c   : > { %2623 = vmatprep.subr.bf16.mxu0 %v2749_v14 }
 0x21f   : > { %2624 = vmatpush3.bf16.msra.mxu0 %v2749_v14  ;;  %v2766_v14 = vld [vmem:[%s3334_s18 + $0x8] sm:$0xff]  }
 0x220   : > { %2625 = vmatprep.subr.bf16.mxu0 %v2750_v15 }
 0x223   : > { %2626 = vmatpush3.bf16.msra.mxu0 %v2750_v15  ;;  %v2767_v15 = vld [vmem:[%s3334_s18 + $0x10] sm:$0xff]  }
 0x224   : > { %2631 = vmatprep.subr.bf16.mxu0 %v2751_v46 }
 0x226   : > { %2628 = vmatmul.mubr.msk.bf16.vlgmr.msra.gmra.mrb[8].mxu0 %vm1001_vm9, %v947_v0  ;;  %v2758_v0 = vld [vmem:[%s3328_s12 + $0x78] sm:$0xff]  }
 0x227   : > { %2632 = vmatpush3.bf16.msra.mxu0 %v2751_v46  ;;  %2639 = vmatprep.mubr.msk.bf16.mxu0 %vm1001_vm9, %v2989_v35  ;;  %v2756_v35 = vld [vmem:[%s3328_s12 + $0x68] sm:$0xff]   ;;  %v2768_v46 = vld [vmem:[%s3334_s18 + $0x18] sm:$0xff]  }
 0x228   : > { %2633 = vmatprep.subr.bf16.mxu0 %v2752_v55 }
 0x22b   : > { %2634 = vmatpush3.bf16.msra.mxu0 %v2752_v55  ;;  %v2424_v55 = vld [vmem:[%s3331_s15] ss:$0 sm:$0xff] }
 0x22c   : > { %2635 = vmatprep.subr.bf16.mxu0 %v2753_v56 }
 0x22f   : > { %2636 = vmatpush3.bf16.msra.mxu0 %v2753_v56 }
 0x230   : > { %2637 = vmatprep.subr.bf16.mxu0 %v2754_v63 }
 0x233   : > { %2638 = vmatpush3.bf16.msra.mxu0 %v2754_v63 }
 0x234   : > { %2643 = vmatprep.subr.bf16.mxu0 %v2755_v24 }
 0x236   : > { %2640 = vmatmul.mubr.msk.bf16.vlgmr.msra.gmra.mrb[8].mxu0 %vm1001_vm9, %v2954_v9  ;;  %v2759_v9 = vld [vmem:[%s3328_s12 + $0x80] sm:$0xff]  }
 0x237   : > { %2644 = vmatpush3.bf16.msra.mxu0 %v2755_v24  ;;  %2651 = vmatprep.mubr.msk.bf16.mxu0 %vm1001_vm9, %v2983_v31  ;;  %v2760_v31 = vld [vmem:[%s3328_s12 + $0x88] sm:$0xff]  }
 0x238   : > { %2645 = vmatprep.subr.bf16.mxu0 %v2756_v35 }
 0x23b   : > { %2646 = vmatpush3.bf16.msra.mxu0 %v2756_v35 }
 0x23c   : > { %2647 = vmatprep.subr.bf16.mxu0 %v2757_v58 }
 0x23f   : > { %2648 = vmatpush3.bf16.msra.mxu0 %v2757_v58 }
 0x240   : > { %2649 = vmatprep.subr.bf16.mxu0 %v2758_v0 }
 0x243   : > { %2650 = vmatpush3.bf16.msra.mxu0 %v2758_v0 }
 0x244   : > { %2655 = vmatprep.subr.bf16.mxu0 %v2759_v9 }
 0x246   : > { %2652 = vmatmul.mubr.msk.bf16.vlgmr.msra.gmra.mrb[8].mxu0 %vm1001_vm9, %v2958_v12  ;;  %v2763_v12 = vld [vmem:[%s3330_s14] sm:$0xff]  }
 0x247   : > { %2656 = vmatpush3.bf16.msra.mxu0 %v2759_v9  ;;  %2663 = vmatprep.mubr.msk.bf16.mxu0 %vm1001_vm9, %v960_v52 }
 0x248   : > { %2657 = vmatprep.subr.bf16.mxu0 %v2760_v31  ;;  %2667 = vmatprep.subr.bf16.mxu1 %v2763_v12 }
 0x249   : > { %2668 = vmatpush3.bf16.msra.mxu1 %v2763_v12 }
 0x24a   : > { %2669 = vmatprep.subr.bf16.mxu1 %v2764_v2 }
 0x24b   : > { %2658 = vmatpush3.bf16.msra.mxu0 %v2760_v31 }
 0x24c   : > { %2659 = vmatprep.subr.bf16.mxu0 %v2761_v16 }
 0x24d   : > { %2670 = vmatpush3.bf16.msra.mxu1 %v2764_v2 }
 0x24e   : > { %2675 = vmatprep.subr.bf16.mxu1 %v2765_v54 }
 0x24f   : > { %2660 = vmatpush3.bf16.msra.mxu0 %v2761_v16 }
 0x250   : > { %2661 = vmatprep.subr.bf16.mxu0 %v2762_v17 }
 0x253   : > { %2662 = vmatpush3.bf16.msra.mxu0 %v2762_v17  ;;  %v2430_v17 = vld [vmem:[%s3333_s17] ss:$0 sm:$0xff] }
 0x256   : > { %2664 = vmatmul.mubr.msk.bf16.vlgmr.msra.gmra.mrb[8].mxu0 %vm1001_vm9, %v961_v49 }
 0x2d9   : > { %v2605_v3 = vpop.f32.mrb[4].mxu0 }
 0x2da   : > { %v1433_v49 = vadd.f32 %v2605_v3, %v2350_v57  ;;  %v1424_v52 = vpop.f32.mrb[5].mxu0 }
 0x2db   : > { %v1425_v19 = vadd.f32 %v2350_v57, %v1424_v52  ;;  %v2606_v20 = vpop.f32.mrb[6].mxu0 }
 0x2dc   : > { %v1441_v21 = vmax.f32 %v1433_v49, 0.0  ;;  %v1436_v22 = vadd.f32 %v2606_v20, %v2350_v57  ;;  %v1427_v23 = vpop.f32.mrb[7].mxu0 }
 0x2dd   : > { %v1439_v25 = vmax.f32 %v1425_v19, 0.0  ;;  %v1428_v26 = vadd.f32 %v2350_v57, %v1427_v23 }
 0x2de   : > { %v1452_v28 = vmul.f32 %v2355_v18, %v1441_v21  ;;  %v1442_v29 = vmax.f32 %v1436_v22, 0.0 }
 0x2df   : > { %v1450_v30 = vmul.f32 %v2355_v18, %v1439_v25  ;;  %v1440_v32 = vmax.f32 %v1428_v26, 0.0  ;;  %v2435_v25 = vld [vmem:[%s3335_s19] ss:$0 sm:$0xff] }
 0x2e0   : > { %v1453_v34 = vmul.f32 %v2355_v18, %v1442_v29  ;;  %v1463_v36 = vadd.f32 %v2356_v27, %v1452_v28 }
 0x2e1   : > { %v1451_v38 = vmul.f32 %v2355_v18, %v1440_v32  ;;  %v1461_v40 = vadd.f32 %v2356_v27, %v1450_v30 }
 0x2e2   : > { %v2455_v39 = vpack.c.bf16 %v1463_v36, %v1463_v36  ;;  %v3243_v41 = vadd.f32 %v2356_v27, %v1453_v34 }
 0x2e3   : > { %v1462_v42 = vadd.f32 %v2356_v27, %v1451_v38  ;;  %v2453_v44 = vpack.c.bf16 %v1461_v40, %v1461_v40 }
 0x2e4   : > { %1481 = vrot.lane.b32.xlu0 %v2455_v39, %s2778_s26 }
 0x2e5   : > { %v2454_v43 = vpack.c.bf16 %v1462_v42, %v1462_v42 }
 0x2e7   : > { %1479 = vrot.lane.b32.xlu1 %v2454_v43, %s2778_s26 }
 0x2e8   : > { %1477 = vrot.lane.b32.xlu0 %v2453_v44, %s2778_s26 }
 0x329   : > { %v2665_v47 = vpop.f32.mrb[8].mxu0 }
 0x32a   : > { %v1936_v48 = vadd.f32 %v2665_v47, %v2423_v45  ;;  %v1908_v59 = vpop.f32.mrb[9].mxu0  ;;  %v2456_v47 = vpack.c.bf16 %v3243_v41, %v3243_v41 }
 0x32b   : > { %v1934_v61 = vadd.f32 %v2423_v45, %v1908_v59  ;;  %v2666_v1 = vpop.f32.mrb[10].mxu0 }
 0x32c   : > { %v1937_v50 = vadd.f32 %v2666_v1, %v2423_v45  ;;  %v1911_v51 = vpop.f32.mrb[11].mxu0  ;;  %v1940_v6 = vmax.f32 %v1936_v48, 0.0 }
 0x32d   : > { %v1935_v5 = vadd.f32 %v2423_v45, %v1911_v51  ;;  %v1938_v8 = vmax.f32 %v1934_v61, 0.0 }
 0x32e   : > { %v1941_v7 = vmax.f32 %v1937_v50, 0.0 }
 0x32f   : > { %v1939_v10 = vmax.f32 %v1935_v5, 0.0 }
 0x330   : > { %v1943_v11 = vpack.c.bf16 %v1941_v7, %v1940_v6 }
 0x331   : > { %v1942_v53 = vpack.c.bf16 %v1939_v10, %v1938_v8 }
 0x333   : > { %2671 = vmatprep.mubr.msk.bf16.mxu1 %vm1383_vm14, %v1942_v53 }
 0x334   : > { %2672 = vmatmul.mubr.msk.bf16.vlgmr.msra.gmra.mrb[12].mxu1 %vm1383_vm14, %v1943_v11 }
 0x335   : > { %2676 = vmatpush3.bf16.msra.mxu1 %v2765_v54  ;;  %2683 = vmatprep.mubr.msk.bf16.mxu1 %vm1001_vm9, %v2080_v4 }
 0x336   : > { %2677 = vmatprep.subr.bf16.mxu1 %v2766_v14 }
 0x339   : > { %2678 = vmatpush3.bf16.msra.mxu1 %v2766_v14 }
 0x33a   : > { %2679 = vmatprep.subr.bf16.mxu1 %v2767_v15 }
 0x33d   : > { %2680 = vmatpush3.bf16.msra.mxu1 %v2767_v15 }
 0x33e   : > { %2681 = vmatprep.subr.bf16.mxu1 %v2768_v46 }
 0x341   : > { %2682 = vmatpush3.bf16.msra.mxu1 %v2768_v46 }
 0x344   : > { %2684 = vmatmul.mubr.msk.bf16.vlgmr.msra.gmra.mrb[16].mxu1 %vm1001_vm9, %v2081_v62 }
 0x356   : > { %v1482_v33 = vpop.permute.xlu0 %1481 }
 0x357   : > { %1492 = vst.msk [vmem:[%s3125_s22 + $0x10] sm:$0xf] %vm1489_vm15, %v1482_v33 }
 0x359   : > { %v1480_v4 = vpop.permute.xlu1 %1479 }
 0x35a   : > { %v1478_v60 = vpop.permute.xlu0 %1477  ;;  %1491 = vst.msk [vmem:[%s3125_s22 + $0x8] sm:$0xf] %vm1489_vm15, %v1480_v4 }
 0x35b   : > { %1490 = vst.msk [vmem:[%s3125_s22] sm:$0xf] %vm1489_vm15, %v1478_v60 }
 0x407   : > { %v2673_v56 = vpop.f32.mrb[12].mxu1 }
 0x408   : > { %v2016_v63 = vadd.f32 %v2673_v56, %v2424_v55  ;;  %v2007_v24 = vpop.f32.mrb[13].mxu1 }
 0x409   : > { %v2008_v13 = vadd.f32 %v2424_v55, %v2007_v24  ;;  %v2674_v62 = vpop.f32.mrb[14].mxu1 }
 0x40a   : > { %v2024_v35 = vmax.f32 %v2016_v63, 0.0  ;;  %v2019_v58 = vadd.f32 %v2674_v62, %v2424_v55  ;;  %v2010_v0 = vpop.f32.mrb[15].mxu1 }
 0x40b   : > { %v2022_v9 = vmax.f32 %v2008_v13, 0.0  ;;  %v2011_v31 = vadd.f32 %v2424_v55, %v2010_v0 }
 0x40c   : > { %v2035_v16 = vmul.f32 %v2429_v37, %v2024_v35  ;;  %v2025_v12 = vmax.f32 %v2019_v58, 0.0 }
 0x40d   : > { %v2033_v2 = vmul.f32 %v2429_v37, %v2022_v9  ;;  %v2023_v54 = vmax.f32 %v2011_v31, 0.0 }
 0x40e   : > { %v2036_v57 = vmul.f32 %v2429_v37, %v2025_v12  ;;  %v2046_v52 = vadd.f32 %v2430_v17, %v2035_v16 }
 0x40f   : > { %v2044_v3 = vadd.f32 %v2430_v17, %v2033_v2  ;;  %v2034_v49 = vmul.f32 %v2429_v37, %v2023_v54 }
 0x410   : > { %v2047_v19 = vadd.f32 %v2430_v17, %v2036_v57  ;;  %v2459_v22 = vpack.c.bf16 %v2046_v52, %v2046_v52 }
 0x411   : > { %v2457_v18 = vpack.c.bf16 %v2044_v3, %v2044_v3  ;;  %v2045_v20 = vadd.f32 %v2430_v17, %v2034_v49 }
 0x412   : > { %v2460_v23 = vpack.c.bf16 %v2047_v19, %v2047_v19  ;;  %2066 = vst.msk [vmem:[%s3125_s22 + $0x14] sm:$0xf] %vm1077_vm0, %v2459_v22 }
 0x413   : > { %2064 = vst.msk [vmem:[%s3125_s22 + $0x4] sm:$0xf] %vm1077_vm0, %v2457_v18  ;;  %v2458_v21 = vpack.c.bf16 %v2045_v20, %v2045_v20 }
 0x414   : > { %2067 = vst.msk [vmem:[%s3125_s22 + $0x1c] sm:$0xf] %vm1077_vm0, %v2460_v23 }
 0x415   : > { %2065 = vst.msk [vmem:[%s3125_s22 + $0xc] sm:$0xf] %vm1077_vm0, %v2458_v21 }
 0x417   : > { %v2685_v26 = vpop.f32.mrb[16].mxu1 }
 0x418   : > { %v2170_v27 = vadd.f32 %v2685_v26, %v2435_v25  ;;  %v2161_v28 = vpop.f32.mrb[17].mxu1 }
 0x419   : > { %v2162_v29 = vadd.f32 %v2435_v25, %v2161_v28  ;;  %v2686_v30 = vpop.f32.mrb[18].mxu1 }
 0x41a   : > { %v2178_v32 = vmax.f32 %v2170_v27, 0.0  ;;  %v2164_v34 = vpop.f32.mrb[19].mxu1  ;;  %v2173_v40 = vadd.f32 %v2686_v30, %v2435_v25 }
 0x41b   : > { %v2176_v36 = vmax.f32 %v2162_v29, 0.0  ;;  %v2165_v38 = vadd.f32 %v2435_v25, %v2164_v34 }
 0x41c   : > { %v2463_v39 = vpack.c.bf16 %v2178_v32, %v2178_v32  ;;  %v2179_v45 = vmax.f32 %v2173_v40, 0.0 }
 0x41d   : > { %v2461_v42 = vpack.c.bf16 %v2176_v36, %v2176_v36  ;;  %v2177_v43 = vmax.f32 %v2165_v38, 0.0 }
 0x41e   : > { %2196 = vrot.lane.b32.xlu1 %v2463_v39, %s2778_s26  ;;  %v2464_v48 = vpack.c.bf16 %v2179_v45, %v2179_v45 }
 0x41f   : > { %v2462_v44 = vpack.c.bf16 %v2177_v43, %v2177_v43  ;;  %2192 = vrot.lane.b32.xlu0 %v2461_v42, %s2778_s26 }
 0x422   : > { %2194 = vrot.lane.b32.xlu1 %v2462_v44, %s2778_s26 }
 0x423   : > { %1483 = vrot.lane.b32.xlu0 %v2456_v47, %s2778_s26 }
 0x426   : > { %2198 = vrot.lane.b32.xlu1 %v2464_v48, %s2778_s26 }
 0x490   : > { %v2197_v59 = vpop.permute.xlu1 %2196 }
 0x491   : > { %v2193_v61 = vpop.permute.xlu0 %2192  ;;  %2206 = vst.msk [vmem:[%s3125_s22 + $0x14] sm:$0xf] %vm1489_vm15, %v2197_v59 }
 0x492   : > { %2204 = vst.msk [vmem:[%s3125_s22 + $0x4] sm:$0xf] %vm1489_vm15, %v2193_v61 }
 0x494   : > { %v2195_v1 = vpop.permute.xlu1 %2194 }
 0x495   : > { %2205 = vst.msk [vmem:[%s3125_s22 + $0xc] sm:$0xf] %vm1489_vm15, %v2195_v1  ;;  %v1484_v50 = vpop.permute.xlu0 %1483 }
 0x496   : > { %1493 = vst.msk [vmem:[%s3125_s22 + $0x18] sm:$0xf] %vm1489_vm15, %v1484_v50 }
 0x498   : > { %v2199_v41 = vpop.permute.xlu1 %2198 }
 0x499   : > { %2207 = vst.msk [vmem:[%s3125_s22 + $0x1c] sm:$0xf] %vm1489_vm15, %v2199_v41 }
 0x49a PF: > { %s30_s1 = sadd.s32 1, %s2775_s1  }
 0x49b   : > { %p27_p4 = scmp.ge.s32.totalorder %s30_s1, 4  }
 0x49d   :  { %29 = sbr.rel (!%p27_p4) target bundleno = 6 (0x6), region = 139 }

// kernel: imu_network.5
= control target key start
LH: loop header
LB: loop body
LE: loop exit
PB: predicated region body
PF: predicated region fallthrough
CT: control target
= control target key end

     0   :  { %s3628_s27 = smov 0   ;;  %s4313_s0 = inlined_call_operand.vmem [shape: bf16[16,256], index: 0, kind: input, shape index: {}]   ;;  %s4314_s1 = inlined_call_operand.vmem [shape: bf16[16,256], index: 1, kind: input, shape index: {}]   ;;  %s4315_s2 = inlined_call_operand.vmem [shape: bf16[256,64], index: 2, kind: input, shape index: {}]   ;;  %s4316_s3 = inlined_call_operand.vmem [shape: f32[1,64], index: 3, kind: input, shape index: {}]   ;;  %s4317_s4 = inlined_call_operand.vmem [shape: bf16[3,256,32], index: 4, kind: input, shape index: {}]   ;;  %s4318_s5 = inlined_call_operand.vmem [shape: f32[1,32], index: 5, kind: input, shape index: {}]   ;;  %s4319_s6 = inlined_call_operand.vmem [shape: bf16[32,64], index: 6, kind: input, shape index: {}]   ;;  %s4320_s7 = inlined_call_operand.vmem [shape: f32[1,64], index: 7, kind: input, shape index: {}]   ;;  %s4321_s8 = inlined_call_operand.vmem [shape: f32[1,64], index: 8, kind: input, shape index: {}]   ;;  %s4322_s9 = inlined_call_operand.vmem [shape: f32[1,64], index: 9, kind: input, shape index: {}]   ;;  %s4323_s10 = inlined_call_operand.vmem [shape: bf16[5,256,32], index: 10, kind: input, shape index: {}]   ;;  %s4324_s11 = inlined_call_operand.vmem [shape: f32[1,32], index: 11, kind: input, shape index: {}]   ;;  %s4325_s12 = inlined_call_operand.vmem [shape: bf16[32,64], index: 12, kind: input, shape index: {}]   ;;  %s4326_s13 = inlined_call_operand.vmem [shape: f32[1,64], index: 13, kind: input, shape index: {}]   ;;  %s4327_s14 = inlined_call_operand.vmem [shape: f32[1,64], index: 14, kind: input, shape index: {}]   ;;  %s4328_s15 = inlined_call_operand.vmem [shape: f32[1,64], index: 15, kind: input, shape index: {}]   ;;  %s4329_s16 = inlined_call_operand.vmem [shape: bf16[256,64], index: 16, kind: input, shape index: {}]   ;;  %s4330_s17 = inlined_call_operand.vmem [shape: f32[1,64], index: 17, kind: input, shape index: {}]   ;;  %s4331_s18 = inlined_call_operand.vmem [shape: bf16[16,256], index: 18, kind: output, shape index: {}]  }
   0x1   :  { %4334 = sst [smem:[#allocation3_spill]] %s4313_s0 }
   0x2   :  { %4335 = sst [smem:[#allocation4_spill]] %s4314_s1 }
   0x3   :  { %4336 = sst [smem:[#allocation5_spill]] %s4315_s2 }
   0x4   :  { %4337 = sst [smem:[#allocation6_spill]] %s4327_s14 }
   0x5   :  { %4338 = sst [smem:[#allocation7_spill]] %s4328_s15 }
   0x6   :  { %4339 = sst [smem:[#allocation8_spill]] %s4330_s17 }
   0x7 LB: > { %4340 = sst [smem:[#allocation2_spill]] %s3528_s27  ;;  %s3634_s28 = sadd.s32 4294967295, %s3528_s27   ;;  %s3528_s27 = sphi %s3628_s27, %s28_s27  }
   0x8   : > { %p2670_p0 = scmp.ge.s32.totalorder %s3528_s27, 1  ;;  %p522_p1 = scmp.lt.s32.totalorder %s3528_s27, 3 }
   0xa   : > { %p523_p2 = pnand %p2670_p0, %p522_p1 }
   0xb   : > { %s4341_s0 = sld [smem:[#allocation5_spill]] (!%p523_p2)  ;;  %v3355_v1 = vld [vmem:[%s4317_s4 + $0xc0] sm:$0xff] (!%p523_p2)   ;;  %v3359_v5 = vld [vmem:[%s4317_s4 + $0xc8] sm:$0xff] (!%p523_p2)   ;;  %v3363_v9 = vld [vmem:[%s4317_s4 + $0xd0] sm:$0xff] (!%p523_p2)   ;;  %p581_p3 = scmp.lt.s32.totalorder (!%p523_p2), %s3634_s28, 1  ;;  %v598_v27 = vlaneseq (!%p523_p2)  ;;  %vm628_vm1 = vcmask (!%p523_p2), 1040384  }
   0xc   : > { %526 = sbr.rel (%p523_p2) target bundleno = 995 (0x3e3), region = 92  ;;  %3123 = vmatprep.subr.bf16.mxu1 (!%p523_p2), %v3355_v1  ;;  %v3357_v3 = vld [vmem:[%s4317_s4 + $0x80] sm:$0xff] (!%p523_p2)   ;;  %v3361_v7 = vld [vmem:[%s4317_s4 + $0x88] sm:$0xff] (!%p523_p2)   ;;  %v3365_v11 = vld [vmem:[%s4317_s4 + $0x90] sm:$0xff] (!%p523_p2)   ;;  %s2677_s30 = sshll.u32 (!%p523_p2), %s3634_s28, 3  ;;  %vm3531_vm8 = vmmov (!%p523_p2), 0  }
   0xd   : > { %3124 = vmatpush3.bf16.msra.mxu1 (!%p523_p2), %v3357_v3  ;;  %v3367_v13 = vld [vmem:[%s4317_s4 + $0xd8] sm:$0xff] (!%p523_p2)   ;;  %v3371_v17 = vld [vmem:[%s4317_s4 + $0xe0] sm:$0xff] (!%p523_p2)   ;;  %v3375_v21 = vld [vmem:[%s4317_s4 + $0xe8] sm:$0xff] (!%p523_p2)   ;;  %s4342_s21 = sld [smem:[#allocation3_spill]] (!%p523_p2)  ;;  %s4343_s15 = sld [smem:[#allocation4_spill]] (!%p523_p2)  ;;  %v599_v32 = vshrl.u32 (!%p523_p2), %v598_v27, 7  ;;  %v600_v34 = vstv (!%p523_p2), %s2677_s30 }
   0xe   : > { %3125 = vmatprep.subr.bf16.mxu1 (!%p523_p2), %v3359_v5  ;;  %v3369_v15 = vld [vmem:[%s4317_s4 + $0x98] sm:$0xff] (!%p523_p2)   ;;  %v3373_v19 = vld [vmem:[%s4317_s4 + $0xa0] sm:$0xff] (!%p523_p2)   ;;  %v3377_v23 = vld [vmem:[%s4317_s4 + $0xa8] sm:$0xff] (!%p523_p2)   ;;  %v3530_v27 = vmov (!%p523_p2), 0.0   ;;  %vm846_vm9 = vcmask (!%p523_p2), 519168   ;;  %vm1395_vm10 = vcmask (!%p523_p2), 261120  }
   0xf   : > { %v3379_v25 = vld [vmem:[%s4317_s4 + $0xf0] sm:$0xff] (!%p523_p2)   ;;  %v3383_v30 = vld [vmem:[%s4317_s4 + $0xf8] sm:$0xff] (!%p523_p2)   ;;  %v3388_v39 = vld [vmem:[%s4317_s4 + $0x40] sm:$0xff] (!%p523_p2)   ;;  %v601_v41 = vadd.s32 (!%p523_p2), %v600_v34, %v599_v32  ;;  %vm643_vm11 = vcmask (!%p523_p2), 1046528   ;;  %s3532_s19 = smov (!%p523_p2), 64   ;;  %vm1463_vm14 = vcmask (!%p523_p2), 1043968  }
  0x10   : > { %v3381_v28 = vld [vmem:[%s4317_s4 + $0xb0] sm:$0xff] (!%p523_p2)   ;;  %v3385_v33 = vld [vmem:[%s4317_s4 + $0xb8] sm:$0xff] (!%p523_p2)   ;;  %v3389_v40 = vld [vmem:[%s4317_s4 + $0x140] sm:$0xff] (!%p523_p2)   ;;  %s4348_s24 = sld [smem:[#allocation6_spill]] (!%p523_p2)  ;;  %s4349_s14 = sld [smem:[#allocation7_spill]] (!%p523_p2) }
  0x11   : > { %v3354_v0 = vld [vmem:[%s4341_s0 + $0x40] sm:$0xff] (!%p523_p2)   ;;  %v3358_v4 = vld [vmem:[%s4341_s0 + $0x48] sm:$0xff] (!%p523_p2)   ;;  %v3362_v8 = vld [vmem:[%s4341_s0 + $0x50] sm:$0xff] (!%p523_p2)   ;;  %3126 = vmatpush3.bf16.msra.mxu1 (!%p523_p2), %v3361_v7  ;;  %v603_v47 = vsub.s32 (!%p523_p2), 0, %v601_v41  ;;  %vm602_vm0 = vcmp.lt.s32.totalorder (!%p523_p2), %v601_v41, 0  ;;  %s4350_s27 = sld [smem:[#allocation8_spill]] (!%p523_p2) }
  0x12   : > { %3101 = vmatprep.subr.bf16.mxu0 (!%p523_p2), %v3354_v0  ;;  %v3356_v2 = vld [vmem:[%s4341_s0] sm:$0xff] (!%p523_p2)   ;;  %v3360_v6 = vld [vmem:[%s4341_s0 + $0x8] sm:$0xff] (!%p523_p2)   ;;  %v3364_v10 = vld [vmem:[%s4341_s0 + $0x10] sm:$0xff] (!%p523_p2)   ;;  %3127 = vmatprep.subr.bf16.mxu1 (!%p523_p2), %v3363_v9 }
  0x13   : > { %3102 = vmatpush3.bf16.msra.mxu0 %v3356_v2  ;;  %v3366_v12 = vld [vmem:[%s4341_s0 + $0x58] sm:$0xff]   ;;  %v3370_v16 = vld [vmem:[%s4341_s0 + $0x60] sm:$0xff]   ;;  %v3374_v20 = vld [vmem:[%s4341_s0 + $0x68] sm:$0xff]   ;;  %s582_s25 = scalar_select %p581_p3, %s3634_s28, 1  ;;  %v2678_v52 = vmin.u32 %v603_v47, %v601_v41 }
  0x14   : > { %3103 = vmatprep.subr.bf16.mxu0 %v3358_v4  ;;  %v3368_v14 = vld [vmem:[%s4341_s0 + $0x18] sm:$0xff]   ;;  %v3372_v18 = vld [vmem:[%s4341_s0 + $0x20] sm:$0xff]   ;;  %v3376_v22 = vld [vmem:[%s4341_s0 + $0x28] sm:$0xff]  }
  0x15   : > { %3128 = vmatpush3.bf16.msra.mxu1 %v3365_v11  ;;  %v3378_v24 = vld [vmem:[%s4341_s0 + $0x70] sm:$0xff]   ;;  %s3721_s2 = sshll.u32 %s582_s25, 3  ;;  %v3382_v29 = vld [vmem:[%s4341_s0 + $0x78] sm:$0xff]   ;;  %v3390_v42 = vld [vmem:[%s4317_s4] sm:$0xff]   ;;  %v606_v57 = vand.u32 7, %v2678_v52 }
  0x16   : > { %3129 = vmatprep.subr.bf16.mxu1 %v3367_v13  ;;  %v3380_v26 = vld [vmem:[%s4341_s0 + $0x30] sm:$0xff]   ;;  %s585_s22 = scalar_lea.vmem %s4342_s21, %s3721_s2  ;;  %s590_s23 = scalar_lea.vmem %s4343_s15, %s3721_s2  ;;  %v3384_v31 = vld [vmem:[%s4341_s0 + $0x38] sm:$0xff]   ;;  %v3391_v44 = vld [vmem:[%s4317_s4 + $0x100] sm:$0xff]  }
  0x17   : > { %3104 = vmatpush3.bf16.msra.mxu0 %v3360_v6  ;;  %v3747_v35 = vld [vmem:[%s585_s22] sm:$0xff]  ;;  %v3392_v45 = vld [vmem:[%s4317_s4 + $0x48] sm:$0xff]   ;;  %v3396_v50 = vld [vmem:[%s4317_s4 + $0x50] sm:$0xff]   ;;  %v607_v62 = vsub.s32 0, %v606_v57  ;;  %s4040_s21 = scalar_lea.vmem %s4331_s18, %s3721_s2 }
  0x18   : > { %3105 = vmatprep.subr.bf16.mxu0 %v3362_v8  ;;  %v3749_v36 = vld [vmem:[%s590_s23] sm:$0xff]  ;;  %v3753_v37 = vcombine.high %v3747_v35, %v3747_v35  ;;  %v3757_v38 = vcombine.low %v3747_v35, %v3747_v35  ;;  %v3393_v46 = vld [vmem:[%s4317_s4 + $0x148] sm:$0xff]   ;;  %v3397_v51 = vld [vmem:[%s4317_s4 + $0x150] sm:$0xff]   ;;  %v3955_v47 = vunpack.c.h.bf16 %v3747_v35 }
  0x19   : > { %3130 = vmatpush3.bf16.msra.mxu1 %v3369_v15  ;;  %v3772_v43 = vcombine.high %v3749_v36, %v3749_v36  ;;  %v3394_v48 = vld [vmem:[%s4317_s4 + $0x8] sm:$0xff]   ;;  %v3398_v53 = vld [vmem:[%s4317_s4 + $0x10] sm:$0xff]   ;;  %v3400_v55 = vld [vmem:[%s4317_s4 + $0x58] sm:$0xff]   ;;  %v608_v3 = vsel %vm602_vm0, %v607_v62, %v606_v57  ;;  %v621_v4 = vunpack.c.h.bf16 %v3749_v36  ;;  %v620_v6 = vunpack.c.l.bf16 %v3749_v36 }
  0x1a   : > { %3131 = vmatprep.subr.bf16.mxu1 %v3371_v17  ;;  %836 = vmatprep.mubr.bf16.mxu0 %v3753_v37  ;;  %v3395_v49 = vld [vmem:[%s4317_s4 + $0x108] sm:$0xff]   ;;  %v3399_v54 = vld [vmem:[%s4317_s4 + $0x110] sm:$0xff]   ;;  %v3401_v56 = vld [vmem:[%s4317_s4 + $0x158] sm:$0xff]   ;;  %vm609_vm2 = vcmp.ne.s32.totalorder %v608_v3, 0  ;;  %vm610_vm3 = vcmp.lt.s32.totalorder %v608_v3, 0  ;;  %v612_v15 = vadd.s32 8, %v608_v3 }
  0x1b   : > { %3106 = vmatpush3.bf16.msra.mxu0 %v3364_v10  ;;  %1041 = vmatprep.mubr.bf16.mxu1 %v3753_v37  ;;  %v3402_v58 = vld [vmem:[%s4317_s4 + $0x18] sm:$0xff]   ;;  %v3404_v60 = vld [vmem:[%s4317_s4 + $0x60] sm:$0xff]   ;;  %v3408_v1 = vld [vmem:[%s4317_s4 + $0x68] sm:$0xff]   ;;  %v625_v10 = vrot.slane %v621_v4, 7  ;;  %v634_v52 = vrot.slane %v3955_v47, 7 }
  0x1c   : > { %3107 = vmatprep.subr.bf16.mxu0 %v3366_v12  ;;  %v3403_v59 = vld [vmem:[%s4317_s4 + $0x118] sm:$0xff]   ;;  %v3405_v61 = vld [vmem:[%s4317_s4 + $0x160] sm:$0xff]   ;;  %v3409_v2 = vld [vmem:[%s4317_s4 + $0x168] sm:$0xff]   ;;  %v624_v12 = vrot.slane %v620_v6, 7 }
  0x1d   : > { %3132 = vmatpush3.bf16.msra.mxu1 %v3373_v19  ;;  %v3406_v63 = vld [vmem:[%s4317_s4 + $0x20] sm:$0xff]   ;;  %v3410_v5 = vld [vmem:[%s4317_s4 + $0x28] sm:$0xff]   ;;  %v3412_v8 = vld [vmem:[%s4317_s4 + $0x70] sm:$0xff]   ;;  %v3865_v17 = vsel %vm628_vm1, 0.0, %v625_v10 }
  0x1e   : > { %3133 = vmatprep.subr.bf16.mxu1 %v3375_v21  ;;  %v3407_v0 = vld [vmem:[%s4317_s4 + $0x120] sm:$0xff]   ;;  %v3411_v7 = vld [vmem:[%s4317_s4 + $0x128] sm:$0xff]   ;;  %v3413_v9 = vld [vmem:[%s4317_s4 + $0x170] sm:$0xff]   ;;  %v3871_v19 = vsel %vm628_vm1, 0.0, %v624_v12 }
  0x1f   : > { %3108 = vmatpush3.bf16.msra.mxu0 %v3368_v14  ;;  %v3414_v11 = vld [vmem:[%s4317_s4 + $0x30] sm:$0xff]   ;;  %v3416_v14 = vld [vmem:[%s4317_s4 + $0x78] sm:$0xff]   ;;  %vm611_vm4 = vmand %vm610_vm3, %vm609_vm2 }
  0x20   : > { %3109 = vmatprep.subr.bf16.mxu0 %v3370_v16  ;;  %v3415_v13 = vld [vmem:[%s4317_s4 + $0x130] sm:$0xff]   ;;  %v3417_v16 = vld [vmem:[%s4317_s4 + $0x178] sm:$0xff]   ;;  %v3877_v21 = vsel %vm611_vm4, %v612_v15, %v608_v3  ;;  %v3429_v32 = vld [vmem:[%s4323_s10 + $0x48] sm:$0xff]  }
  0x21   : > { %3134 = vmatpush3.bf16.msra.mxu1 %v3377_v23  ;;  %v3885_v23 = vcombine.low %v3749_v36, %v3749_v36  ;;  %vm614_vm5 = vcmp.eq.s32.totalorder %v3877_v21, 0  ;;  %v3433_v34 = vld [vmem:[%s4323_s10 + $0x50] sm:$0xff]   ;;  %v3439_v41 = vld [vmem:[%s4323_s10 + $0x18] sm:$0xff]   ;;  %v3478_v3 = vld [vmem:[%s4323_s10 + $0x1e8] sm:$0xff]   ;;  %vm3100_vm12 = vcmp.ne.s32.totalorder %v3877_v21, 7 }
  0x22   : > { %3135 = vmatprep.subr.bf16.mxu1 %v3379_v25  ;;  %vm2762_vm6 = vmneg %vm614_vm5  ;;  %v3466_v62 = vld [vmem:[%s4323_s10 + $0x1d0] sm:$0xff]   ;;  %v3487_v10 = vld [vmem:[%s4323_s10 + $0x1b8] sm:$0xff]  }
  0x23   : > { %3110 = vmatpush3.bf16.msra.mxu0 %v3372_v18  ;;  %v3418_v18 = vld [vmem:[%s4317_s4 + $0x38] sm:$0xff]   ;;  %vm3894_vm7 = vmpackc.low %vm2762_vm6, %vm2762_vm6  ;;  %v3472_v25 = vld [vmem:[%s4323_s10 + $0x160] sm:$0xff]  }
  0x24   : > { %3111 = vmatprep.subr.bf16.mxu0 %v3374_v20  ;;  %v3419_v20 = vld [vmem:[%s4317_s4 + $0x138] sm:$0xff]   ;;  %vm4160_vm13 = vmpackc.low %vm3100_vm12, %vm3100_vm12  ;;  %v3073_v36 = vld [vmem:[%s4348_s24] ss:$0 sm:$0xff] }
  0x25   : > { %3136 = vmatpush3.bf16.msra.mxu1 %v3381_v28  ;;  %v3423_v28 = vld [vmem:[%s4319_s6 + $0x8] sm:$0xff]   ;;  %v3520_v21 = vld [vmem:[%s4329_s16 + $0x78] sm:$0xff]  }
  0x26   : > { %3137 = vmatprep.subr.bf16.mxu1 %v3383_v30  ;;  %v3425_v30 = vld [vmem:[%s4323_s10 + $0x40] sm:$0xff]  }
  0x27   : > { %3112 = vmatpush3.bf16.msra.mxu0 %v3376_v22  ;;  %v3881_v22 = vpack.c.bf16 %v3865_v17, %v3865_v17 }
  0x28   : > { %3113 = vmatprep.subr.bf16.mxu0 %v3378_v24  ;;  %v3890_v24 = vpack.c.bf16 %v3871_v19, %v3871_v19 }
  0x29   : > { %3138 = vmatpush3.bf16.msra.mxu1 %v3385_v33  ;;  %v3431_v33 = vld [vmem:[%s4323_s10 + $0x8] sm:$0xff]  }
  0x2a   : > { %3167 = vmatprep.subr.bf16.mxu1 %v3389_v40  ;;  %v3437_v40 = vld [vmem:[%s4323_s10 + $0x58] sm:$0xff]  }
  0x2b   : > { %3114 = vmatpush3.bf16.msra.mxu0 %v3380_v26  ;;  %v3422_v26 = vld [vmem:[%s4319_s6] sm:$0xff]  }
  0x2c   : > { %3115 = vmatprep.subr.bf16.mxu0 %v3382_v29  ;;  %1042 = vmatmul.mubr.bf16.vlgmr.msra.gmra.mrb[0].mxu1 %v3757_v38  ;;  %v3424_v29 = vld [vmem:[%s4323_s10 + $0xc0] sm:$0xff]  }
  0x2d   : > { %3168 = vmatpush3.bf16.msra.mxu1 %v3391_v44  ;;  %1353 = vmatprep.mubr.bf16.mxu1 %v3772_v43  ;;  %v3443_v44 = vld [vmem:[%s4323_s10 + $0x20] sm:$0xff]  }
  0x2e   : > { %3169 = vmatprep.subr.bf16.mxu1 %v3393_v46  ;;  %v3447_v46 = vld [vmem:[%s4323_s10 + $0x28] sm:$0xff]  }
  0x2f   : > { %3116 = vmatpush3.bf16.msra.mxu0 %v3384_v31  ;;  %v3427_v31 = vld [vmem:[%s4323_s10] sm:$0xff]  }
  0x30   : > { %3145 = vmatprep.subr.bf16.mxu0 %v3388_v39  ;;  %v3435_v39 = vld [vmem:[%s4323_s10 + $0x10] sm:$0xff]  }
  0x31   : > { %3170 = vmatpush3.bf16.msra.mxu1 %v3395_v49  ;;  %v3961_v49 = vunpack.c.l.bf16 %v3747_v35  ;;  %v638_v35 = vsel %vm628_vm1, 0.0, %v634_v52 }
  0x32   : > { %837 = vmatmul.mubr.bf16.vlgmr.msra.gmra.mrb[0].mxu0 %v3757_v38  ;;  %3171 = vmatprep.subr.bf16.mxu1 %v3397_v51  ;;  %v3453_v51 = vld [vmem:[%s4323_s10 + $0x78] sm:$0xff]  }
  0x33   : > { %3146 = vmatpush3.bf16.msra.mxu0 %v3390_v42  ;;  %2766 = vmatprep.mubr.msk.bf16.mxu0 %vm3894_vm7, %v3881_v22  ;;  %v3441_v42 = vld [vmem:[%s4323_s10 + $0x60] sm:$0xff]  }
  0x34   : > { %3147 = vmatprep.subr.bf16.mxu0 %v3392_v45  ;;  %v3445_v45 = vld [vmem:[%s4323_s10 + $0x68] sm:$0xff]  }
  0x35   : > { %3172 = vmatpush3.bf16.msra.mxu1 %v3399_v54  ;;  %v633_v54 = vrot.slane %v3961_v49, 7 }
  0x36   : > { %3173 = vmatprep.subr.bf16.mxu1 %v3401_v56 }
  0x37   : > { %3148 = vmatpush3.bf16.msra.mxu0 %v3394_v48  ;;  %v3449_v48 = vld [vmem:[%s4323_s10 + $0x70] sm:$0xff]   ;;  %v637_v56 = vsel %vm628_vm1, 0.0, %v633_v54  ;;  %v3426_v54 = vld [vmem:[%s4323_s10 + $0x80] sm:$0xff]  }
  0x38   : > { %3149 = vmatprep.subr.bf16.mxu0 %v3396_v50  ;;  %v3451_v50 = vld [vmem:[%s4323_s10 + $0x30] sm:$0xff]   ;;  %v2912_v57 = vpack.c.bf16 %v637_v56, %v637_v56  ;;  %v3430_v56 = vld [vmem:[%s4323_s10 + $0x88] sm:$0xff]  }
  0x39   : > { %3174 = vmatpush3.bf16.msra.mxu1 %v3403_v59  ;;  %v3459_v59 = vld [vmem:[%s4323_s10 + $0x180] sm:$0xff]  }
  0x3a   : > { %3175 = vmatprep.subr.bf16.mxu1 %v3405_v61  ;;  %v3463_v61 = vld [vmem:[%s4323_s10 + $0x188] sm:$0xff]  }
  0x3b   : > { %3150 = vmatpush3.bf16.msra.mxu0 %v3398_v53  ;;  %v3455_v53 = vld [vmem:[%s4323_s10 + $0x38] sm:$0xff]  }
  0x3c   : > { %3151 = vmatprep.subr.bf16.mxu0 %v3400_v55  ;;  %v2907_v55 = vpack.c.bf16 %v638_v35, %v638_v35 }
  0x3d   : > { %3176 = vmatpush3.bf16.msra.mxu1 %v3407_v0  ;;  %v3471_v0 = vld [vmem:[%s4323_s10 + $0x198] sm:$0xff]  }
  0x3e   : > { %3177 = vmatprep.subr.bf16.mxu1 %v3409_v2  ;;  %v3475_v2 = vld [vmem:[%s4323_s10 + $0x1a0] sm:$0xff]  }
  0x3f   : > { %3152 = vmatpush3.bf16.msra.mxu0 %v3402_v58  ;;  %v3458_v58 = vld [vmem:[%s4323_s10 + $0x1c0] sm:$0xff]  }
  0x40   : > { %3153 = vmatprep.subr.bf16.mxu0 %v3404_v60  ;;  %v3462_v60 = vld [vmem:[%s4323_s10 + $0x1c8] sm:$0xff]  }
  0x41   : > { %3178 = vmatpush3.bf16.msra.mxu1 %v3411_v7  ;;  %v3482_v7 = vld [vmem:[%s4323_s10 + $0x1f0] sm:$0xff]  }
  0x42   : > { %3179 = vmatprep.subr.bf16.mxu1 %v3413_v9  ;;  %v3486_v9 = vld [vmem:[%s4323_s10 + $0x1f8] sm:$0xff]  }
  0x43   : > { %3154 = vmatpush3.bf16.msra.mxu0 %v3406_v63  ;;  %v3470_v63 = vld [vmem:[%s4323_s10 + $0x1d8] sm:$0xff]  }
  0x44   : > { %3155 = vmatprep.subr.bf16.mxu0 %v3408_v1  ;;  %v3474_v1 = vld [vmem:[%s4323_s10 + $0x1e0] sm:$0xff]  }
  0x45   : > { %3180 = vmatpush3.bf16.msra.mxu1 %v3415_v13  ;;  %v2679_v13 = vld [vmem:[%s4316_s3] ss:$0 sm:$0xff] }
  0x46   : > { %3181 = vmatprep.subr.bf16.mxu1 %v3417_v16 }
  0x47   : > { %3156 = vmatpush3.bf16.msra.mxu0 %v3410_v5  ;;  %v3479_v5 = vld [vmem:[%s4323_s10 + $0x1a8] sm:$0xff]  }
  0x48   : > { %3157 = vmatprep.subr.bf16.mxu0 %v3412_v8  ;;  %v3483_v8 = vld [vmem:[%s4323_s10 + $0x1b0] sm:$0xff]  }
  0x49   : > { %3182 = vmatpush3.bf16.msra.mxu1 %v3419_v20 }
  0x4a   : > { %3327 = vmatprep.subr.bf16.mxu1 %v3530_v27 }
  0x4b   : > { %3158 = vmatpush3.bf16.msra.mxu0 %v3414_v11 }
  0x4c   : > { %3159 = vmatprep.subr.bf16.mxu0 %v3416_v14  ;;  %1354 = vmatmul.mubr.bf16.vlgmr.msra.gmra.mrb[4].mxu1 %v3885_v23 }
  0x4d   : > { %3328 = vmatpush3.bf16.msra.mxu1 %v3422_v26  ;;  %3331 = vmatprep.mubr.msk.bf16.mxu1 %vm3531_vm8, %v3530_v27 }
  0x4e   : > { %3329 = vmatprep.subr.bf16.mxu1 %v3530_v27 }
  0x4f   : > { %3160 = vmatpush3.bf16.msra.mxu0 %v3418_v18 }
  0x50   : > { %3214 = vmatprep.subr.bf16.mxu0 %v3425_v30 }
  0x51   : > { %3330 = vmatpush3.bf16.msra.mxu1 %v3423_v28 }
  0x52   : > { %2771 = vmatmul.mubr.msk.bf16.vlgmr.msra.gmra.mrb[4].mxu0 %vm3894_vm7, %v3890_v24  ;;  %3192 = vmatprep.subr.bf16.mxu1 %v3424_v29 }
  0x53   : > { %3215 = vmatpush3.bf16.msra.mxu0 %v3427_v31  ;;  %2908 = vmatprep.mubr.msk.bf16.mxu0 %vm3894_vm7, %v2907_v55  ;;  %v3428_v55 = vld [vmem:[%s4323_s10 + $0xc8] sm:$0xff]  }
  0x54   : > { %3216 = vmatprep.subr.bf16.mxu0 %v3429_v32 }
  0x57   : > { %3217 = vmatpush3.bf16.msra.mxu0 %v3431_v33 }
  0x58   : > { %3218 = vmatprep.subr.bf16.mxu0 %v3433_v34 }
  0x5b   : > { %3219 = vmatpush3.bf16.msra.mxu0 %v3435_v39 }
  0x5c   : > { %3220 = vmatprep.subr.bf16.mxu0 %v3437_v40 }
  0x5f   : > { %3221 = vmatpush3.bf16.msra.mxu0 %v3439_v41 }
  0x60   : > { %3222 = vmatprep.subr.bf16.mxu0 %v3441_v42 }
  0x63   : > { %3223 = vmatpush3.bf16.msra.mxu0 %v3443_v44 }
  0x64   : > { %3224 = vmatprep.subr.bf16.mxu0 %v3445_v45 }
  0x67   : > { %3225 = vmatpush3.bf16.msra.mxu0 %v3447_v46 }
  0x68   : > { %3226 = vmatprep.subr.bf16.mxu0 %v3449_v48 }
  0x6b   : > { %3227 = vmatpush3.bf16.msra.mxu0 %v3451_v50  ;;  %v2822_v50 = vld [vmem:[%s4318_s5] ss:$0 sm:$0xff] }
  0x6c   : > { %3228 = vmatprep.subr.bf16.mxu0 %v3453_v51 }
  0x6f   : > { %3229 = vmatpush3.bf16.msra.mxu0 %v3455_v53 }
  0x70   : > { %3258 = vmatprep.subr.bf16.mxu0 %v3458_v58  ;;  %v3434_v58 = vld [vmem:[%s4323_s10 + $0x90] sm:$0xff]  }
  0x72   : > { %2913 = vmatmul.mubr.msk.bf16.vlgmr.msra.gmra.mrb[8].mxu0 %vm3894_vm7, %v2912_v57  ;;  %v3432_v57 = vld [vmem:[%s4323_s10 + $0xd0] sm:$0xff]  }
  0x73   : > { %2133 = vmatprep.mubr.bf16.mxu0 %v3772_v43  ;;  %3259 = vmatpush3.bf16.msra.mxu0 %v3459_v59  ;;  %v3467_v43 = vld [vmem:[%s4323_s10 + $0x190] sm:$0xff]   ;;  %v3436_v59 = vld [vmem:[%s4323_s10 + $0xd8] sm:$0xff]  }
  0x74   : > { %3260 = vmatprep.subr.bf16.mxu0 %v3462_v60  ;;  %v3440_v60 = vld [vmem:[%s4323_s10 + $0xe0] sm:$0xff]  }
  0x77   : > { %3261 = vmatpush3.bf16.msra.mxu0 %v3463_v61  ;;  %v3442_v61 = vld [vmem:[%s4323_s10 + $0xa0] sm:$0xff]  }
  0x78   : > { %3262 = vmatprep.subr.bf16.mxu0 %v3466_v62  ;;  %v3444_v62 = vld [vmem:[%s4323_s10 + $0xe8] sm:$0xff]  }
  0x7b   : > { %3263 = vmatpush3.bf16.msra.mxu0 %v3467_v43  ;;  %v3446_v43 = vld [vmem:[%s4323_s10 + $0xa8] sm:$0xff]  }
  0x7c   : > { %3264 = vmatprep.subr.bf16.mxu0 %v3470_v63  ;;  %v3448_v63 = vld [vmem:[%s4323_s10 + $0xf0] sm:$0xff]  }
  0x7f   : > { %3265 = vmatpush3.bf16.msra.mxu0 %v3471_v0  ;;  %v3450_v0 = vld [vmem:[%s4323_s10 + $0xb0] sm:$0xff]  }
  0x80   : > { %3266 = vmatprep.subr.bf16.mxu0 %v3474_v1  ;;  %v3452_v1 = vld [vmem:[%s4323_s10 + $0xf8] sm:$0xff]  }
  0x83   : > { %3267 = vmatpush3.bf16.msra.mxu0 %v3475_v2  ;;  %v3454_v2 = vld [vmem:[%s4323_s10 + $0xb8] sm:$0xff]  }
  0x84   : > { %3268 = vmatprep.subr.bf16.mxu0 %v3478_v3  ;;  %v3456_v3 = vld [vmem:[%s4323_s10 + $0x140] sm:$0xff]  }
  0x87   : > { %3269 = vmatpush3.bf16.msra.mxu0 %v3479_v5  ;;  %v3457_v5 = vld [vmem:[%s4323_s10 + $0x100] sm:$0xff]  }
  0x88   : > { %3270 = vmatprep.subr.bf16.mxu0 %v3482_v7  ;;  %v3460_v7 = vld [vmem:[%s4323_s10 + $0x148] sm:$0xff]  }
  0x8b   : > { %3271 = vmatpush3.bf16.msra.mxu0 %v3483_v8  ;;  %v3461_v8 = vld [vmem:[%s4323_s10 + $0x108] sm:$0xff]  }
  0x8c   : > { %3272 = vmatprep.subr.bf16.mxu0 %v3486_v9  ;;  %v3464_v9 = vld [vmem:[%s4323_s10 + $0x150] sm:$0xff]  }
  0x8f   : > { %3273 = vmatpush3.bf16.msra.mxu0 %v3487_v10  ;;  %v3465_v10 = vld [vmem:[%s4323_s10 + $0x110] sm:$0xff]  }
  0x90   : > { %3335 = vmatprep.subr.bf16.mxu0 %v3530_v27 }
  0x92   : > { %2134 = vmatmul.mubr.bf16.vlgmr.msra.gmra.mrb[12].mxu0 %v3885_v23 }
  0x93   : > { %3339 = vmatprep.mubr.msk.bf16.mxu0 %vm3531_vm8, %v3530_v27 }
  0xff   : > { %v3139_v12 = vpop.f32.mrb[0].mxu1 }
 0x100   : > { %v3140_v15 = vpop.f32.mrb[1].mxu1 }
 0x101   : > { %v3141_v18 = vadd.f32 %v3140_v15, %v3139_v12  ;;  %v3142_v26 = vpop.f32.mrb[2].mxu1  ;;  %v3476_v12 = vld [vmem:[%s4323_s10 + $0x168] sm:$0xff]   ;;  %v3481_v15 = vld [vmem:[%s4323_s10 + $0x130] sm:$0xff]  }
 0x102   : > { %v3143_v29 = vpop.f32.mrb[3].mxu1  ;;  %v3488_v26 = vld [vmem:[%s4323_s10 + $0x240] sm:$0xff]  }
 0x103   : > { %v3489_v29 = vld [vmem:[%s4323_s10 + $0x200] sm:$0xff]  }
 0x105   : > { %v3117_v11 = vpop.f32.mrb[0].mxu0 }
 0x106   : > { %v3118_v14 = vpop.f32.mrb[1].mxu0 }
 0x107   : > { %v3119_v16 = vadd.f32 %v3118_v14, %v3117_v11  ;;  %v3120_v20 = vpop.f32.mrb[2].mxu0  ;;  %v3473_v11 = vld [vmem:[%s4323_s10 + $0x120] sm:$0xff]   ;;  %v3480_v14 = vld [vmem:[%s4323_s10 + $0x170] sm:$0xff]  }
 0x108   : > { %v3121_v28 = vpop.f32.mrb[3].mxu0  ;;  %v3485_v20 = vld [vmem:[%s4323_s10 + $0x138] sm:$0xff]  }
 0x109   : > { %v839_v30 = vadd.f32 %v3119_v16, %v2679_v13  ;;  %v3477_v13 = vld [vmem:[%s4323_s10 + $0x128] sm:$0xff]   ;;  %v3484_v16 = vld [vmem:[%s4323_s10 + $0x178] sm:$0xff]  }
 0x10b   : > { %v844_v31 = vmax.f32 %v839_v30, 0.0 }
 0x10d   : > { %v845_v23 = vpack.c.bf16 %v844_v31, %v844_v31  ;;  %v3490_v31 = vld [vmem:[%s4323_s10 + $0x248] sm:$0xff]  }
 0x10f   : > { %847 = vst.msk [vmem:[%s4040_s21] sm:$0xf] %vm846_vm9, %v845_v23 }
 0x11f   : > { %v3183_v32 = vpop.f32.mrb[4].mxu1 }
 0x120   : > { %v3184_v34 = vpop.f32.mrb[5].mxu1 }
 0x121   : > { %v3185_v40 = vadd.f32 %v3184_v34, %v3183_v32  ;;  %v3186_v41 = vpop.f32.mrb[6].mxu1  ;;  %v3491_v32 = vld [vmem:[%s4323_s10 + $0x208] sm:$0xff]   ;;  %v3493_v34 = vld [vmem:[%s4323_s10 + $0x210] sm:$0xff]  }
 0x122   : > { %v3187_v45 = vpop.f32.mrb[7].mxu1  ;;  %v3497_v41 = vld [vmem:[%s4323_s10 + $0x220] sm:$0xff]  }
 0x123   : > { %v3500_v45 = vld [vmem:[%s4323_s10 + $0x270] sm:$0xff]  }
 0x125   : > { %v3161_v33 = vpop.f32.mrb[4].mxu0 }
 0x126   : > { %v3162_v39 = vpop.f32.mrb[5].mxu0 }
 0x127   : > { %v3163_v42 = vadd.f32 %v3162_v39, %v3161_v33  ;;  %v3164_v44 = vpop.f32.mrb[6].mxu0  ;;  %v3492_v33 = vld [vmem:[%s4323_s10 + $0x250] sm:$0xff]   ;;  %v3495_v39 = vld [vmem:[%s4323_s10 + $0x218] sm:$0xff]  }
 0x128   : > { %v3165_v46 = vpop.f32.mrb[7].mxu0  ;;  %v3499_v44 = vld [vmem:[%s4323_s10 + $0x228] sm:$0xff]  }
 0x129   : > { %v1180_v48 = vadd.f32 %v3163_v42, %v3141_v18  ;;  %v640_v18 = vrot.slane %v3955_v47, 1  ;;  %v3498_v42 = vld [vmem:[%s4323_s10 + $0x268] sm:$0xff]   ;;  %v3501_v46 = vld [vmem:[%s4323_s10 + $0x230] sm:$0xff]  }
 0x12b   : > { %v1361_v51 = vadd.f32 %v3185_v40, %v1180_v48  ;;  %v645_v28 = vsel %vm643_vm11, %v640_v18, 0.0  ;;  %v3496_v40 = vld [vmem:[%s4323_s10 + $0x260] sm:$0xff]   ;;  %v639_v48 = vrot.slane %v3961_v49, 1 }
 0x12c   : > { %v3061_v30 = vpack.c.bf16 %v645_v28, %v645_v28 }
 0x12d   : > { %v1369_v52 = vadd.f32 %v2822_v50, %v1361_v51  ;;  %v3502_v50 = vld [vmem:[%s4323_s10 + $0x278] sm:$0xff]  }
 0x12e   : > { %v3503_v51 = vld [vmem:[%s4323_s10 + $0x238] sm:$0xff]  }
 0x12f   : > { %v1370_v53 = vmax.f32 %v1369_v52, 0.0  ;;  %v644_v52 = vsel %vm643_vm11, %v639_v48, 0.0 }
 0x131   : > { %v1371_v35 = vpack.c.bf16 %v1370_v53, %v1370_v53  ;;  %v3066_v53 = vpack.c.bf16 %v644_v52, %v644_v52  ;;  %v3512_v52 = vld [vmem:[%s4329_s16 + $0x58] sm:$0xff]  }
 0x133   : > { %3332 = vmatmul.mubr.msk.bf16.vlgmr.msra.gmra.mrb[8].mxu1 %vm1395_vm10, %v1371_v35 }
 0x134   : > { %3193 = vmatpush3.bf16.msra.mxu1 %v3426_v54  ;;  %2882 = vmatprep.mubr.msk.bf16.mxu1 %vm3894_vm7, %v3881_v22  ;;  %v3438_v22 = vld [vmem:[%s4323_s10 + $0x98] sm:$0xff]  }
 0x135   : > { %3194 = vmatprep.subr.bf16.mxu1 %v3428_v55 }
 0x138   : > { %3195 = vmatpush3.bf16.msra.mxu1 %v3430_v56 }
 0x139   : > { %3196 = vmatprep.subr.bf16.mxu1 %v3432_v57 }
 0x13c   : > { %3197 = vmatpush3.bf16.msra.mxu1 %v3434_v58 }
 0x13d   : > { %3198 = vmatprep.subr.bf16.mxu1 %v3436_v59 }
 0x140   : > { %3199 = vmatpush3.bf16.msra.mxu1 %v3438_v22 }
 0x141   : > { %3200 = vmatprep.subr.bf16.mxu1 %v3440_v60 }
 0x144   : > { %3201 = vmatpush3.bf16.msra.mxu1 %v3442_v61 }
 0x145   : > { %3202 = vmatprep.subr.bf16.mxu1 %v3444_v62  ;;  %v3230_v54 = vpop.f32.mrb[8].mxu0  ;;  %v3504_v62 = vld [vmem:[%s4325_s12] sm:$0xff]  }
 0x146   : > { %v3231_v35 = vpop.f32.mrb[9].mxu0  ;;  %3336 = vmatpush3.bf16.msra.mxu0 %v3504_v62  ;;  %v3069_v62 = vld [vmem:[%s4326_s13] ss:$0 sm:$0xff] }
 0x147   : > { %v3232_v55 = vadd.f32 %v3231_v35, %v3230_v54  ;;  %v3233_v56 = vpop.f32.mrb[10].mxu0  ;;  %3337 = vmatprep.subr.bf16.mxu0 %v3530_v27  ;;  %v2827_v27 = vld [vmem:[%s4321_s8] ss:$0 sm:$0xff] }
 0x148   : > { %3203 = vmatpush3.bf16.msra.mxu1 %v3446_v43  ;;  %v3234_v57 = vpop.f32.mrb[11].mxu0  ;;  %v3505_v43 = vld [vmem:[%s4325_s12 + $0x8] sm:$0xff]   ;;  %v3514_v54 = vld [vmem:[%s4329_s16 + $0x60] sm:$0xff]  }
 0x149   : > { %3204 = vmatprep.subr.bf16.mxu1 %v3448_v63  ;;  %v3506_v63 = vld [vmem:[%s4329_s16 + $0x40] sm:$0xff]   ;;  %v3517_v57 = vld [vmem:[%s4329_s16 + $0x28] sm:$0xff]  }
 0x14a   : > { %3338 = vmatpush3.bf16.msra.mxu0 %v3505_v43  ;;  %v3515_v35 = vld [vmem:[%s4329_s16 + $0x20] sm:$0xff]  }
 0x14b   : > { %3305 = vmatprep.subr.bf16.mxu0 %v3506_v63 }
 0x14c   : > { %3205 = vmatpush3.bf16.msra.mxu1 %v3450_v0  ;;  %v2823_v0 = vld [vmem:[%s4320_s7] ss:$0 sm:$0xff] }
 0x14d   : > { %3206 = vmatprep.subr.bf16.mxu1 %v3452_v1 }
 0x150   : > { %3207 = vmatpush3.bf16.msra.mxu1 %v3454_v2 }
 0x151   : > { %3236 = vmatprep.subr.bf16.mxu1 %v3456_v3 }
 0x153   : > { %2887 = vmatmul.mubr.msk.bf16.vlgmr.msra.gmra.mrb[12].mxu1 %vm3894_vm7, %v3890_v24  ;;  %v3468_v24 = vld [vmem:[%s4323_s10 + $0x158] sm:$0xff]  }
 0x154   : > { %3237 = vmatpush3.bf16.msra.mxu1 %v3457_v5  ;;  %1963 = vmatprep.mubr.bf16.mxu1 %v3753_v37  ;;  %v3469_v37 = vld [vmem:[%s4323_s10 + $0x118] sm:$0xff]  }
 0x155   : > { %3238 = vmatprep.subr.bf16.mxu1 %v3460_v7 }
 0x158   : > { %3239 = vmatpush3.bf16.msra.mxu1 %v3461_v8 }
 0x159   : > { %3240 = vmatprep.subr.bf16.mxu1 %v3464_v9  ;;  %v2828_v9 = vld [vmem:[%s4322_s9] ss:$0 sm:$0xff] }
 0x15c   : > { %3241 = vmatpush3.bf16.msra.mxu1 %v3465_v10 }
 0x15d   : > { %3242 = vmatprep.subr.bf16.mxu1 %v3468_v24 }
 0x160   : > { %3243 = vmatpush3.bf16.msra.mxu1 %v3469_v37 }
 0x161   : > { %3244 = vmatprep.subr.bf16.mxu1 %v3472_v25 }
 0x164   : > { %3245 = vmatpush3.bf16.msra.mxu1 %v3473_v11 }
 0x165   : > { %3246 = vmatprep.subr.bf16.mxu1 %v3476_v12  ;;  %v3274_v58 = vpop.f32.mrb[12].mxu0 }
 0x166   : > { %v3275_v59 = vpop.f32.mrb[13].mxu0 }
 0x167   : > { %v3276_v22 = vadd.f32 %v3275_v59, %v3274_v58  ;;  %v3277_v60 = vpop.f32.mrb[14].mxu0  ;;  %v2407_v58 = vsel %vm614_vm5, -inf, %v3871_v19  ;;  %v3518_v59 = vld [vmem:[%s4329_s16 + $0x70] sm:$0xff]  }
 0x168   : > { %3247 = vmatpush3.bf16.msra.mxu1 %v3477_v13  ;;  %v3278_v61 = vpop.f32.mrb[15].mxu0  ;;  %v3519_v60 = vld [vmem:[%s4329_s16 + $0x30] sm:$0xff]  }
 0x169   : > { %3248 = vmatprep.subr.bf16.mxu1 %v3480_v14  ;;  %v3521_v61 = vld [vmem:[%s4329_s16 + $0x38] sm:$0xff]  }
 0x16c   : > { %3249 = vmatpush3.bf16.msra.mxu1 %v3481_v15 }
 0x16d   : > { %3250 = vmatprep.subr.bf16.mxu1 %v3484_v16 }
 0x170   : > { %3251 = vmatpush3.bf16.msra.mxu1 %v3485_v20 }
 0x171   : > { %3280 = vmatprep.subr.bf16.mxu1 %v3488_v26 }
 0x173   : > { %1964 = vmatmul.mubr.bf16.vlgmr.msra.gmra.mrb[16].mxu1 %v3757_v38  ;;  %v3494_v38 = vld [vmem:[%s4323_s10 + $0x258] sm:$0xff]  }
 0x174   : > { %3281 = vmatpush3.bf16.msra.mxu1 %v3489_v29  ;;  %3062 = vmatprep.mubr.msk.bf16.mxu1 %vm4160_vm13, %v3061_v30 }
 0x175   : > { %3282 = vmatprep.subr.bf16.mxu1 %v3490_v31  ;;  %v2408_v31 = vsel %vm614_vm5, -inf, %v3865_v17  ;;  %v3507_v17 = vld [vmem:[%s4329_s16] sm:$0xff]  }
 0x178   : > { %3283 = vmatpush3.bf16.msra.mxu1 %v3491_v32 }
 0x179   : > { %3284 = vmatprep.subr.bf16.mxu1 %v3492_v33  ;;  %v2410_v33 = vmax.f32 %v2408_v31, %v3955_v47  ;;  %v3508_v47 = vld [vmem:[%s4329_s16 + $0x48] sm:$0xff]  }
 0x17c   : > { %3285 = vmatpush3.bf16.msra.mxu1 %v3493_v34 }
 0x17d   : > { %3286 = vmatprep.subr.bf16.mxu1 %v3494_v38 }
 0x180   : > { %3287 = vmatpush3.bf16.msra.mxu1 %v3495_v39  ;;  %v3068_v39 = vld [vmem:[%s4324_s11] ss:$0 sm:$0xff] }
 0x181   : > { %3288 = vmatprep.subr.bf16.mxu1 %v3496_v40 }
 0x184   : > { %3289 = vmatpush3.bf16.msra.mxu1 %v3497_v41 }
 0x185   : > { %3290 = vmatprep.subr.bf16.mxu1 %v3498_v42  ;;  %v2412_v42 = vmax.f32 %v2410_v33, %v621_v4  ;;  %v3510_v4 = vld [vmem:[%s4329_s16 + $0x50] sm:$0xff]  }
 0x188   : > { %3291 = vmatpush3.bf16.msra.mxu1 %v3499_v44 }
 0x189   : > { %3292 = vmatprep.subr.bf16.mxu1 %v3500_v45 }
 0x18c   : > { %3293 = vmatpush3.bf16.msra.mxu1 %v3501_v46  ;;  %v2414_v46 = vpack.c.bf16 %v2412_v42, %v2412_v42 }
 0x18d   : > { %3294 = vmatprep.subr.bf16.mxu1 %v3502_v50  ;;  %v3509_v50 = vld [vmem:[%s4329_s16 + $0x8] sm:$0xff]  }
 0x190   : > { %3295 = vmatpush3.bf16.msra.mxu1 %v3503_v51  ;;  %v3511_v51 = vld [vmem:[%s4329_s16 + $0x10] sm:$0xff]  }
 0x193   : > { %3067 = vmatmul.mubr.msk.bf16.vlgmr.msra.gmra.mrb[20].mxu1 %vm4160_vm13, %v3066_v53  ;;  %v3513_v53 = vld [vmem:[%s4329_s16 + $0x18] sm:$0xff]  }
 0x206   : > { %v1433_v1 = vpop.f32.mrb[8].mxu1 }
 0x207   : > { %v1434_v2 = vadd.f32 %v2823_v0, %v1433_v1  ;;  %v3333_v3 = vpop.f32.mrb[9].mxu1 }
 0x208   : > { %v1436_v5 = vpop.f32.mrb[10].mxu1  ;;  %v3074_v3 = vld [vmem:[%s4349_s14] ss:$0 sm:$0xff] }
 0x209   : > { %v1439_v7 = vmax.f32 %v1434_v2, 0.0  ;;  %v3334_v8 = vpop.f32.mrb[11].mxu1 }
 0x20b   : > { %v1447_v10 = vmul.f32 %v2827_v27, %v1439_v7 }
 0x20d   : > { %v1455_v24 = vadd.f32 %v2828_v9, %v1447_v10  ;;  %v3075_v9 = vld [vmem:[%s4350_s27] ss:$0 sm:$0xff] }
 0x20f   : > { %v3098_v37 = vpack.c.bf16 %v1455_v24, %v1455_v24 }
 0x211   : > { %1460 = vrot.lane.b32.xlu0 %v3098_v37, %s3532_s19 }
 0x226   : > { %v3208_v25 = vpop.f32.mrb[12].mxu1 }
 0x227   : > { %v3209_v11 = vpop.f32.mrb[13].mxu1 }
 0x228   : > { %v3210_v12 = vadd.f32 %v3209_v11, %v3208_v25  ;;  %v3211_v13 = vpop.f32.mrb[14].mxu1 }
 0x229   : > { %v3212_v14 = vpop.f32.mrb[15].mxu1 }
 0x22a   : > { %v1797_v15 = vadd.f32 %v3232_v55, %v3210_v12  ;;  %v3516_v55 = vld [vmem:[%s4329_s16 + $0x68] sm:$0xff]  }
 0x246   : > { %v3252_v16 = vpop.f32.mrb[16].mxu1 }
 0x247   : > { %v3253_v18 = vpop.f32.mrb[17].mxu1 }
 0x248   : > { %v3254_v20 = vadd.f32 %v3253_v18, %v3252_v16  ;;  %v3255_v26 = vpop.f32.mrb[18].mxu1 }
 0x249   : > { %v3256_v28 = vpop.f32.mrb[19].mxu1 }
 0x24a   : > { %v1971_v29 = vadd.f32 %v3254_v20, %v1797_v15 }
 0x24c   : > { %v2141_v30 = vadd.f32 %v3276_v22, %v1971_v29  ;;  %v2409_v22 = vmax.f32 %v2407_v58, %v3961_v49 }
 0x24e   : > { %v2411_v19 = vmax.f32 %v2409_v22, %v620_v6 }
 0x250   : > { %v2413_v49 = vpack.c.bf16 %v2411_v19, %v2411_v19 }
 0x266   : > { %v3296_v23 = vpop.f32.mrb[20].mxu1 }
 0x267   : > { %v3297_v32 = vpop.f32.mrb[21].mxu1 }
 0x268   : > { %v3298_v34 = vadd.f32 %v3297_v32, %v3296_v23  ;;  %v3299_v38 = vpop.f32.mrb[22].mxu1 }
 0x269   : > { %v3300_v40 = vpop.f32.mrb[23].mxu1 }
 0x26a   : > { %v2311_v41 = vadd.f32 %v3298_v34, %v2141_v30 }
 0x26c   : > { %v2319_v44 = vadd.f32 %v3068_v39, %v2311_v41 }
 0x26e   : > { %v2320_v45 = vmax.f32 %v2319_v44, 0.0 }
 0x270   : > { %v2321_v48 = vpack.c.bf16 %v2320_v45, %v2320_v45 }
 0x272   : > { %3340 = vmatmul.mubr.msk.bf16.vlgmr.msra.gmra.mrb[16].mxu0 %vm1395_vm10, %v2321_v48 }
 0x273   : > { %3306 = vmatpush3.bf16.msra.mxu0 %v3507_v17  ;;  %2582 = vmatprep.mubr.bf16.mxu0 %v2414_v46 }
 0x274   : > { %3307 = vmatprep.subr.bf16.mxu0 %v3508_v47 }
 0x277   : > { %3308 = vmatpush3.bf16.msra.mxu0 %v3509_v50 }
 0x278   : > { %3309 = vmatprep.subr.bf16.mxu0 %v3510_v4 }
 0x27b   : > { %3310 = vmatpush3.bf16.msra.mxu0 %v3511_v51 }
 0x27c   : > { %3311 = vmatprep.subr.bf16.mxu0 %v3512_v52 }
 0x27f   : > { %3312 = vmatpush3.bf16.msra.mxu0 %v3513_v53 }
 0x280   : > { %3313 = vmatprep.subr.bf16.mxu0 %v3514_v54 }
 0x283   : > { %3314 = vmatpush3.bf16.msra.mxu0 %v3515_v35  ;;  %v1461_v56 = vpop.permute.xlu0 %1460 }
 0x284   : > { %1464 = vst.msk [vmem:[%s4040_s21] sm:$0xf] %vm1463_vm14, %v1461_v56  ;;  %3315 = vmatprep.subr.bf16.mxu0 %v3516_v55 }
 0x287   : > { %3316 = vmatpush3.bf16.msra.mxu0 %v3517_v57 }
 0x288   : > { %3317 = vmatprep.subr.bf16.mxu0 %v3518_v59 }
 0x28b   : > { %3318 = vmatpush3.bf16.msra.mxu0 %v3519_v60 }
 0x28c   : > { %3319 = vmatprep.subr.bf16.mxu0 %v3520_v21 }
 0x28f   : > { %3320 = vmatpush3.bf16.msra.mxu0 %v3521_v61 }
 0x292   : > { %2583 = vmatmul.mubr.bf16.vlgmr.msra.gmra.mrb[20].mxu0 %v2413_v49 }
 0x345   : > { %v2382_v43 = vpop.f32.mrb[16].mxu0 }
 0x346   : > { %v2383_v63 = vadd.f32 %v3069_v62, %v2382_v43  ;;  %v3341_v0 = vpop.f32.mrb[17].mxu0 }
 0x347   : > { %v2385_v6 = vpop.f32.mrb[18].mxu0 }
 0x348   : > { %v2388_v1 = vmax.f32 %v2383_v63, 0.0  ;;  %v3342_v2 = vpop.f32.mrb[19].mxu0 }
 0x34a   : > { %v2396_v27 = vmul.f32 %v3073_v36, %v2388_v1 }
 0x34c   : > { %v2404_v5 = vadd.f32 %v3074_v3, %v2396_v27 }
 0x34e   : > { %v2405_v7 = vpack.c.bf16 %v2404_v5, %v2404_v5 }
 0x350   : > { %2406 = vst.msk [vmem:[%s4040_s21 + $0x4] sm:$0xf] %vm846_vm9, %v2405_v7 }
 0x365   : > { %v3321_v8 = vpop.f32.mrb[20].mxu0 }
 0x366   : > { %v3322_v10 = vpop.f32.mrb[21].mxu0 }
 0x367   : > { %v3323_v24 = vadd.f32 %v3322_v10, %v3321_v8  ;;  %v3324_v37 = vpop.f32.mrb[22].mxu0 }
 0x368   : > { %v3325_v25 = vpop.f32.mrb[23].mxu0 }
 0x369   : > { %v2585_v11 = vadd.f32 %v3323_v24, %v3075_v9 }
 0x36b   : > { %v2590_v12 = vmax.f32 %v2585_v11, 0.0 }
 0x36d   : > { %v3099_v13 = vpack.c.bf16 %v2590_v12, %v2590_v12 }
 0x36f   : > { %2595 = vrot.lane.b32.xlu0 %v3099_v13, %s3532_s19 }
 0x3e1   : > { %v2596_v14 = vpop.permute.xlu0 %2595 }
 0x3e2   : > { %2598 = vst.msk [vmem:[%s4040_s21 + $0x4] sm:$0xf] %vm1463_vm14, %v2596_v14 }
 0x3e3 PF: > { %s4351_s29 = sld [smem:[#allocation2_spill]] }
 0x3e9   : > { %s28_s27 = sadd.s32 1, %s4351_s29  }
 0x3ea   : > { %p25_p4 = scmp.ge.s32.totalorder %s28_s27, 4  }
 0x3ec   :  { %27 = sbr.rel (!%p25_p4) target bundleno = 7 (0x7), region = 131 }

// kernel: imu_network.7
= control target key start
LH: loop header
LB: loop body
LE: loop exit
PB: predicated region body
PF: predicated region fallthrough
CT: control target
= control target key end

     0   :  { %v30_v30 = vlaneseq  ;;  %v545_v37 = vmov 1983009808   ;;  %s689_s0 = inlined_call_operand.vmem [shape: bf16[2,512], index: 0, kind: input, shape index: {}]   ;;  %s690_s1 = inlined_call_operand.vmem [shape: bf16[2,512], index: 1, kind: input, shape index: {}]   ;;  %s691_s2 = inlined_call_operand.vmem [shape: bf16[512,10], index: 2, kind: input, shape index: {}]   ;;  %s692_s3 = inlined_call_operand.vmem [shape: f32[1,10], index: 3, kind: input, shape index: {}]   ;;  %s693_s4 = inlined_call_operand.hbm [shape: f32[2,10], index: 4, kind: output, shape index: {}]  }
   0x1   :  { %v489_v0 = vld [vmem:[%s691_s2 + $0x40] sm:$0xff]   ;;  %v493_v4 = vld [vmem:[%s691_s2 + $0x48] sm:$0xff]   ;;  %v497_v8 = vld [vmem:[%s691_s2 + $0x50] sm:$0xff]   ;;  %v28_v38 = vunpack.c.l.s4 %v545_v37 }
   0x2   :  { %v490_v1 = vld [vmem:[%s691_s2 + $0xc0] sm:$0xff]   ;;  %443 = vmatprep.subr.bf16.mxu0 %v489_v0  ;;  %v494_v5 = vld [vmem:[%s691_s2 + $0xc8] sm:$0xff]   ;;  %v498_v9 = vld [vmem:[%s691_s2 + $0xd0] sm:$0xff]   ;;  %v31_v39 = vshrl.u32 %v30_v30, 7 }
   0x3   :  { %v491_v2 = vld [vmem:[%s691_s2] sm:$0xff]   ;;  %465 = vmatprep.subr.bf16.mxu1 %v490_v1  ;;  %v495_v6 = vld [vmem:[%s691_s2 + $0x8] sm:$0xff]   ;;  %v499_v10 = vld [vmem:[%s691_s2 + $0x10] sm:$0xff]  }
   0x4   :  { %v492_v3 = vld [vmem:[%s691_s2 + $0x80] sm:$0xff]   ;;  %444 = vmatpush3.bf16.msra.mxu0 %v491_v2  ;;  %v496_v7 = vld [vmem:[%s691_s2 + $0x88] sm:$0xff]   ;;  %v500_v11 = vld [vmem:[%s691_s2 + $0x90] sm:$0xff]  }
   0x5   :  { %466 = vmatpush3.bf16.msra.mxu1 %v492_v3  ;;  %445 = vmatprep.subr.bf16.mxu0 %v493_v4  ;;  %v501_v12 = vld [vmem:[%s691_s2 + $0x58] sm:$0xff]   ;;  %v505_v16 = vld [vmem:[%s691_s2 + $0x60] sm:$0xff]   ;;  %v509_v20 = vld [vmem:[%s691_s2 + $0x68] sm:$0xff]  }
   0x6   :  { %467 = vmatprep.subr.bf16.mxu1 %v494_v5  ;;  %v502_v13 = vld [vmem:[%s691_s2 + $0xd8] sm:$0xff]   ;;  %v506_v17 = vld [vmem:[%s691_s2 + $0xe0] sm:$0xff]   ;;  %v510_v21 = vld [vmem:[%s691_s2 + $0xe8] sm:$0xff]  }
   0x7   :  { %v503_v14 = vld [vmem:[%s691_s2 + $0x18] sm:$0xff]   ;;  %v507_v18 = vld [vmem:[%s691_s2 + $0x20] sm:$0xff]   ;;  %v511_v22 = vld [vmem:[%s691_s2 + $0x28] sm:$0xff]  }
   0x8   :  { %446 = vmatpush3.bf16.msra.mxu0 %v495_v6  ;;  %v504_v15 = vld [vmem:[%s691_s2 + $0x98] sm:$0xff]   ;;  %v508_v19 = vld [vmem:[%s691_s2 + $0xa0] sm:$0xff]   ;;  %v512_v23 = vld [vmem:[%s691_s2 + $0xa8] sm:$0xff]  }
   0x9   :  { %468 = vmatpush3.bf16.msra.mxu1 %v496_v7  ;;  %447 = vmatprep.subr.bf16.mxu0 %v497_v8  ;;  %v513_v24 = vld [vmem:[%s691_s2 + $0x70] sm:$0xff]   ;;  %v517_v28 = vld [vmem:[%s691_s2 + $0x78] sm:$0xff]   ;;  %v19_v33 = vld [vmem:[%s689_s0] sm:$0xf] }
   0xa   :  { %469 = vmatprep.subr.bf16.mxu1 %v498_v9  ;;  %v514_v25 = vld [vmem:[%s691_s2 + $0xf0] sm:$0xff]   ;;  %v518_v29 = vld [vmem:[%s691_s2 + $0xf8] sm:$0xff]   ;;  %v21_v34 = vld [vmem:[%s690_s1] sm:$0xf]  ;;  %v20_v35 = vunpack.c.l.bf16 %v19_v33 }
   0xb   :  { %v515_v26 = vld [vmem:[%s691_s2 + $0x30] sm:$0xff]   ;;  %v519_v31 = vld [vmem:[%s691_s2 + $0x38] sm:$0xff]   ;;  %v22_v36 = vunpack.c.l.bf16 %v21_v34 }
   0xc   :  { %448 = vmatpush3.bf16.msra.mxu0 %v499_v10  ;;  %v516_v27 = vld [vmem:[%s691_s2 + $0xb0] sm:$0xff]   ;;  %v520_v32 = vld [vmem:[%s691_s2 + $0xb8] sm:$0xff]  }
   0xd   :  { %470 = vmatpush3.bf16.msra.mxu1 %v500_v11  ;;  %449 = vmatprep.subr.bf16.mxu0 %v501_v12 }
   0xe   :  { %471 = vmatprep.subr.bf16.mxu1 %v502_v13 }
  0x10   :  { %450 = vmatpush3.bf16.msra.mxu0 %v503_v14 }
  0x11   :  { %472 = vmatpush3.bf16.msra.mxu1 %v504_v15  ;;  %451 = vmatprep.subr.bf16.mxu0 %v505_v16 }
  0x12   :  { %473 = vmatprep.subr.bf16.mxu1 %v506_v17 }
  0x14   :  { %452 = vmatpush3.bf16.msra.mxu0 %v507_v18 }
  0x15   :  { %474 = vmatpush3.bf16.msra.mxu1 %v508_v19  ;;  %453 = vmatprep.subr.bf16.mxu0 %v509_v20 }
  0x16   :  { %475 = vmatprep.subr.bf16.mxu1 %v510_v21 }
  0x18   :  { %454 = vmatpush3.bf16.msra.mxu0 %v511_v22 }
  0x19   :  { %476 = vmatpush3.bf16.msra.mxu1 %v512_v23  ;;  %455 = vmatprep.subr.bf16.mxu0 %v513_v24 }
  0x1a   :  { %477 = vmatprep.subr.bf16.mxu1 %v514_v25 }
  0x1c   :  { %456 = vmatpush3.bf16.msra.mxu0 %v515_v26 }
  0x1d   :  { %478 = vmatpush3.bf16.msra.mxu1 %v516_v27  ;;  %457 = vmatprep.subr.bf16.mxu0 %v517_v28 }
  0x1e   :  { %479 = vmatprep.subr.bf16.mxu1 %v518_v29 }
  0x20   :  { %458 = vmatpush3.bf16.msra.mxu0 %v519_v31 }
  0x21   :  { %480 = vmatpush3.bf16.msra.mxu1 %v520_v32 }
  0x22   :  { %9 = vsyncpa [#allocation3], 0  ;;  %v23_v40 = vadd.f32 %v22_v36, %v20_v35  ;;  %v29_v41 = vunpack.c.0.s8 %v28_v38  ;;  %v410_v54 = vld [vmem:[%s692_s3] ss:$0 sm:$0xff]  ;;  %s546_s2 = smov [#allocation2]   ;;  %vm394_vm0 = vcmask 74752  }
  0x23   :  { %s402_s5 = sshll.u32 %s546_s2, 4  ;;  %s403_s5 = int_to_ptr.vmem [resolvable:$true] %s402_s5 }
  0x24   :  { %v24_v42 = vmul.f32 0.5, %v23_v40  ;;  %v32_v43 = vsub.s32 %v29_v41, %v31_v39  ;;  %s521_s6 = scalar_lea.vmem %s403_s5, 32  ;;  %p526_p1 = scmp.lt.s32.totalorder %s403_s5, %s403_s5 }
  0x25   :  { %p522_p0 = scmp.ne.s32.totalorder %s403_s5, %s521_s6  ;;  %p527_p2 = scmp.lt.s32.totalorder %s521_s6, %s521_s6 }
  0x26   :  { %v33_v44 = vrot.slane %v24_v42, %v32_v43  ;;  %v26_v45 = vcombine.high %v24_v42, %v24_v42 }
  0x27   :  { %p528_p3 = por %p527_p2, %p526_p1 }
  0x28   :  { %v41_v46 = vcombine.high %v33_v44, %v33_v44  ;;  %v40_v47 = vrot.slane %v26_v45, %v32_v43  ;;  %v47_v48 = vpack.c.bf16 %v33_v44, %v33_v44 }
  0x29   :  { %p529_p4 = pnand %p528_p3, %p522_p0 }
  0x2a   :  { %v48_v49 = vpack.c.bf16 %v41_v46, %v41_v46  ;;  %v42_v50 = vcombine.high %v40_v47, %v40_v47  ;;  %v49_v51 = vpack.c.bf16 %v40_v47, %v40_v47 }
  0x2c   :  { %346 = vmatprep.mubr.bf16.mxu0 %v48_v49  ;;  %v50_v52 = vpack.c.bf16 %v42_v50, %v42_v50 }
  0x2d   :  { %347 = vmatmul.mubr.bf16.vlgmr.msra.gmra.mrb[0].mxu0 %v47_v48 }
  0x2e   :  { %386 = vmatprep.mubr.bf16.mxu1 %v50_v52 }
  0x2f   :  { %387 = vmatmul.mubr.bf16.vlgmr.msra.gmra.mrb[0].mxu1 %v49_v51 }
 0x100   :  { %v459_v53 = vpop.f32.mrb[0].mxu0 }
 0x101   :  { %v460_v55 = vpop.f32.mrb[1].mxu0 }
 0x102   :  { %v481_v56 = vpop.f32.mrb[0].mxu1  ;;  %v461_v57 = vadd.f32 %v460_v55, %v459_v53  ;;  %v462_v58 = vpop.f32.mrb[2].mxu0 }
 0x103   :  { %v482_v59 = vpop.f32.mrb[1].mxu1  ;;  %v463_v60 = vpop.f32.mrb[3].mxu0 }
 0x104   :  { %v349_v61 = vadd.f32 %v461_v57, %v410_v54  ;;  %v483_v62 = vadd.f32 %v482_v59, %v481_v56  ;;  %v484_v63 = vpop.f32.mrb[2].mxu1 }
 0x105   :  { %v485_v0 = vpop.f32.mrb[3].mxu1 }
 0x106   :  { %v389_v1 = vadd.f32 %v483_v62, %v349_v61 }
 0x108   :  { %395 = vst.msk [vmem:[#allocation2] sm:$0x3] %vm394_vm0, %v389_v1 }
 0x109   :  { %532 = shalt.err (!%p529_p4)
}
 0x10a   :  { %s533_s8 = scalar_lea.hbm %s693_s4, 32 }
 0x10b   :  { %p534_p5 = scmp.ne.s32.totalorder %s693_s4, %s533_s8  ;;  %p537_p6 = scmp.lt.u32.totalorder %s533_s8, %s693_s4 }
 0x10d   :  { %p539_p7 = pnand %p537_p6, %p534_p5 }
 0x10f   :  { %542 = shalt.err (!%p539_p7)
}
 0x110   :  { %405 = dma.vmem_to_hbm [thread:$0]  %s403_s5, 32, %s693_s4, [#allocation3]  }
 0x111   :  { %543 = dma.done.wait [#allocation3], 32  }
 0x112   :  { %544 = vsyncadd [#allocation3], 4294967264 }
 0x113   :  { %409 = vsyncpa [#allocation3], 1 }

// kernel: imu_network.6
= control target key start
LH: loop header
LB: loop body
LE: loop exit
PB: predicated region body
PF: predicated region fallthrough
CT: control target
= control target key end

     0   :  { %v61_v22 = vlaneseq  ;;  %v2930_v23 = vmov 1983009808   ;;  %vm89_vm1 = vcmask 1040384   ;;  %vm2932_vm4 = vmmov 0   ;;  %s3721_s2 = inlined_call_operand.vmem [shape: bf16[256,128], index: 2, kind: input, shape index: {}]   ;;  %s3722_s4 = inlined_call_operand.vmem [shape: bf16[3,256,64], index: 4, kind: input, shape index: {}]   ;;  %s3723_s0 = inlined_call_operand.vmem [shape: bf16[4,256], index: 0, kind: input, shape index: {}]   ;;  %s3724_s1 = inlined_call_operand.vmem [shape: bf16[4,256], index: 1, kind: input, shape index: {}]   ;;  %s3725_s6 = inlined_call_operand.vmem [shape: bf16[64,128], index: 6, kind: input, shape index: {}]   ;;  %s3726_s10 = inlined_call_operand.vmem [shape: bf16[5,256,64], index: 10, kind: input, shape index: {}]   ;;  %s3727_s3 = inlined_call_operand.vmem [shape: f32[1,128], index: 3, kind: input, shape index: {}]   ;;  %s3728_s18 = inlined_call_operand.vmem [shape: bf16[4,512], index: 18, kind: output, shape index: {}]   ;;  %s3729_s5 = inlined_call_operand.vmem [shape: f32[1,64], index: 5, kind: input, shape index: {}]   ;;  %s3730_s12 = inlined_call_operand.vmem [shape: bf16[64,128], index: 12, kind: input, shape index: {}]   ;;  %s3731_s16 = inlined_call_operand.vmem [shape: bf16[256,128], index: 16, kind: input, shape index: {}]   ;;  %s3732_s7 = inlined_call_operand.vmem [shape: f32[1,128], index: 7, kind: input, shape index: {}]   ;;  %s3733_s8 = inlined_call_operand.vmem [shape: f32[1,128], index: 8, kind: input, shape index: {}]   ;;  %s3734_s9 = inlined_call_operand.vmem [shape: f32[1,128], index: 9, kind: input, shape index: {}]   ;;  %s3735_s11 = inlined_call_operand.vmem [shape: f32[1,64], index: 11, kind: input, shape index: {}]   ;;  %s3736_s13 = inlined_call_operand.vmem [shape: f32[1,128], index: 13, kind: input, shape index: {}]   ;;  %s3737_s14 = inlined_call_operand.vmem [shape: f32[1,128], index: 14, kind: input, shape index: {}]   ;;  %s3738_s15 = inlined_call_operand.vmem [shape: f32[1,128], index: 15, kind: input, shape index: {}]   ;;  %s3739_s17 = inlined_call_operand.vmem [shape: f32[1,128], index: 17, kind: input, shape index: {}]  }
   0x1   :  { %3742 = sst [smem:[#allocation2_spill]] %s3721_s2  ;;  %v164_v24 = vunpack.c.l.s4 %v2930_v23  ;;  %v2931_v23 = vmov 0.0   ;;  %vm879_vm5 = vcmask 523264   ;;  %vm104_vm6 = vcmask 1042432  }
   0x2   :  { %3743 = sst [smem:[#allocation3_spill]] %s3722_s4  ;;  %s3746_s29 = sld [smem:[#allocation2_spill]]  ;;  %v3106_v29 = vshrl.u32 %v61_v22, 7 }
   0x3   :  { %3744 = sst [smem:[#allocation4_spill]] %s3723_s0  ;;  %v165_v30 = vunpack.c.0.s8 %v164_v24  ;;  %v2826_v24 = vld [vmem:[%s3725_s6] sm:$0xff]  }
   0x4   :  { %3745 = sst [smem:[#allocation5_spill]] %s3734_s9  ;;  %s3747_s9 = sld [smem:[#allocation3_spill]] }
   0x5   :  { %v3121_v35 = vsub.s32 %v165_v30, %v3106_v29  ;;  %s3748_s23 = sld [smem:[#allocation4_spill]]  ;;  %v2831_v30 = vld [vmem:[%s3726_s10 + $0x40] sm:$0xff]  }
   0x8   :  { %v2762_v0 = vld [vmem:[%s3746_s29 + $0x40] sm:$0xff]   ;;  %v2766_v4 = vld [vmem:[%s3746_s29 + $0x48] sm:$0xff]   ;;  %v2770_v8 = vld [vmem:[%s3746_s29 + $0x50] sm:$0xff]  }
   0x9   :  { %2505 = vmatprep.subr.bf16.mxu0 %v2762_v0  ;;  %v2764_v2 = vld [vmem:[%s3746_s29] sm:$0xff]   ;;  %v2768_v6 = vld [vmem:[%s3746_s29 + $0x8] sm:$0xff]   ;;  %v2772_v10 = vld [vmem:[%s3746_s29 + $0x10] sm:$0xff]  }
   0xa   :  { %v2763_v1 = vld [vmem:[%s3747_s9 + $0xc0] sm:$0xff]   ;;  %2506 = vmatpush3.bf16.msra.mxu0 %v2764_v2  ;;  %v2767_v5 = vld [vmem:[%s3747_s9 + $0xc8] sm:$0xff]   ;;  %v2771_v9 = vld [vmem:[%s3747_s9 + $0xd0] sm:$0xff]  }
   0xb   :  { %2527 = vmatprep.subr.bf16.mxu1 %v2763_v1  ;;  %v2765_v3 = vld [vmem:[%s3747_s9 + $0x80] sm:$0xff]   ;;  %2507 = vmatprep.subr.bf16.mxu0 %v2766_v4  ;;  %v2769_v7 = vld [vmem:[%s3747_s9 + $0x88] sm:$0xff]   ;;  %v2773_v11 = vld [vmem:[%s3747_s9 + $0x90] sm:$0xff]  }
   0xc   :  { %2528 = vmatpush3.bf16.msra.mxu1 %v2765_v3  ;;  %v2774_v12 = vld [vmem:[%s3746_s29 + $0x58] sm:$0xff]   ;;  %v2778_v16 = vld [vmem:[%s3746_s29 + $0x60] sm:$0xff]   ;;  %v2782_v20 = vld [vmem:[%s3746_s29 + $0x68] sm:$0xff]  }
   0xd   :  { %2529 = vmatprep.subr.bf16.mxu1 %v2767_v5  ;;  %v2775_v13 = vld [vmem:[%s3747_s9 + $0xd8] sm:$0xff]   ;;  %v2779_v17 = vld [vmem:[%s3747_s9 + $0xe0] sm:$0xff]   ;;  %v2783_v21 = vld [vmem:[%s3747_s9 + $0xe8] sm:$0xff]  }
   0xe   :  { %2508 = vmatpush3.bf16.msra.mxu0 %v2768_v6  ;;  %v2776_v14 = vld [vmem:[%s3746_s29 + $0x18] sm:$0xff]   ;;  %v2780_v18 = vld [vmem:[%s3746_s29 + $0x20] sm:$0xff]   ;;  %v2784_v25 = vld [vmem:[%s3746_s29 + $0x28] sm:$0xff]   ;;  %v69_v6 = vand.u32 1, %v3106_v29 }
   0xf   :  { %2509 = vmatprep.subr.bf16.mxu0 %v2770_v8  ;;  %v2777_v15 = vld [vmem:[%s3747_s9 + $0x98] sm:$0xff]   ;;  %v2781_v19 = vld [vmem:[%s3747_s9 + $0xa0] sm:$0xff]   ;;  %v2785_v26 = vld [vmem:[%s3747_s9 + $0xa8] sm:$0xff]  }
  0x10   :  { %2530 = vmatpush3.bf16.msra.mxu1 %v2769_v7  ;;  %v2786_v27 = vld [vmem:[%s3746_s29 + $0x70] sm:$0xff]   ;;  %v2790_v33 = vld [vmem:[%s3746_s29 + $0x78] sm:$0xff]   ;;  %v3132_v38 = vld [vmem:[%s3748_s23] sm:$0xf]  ;;  %vm3248_vm0 = vcmp.eq.s32.totalorder %v69_v6, 0  ;;  %vm3549_vm7 = vcmp.ne.s32.totalorder %v69_v6, 1 }
  0x11   :  { %2531 = vmatprep.subr.bf16.mxu1 %v2771_v9  ;;  %v2787_v28 = vld [vmem:[%s3747_s9 + $0xf0] sm:$0xff]   ;;  %v2791_v34 = vld [vmem:[%s3747_s9 + $0xf8] sm:$0xff]   ;;  %v3136_v39 = vrot.slane %v3132_v38, %v3121_v35  ;;  %v2794_v40 = vld [vmem:[%s3747_s9 + $0x40] sm:$0xff]  }
  0x12   :  { %2510 = vmatpush3.bf16.msra.mxu0 %v2772_v10  ;;  %v2788_v31 = vld [vmem:[%s3746_s29 + $0x30] sm:$0xff]   ;;  %v2792_v36 = vld [vmem:[%s3746_s29 + $0x38] sm:$0xff]   ;;  %v2795_v41 = vld [vmem:[%s3747_s9 + $0x140] sm:$0xff]  }
  0x13   :  { %2511 = vmatprep.subr.bf16.mxu0 %v2774_v12  ;;  %v2789_v32 = vld [vmem:[%s3747_s9 + $0xb0] sm:$0xff]   ;;  %v2793_v37 = vld [vmem:[%s3747_s9 + $0xb8] sm:$0xff]   ;;  %v3146_v42 = vcombine.high %v3136_v39, %v3136_v39  ;;  %v2796_v43 = vld [vmem:[%s3747_s9] sm:$0xff]  }
  0x14   :  { %2532 = vmatpush3.bf16.msra.mxu1 %v2773_v11  ;;  %v2797_v44 = vld [vmem:[%s3747_s9 + $0x100] sm:$0xff]   ;;  %v2798_v45 = vld [vmem:[%s3747_s9 + $0x48] sm:$0xff]   ;;  %v2802_v49 = vld [vmem:[%s3747_s9 + $0x50] sm:$0xff]  }
  0x15   :  { %2533 = vmatprep.subr.bf16.mxu1 %v2775_v13  ;;  %301 = vmatprep.mubr.bf16.mxu0 %v3146_v42  ;;  %v2799_v46 = vld [vmem:[%s3747_s9 + $0x148] sm:$0xff]   ;;  %v2803_v50 = vld [vmem:[%s3747_s9 + $0x150] sm:$0xff]   ;;  %v2806_v53 = vld [vmem:[%s3747_s9 + $0x58] sm:$0xff]  }
  0x16   :  { %2512 = vmatpush3.bf16.msra.mxu0 %v2776_v14  ;;  %505 = vmatprep.mubr.bf16.mxu1 %v3146_v42  ;;  %v2800_v47 = vld [vmem:[%s3747_s9 + $0x8] sm:$0xff]   ;;  %v2804_v51 = vld [vmem:[%s3747_s9 + $0x10] sm:$0xff]   ;;  %v2807_v54 = vld [vmem:[%s3747_s9 + $0x158] sm:$0xff]  }
  0x17   :  { %2513 = vmatprep.subr.bf16.mxu0 %v2778_v16  ;;  %v2801_v48 = vld [vmem:[%s3747_s9 + $0x108] sm:$0xff]   ;;  %v2805_v52 = vld [vmem:[%s3747_s9 + $0x110] sm:$0xff]   ;;  %v2808_v55 = vld [vmem:[%s3747_s9 + $0x18] sm:$0xff]  }
  0x18   :  { %2534 = vmatpush3.bf16.msra.mxu1 %v2777_v15  ;;  %v2809_v56 = vld [vmem:[%s3747_s9 + $0x118] sm:$0xff]   ;;  %v2810_v57 = vld [vmem:[%s3747_s9 + $0x60] sm:$0xff]   ;;  %v2814_v61 = vld [vmem:[%s3747_s9 + $0x68] sm:$0xff]  }
  0x19   :  { %2535 = vmatprep.subr.bf16.mxu1 %v2779_v17  ;;  %v2811_v58 = vld [vmem:[%s3747_s9 + $0x160] sm:$0xff]   ;;  %v2815_v62 = vld [vmem:[%s3747_s9 + $0x168] sm:$0xff]   ;;  %v2818_v1 = vld [vmem:[%s3747_s9 + $0x70] sm:$0xff]  }
  0x1a   :  { %2514 = vmatpush3.bf16.msra.mxu0 %v2780_v18  ;;  %v2812_v59 = vld [vmem:[%s3747_s9 + $0x20] sm:$0xff]   ;;  %v2816_v63 = vld [vmem:[%s3747_s9 + $0x28] sm:$0xff]   ;;  %v2819_v2 = vld [vmem:[%s3747_s9 + $0x170] sm:$0xff]  }
  0x1b   :  { %2515 = vmatprep.subr.bf16.mxu0 %v2782_v20  ;;  %v2813_v60 = vld [vmem:[%s3747_s9 + $0x120] sm:$0xff]   ;;  %v2817_v0 = vld [vmem:[%s3747_s9 + $0x128] sm:$0xff]   ;;  %v2820_v3 = vld [vmem:[%s3747_s9 + $0x30] sm:$0xff]  }
  0x1c   :  { %2536 = vmatpush3.bf16.msra.mxu1 %v2781_v19  ;;  %v2821_v4 = vld [vmem:[%s3747_s9 + $0x130] sm:$0xff]   ;;  %v2822_v5 = vld [vmem:[%s3747_s9 + $0x78] sm:$0xff]   ;;  %v80_v10 = vld [vmem:[%s3724_s1] sm:$0xf] }
  0x1d   :  { %2537 = vmatprep.subr.bf16.mxu1 %v2783_v21  ;;  %v2823_v7 = vld [vmem:[%s3747_s9 + $0x178] sm:$0xff]   ;;  %v3252_v12 = vunpack.c.l.bf16 %v80_v10  ;;  %v3255_v13 = vrot.slane %v80_v10, %v3121_v35  ;;  %vm2173_vm2 = vmneg %vm3248_vm0  ;;  %v2841_v35 = vld [vmem:[%s3726_s10 + $0x10] sm:$0xff]  }
  0x1e   :  { %2516 = vmatpush3.bf16.msra.mxu0 %v2784_v25  ;;  %v2824_v8 = vld [vmem:[%s3747_s9 + $0x38] sm:$0xff]   ;;  %vm3277_vm3 = vmpackc.low %vm2173_vm2, %vm2173_vm2  ;;  %v2827_v25 = vld [vmem:[%s3725_s6 + $0x8] sm:$0xff]  }
  0x1f   :  { %2517 = vmatprep.subr.bf16.mxu0 %v2786_v27  ;;  %v2825_v9 = vld [vmem:[%s3747_s9 + $0x138] sm:$0xff]   ;;  %v3259_v14 = vcombine.high %v3252_v12, %v3252_v12  ;;  %v3263_v15 = vcombine.high %v3255_v13, %v3255_v13  ;;  %v85_v16 = vrot.slane %v3252_v12, 7  ;;  %vm2470_vm8 = vmpackc.low %vm3549_vm7, %vm3549_vm7  ;;  %v2897_v29 = vld [vmem:[%s3726_s10 + $0x208] sm:$0xff]  }
  0x20   :  { %2538 = vmatpush3.bf16.msra.mxu1 %v2785_v26  ;;  %v2828_v26 = vld [vmem:[%s3725_s6 + $0x10] sm:$0xff]   ;;  %v2829_v27 = vld [vmem:[%s3725_s6 + $0x18] sm:$0xff]   ;;  %s3755_s6 = sld [smem:[#allocation5_spill]] }
  0x21   :  { %2539 = vmatprep.subr.bf16.mxu1 %v2787_v28  ;;  %v86_v17 = vrot.slane %v3259_v14, 7  ;;  %v3271_v18 = vsel %vm89_vm1, 0.0, %v85_v16  ;;  %v2830_v28 = vld [vmem:[%s3726_s10 + $0xc0] sm:$0xff]   ;;  %v2874_v20 = vld [vmem:[%s3726_s10 + $0x158] sm:$0xff]   ;;  %v2898_v6 = vld [vmem:[%s3726_s10 + $0x250] sm:$0xff]  }
  0x22   :  { %2518 = vmatpush3.bf16.msra.mxu0 %v2788_v31  ;;  %v3283_v21 = vpack.c.bf16 %v3271_v18, %v3271_v18  ;;  %v2833_v31 = vld [vmem:[%s3726_s10] sm:$0xff]  }
  0x23   :  { %2519 = vmatprep.subr.bf16.mxu0 %v2790_v33  ;;  %v3275_v19 = vsel %vm89_vm1, 0.0, %v86_v17  ;;  %v2837_v33 = vld [vmem:[%s3726_s10 + $0x8] sm:$0xff]  }
  0x24   :  { %2540 = vmatpush3.bf16.msra.mxu1 %v2789_v32  ;;  %v3287_v22 = vpack.c.bf16 %v3275_v19, %v3275_v19  ;;  %v2835_v32 = vld [vmem:[%s3726_s10 + $0x48] sm:$0xff]  }
  0x25   :  { %2541 = vmatprep.subr.bf16.mxu1 %v2791_v34  ;;  %v2839_v34 = vld [vmem:[%s3726_s10 + $0x50] sm:$0xff]  }
  0x26   :  { %2520 = vmatpush3.bf16.msra.mxu0 %v2792_v36  ;;  %v2843_v36 = vld [vmem:[%s3726_s10 + $0x58] sm:$0xff]  }
  0x27   :  { %2549 = vmatprep.subr.bf16.mxu0 %v2794_v40  ;;  %v2847_v40 = vld [vmem:[%s3726_s10 + $0x60] sm:$0xff]  }
  0x28   :  { %2542 = vmatpush3.bf16.msra.mxu1 %v2793_v37  ;;  %v2845_v37 = vld [vmem:[%s3726_s10 + $0x18] sm:$0xff]  }
  0x29   :  { %2571 = vmatprep.subr.bf16.mxu1 %v2795_v41  ;;  %302 = vmatmul.mubr.bf16.vlgmr.msra.gmra.mrb[0].mxu0 %v3136_v39  ;;  %v2849_v41 = vld [vmem:[%s3726_s10 + $0x20] sm:$0xff]  }
  0x2a   :  { %2550 = vmatpush3.bf16.msra.mxu0 %v2796_v43  ;;  %2177 = vmatprep.mubr.msk.bf16.mxu0 %vm3277_vm3, %v3287_v22  ;;  %v2851_v43 = vld [vmem:[%s3726_s10 + $0x68] sm:$0xff]  }
  0x2b   :  { %506 = vmatmul.mubr.bf16.vlgmr.msra.gmra.mrb[0].mxu1 %v3136_v39  ;;  %2551 = vmatprep.subr.bf16.mxu0 %v2798_v45  ;;  %v2853_v45 = vld [vmem:[%s3726_s10 + $0x28] sm:$0xff]  }
  0x2c   :  { %2572 = vmatpush3.bf16.msra.mxu1 %v2797_v44  ;;  %821 = vmatprep.mubr.bf16.mxu1 %v3263_v15  ;;  %v3350_v44 = vunpack.c.l.bf16 %v3132_v38  ;;  %v2859_v38 = vld [vmem:[%s3726_s10 + $0x78] sm:$0xff]  }
  0x2d   :  { %2573 = vmatprep.subr.bf16.mxu1 %v2799_v46  ;;  %v2855_v46 = vld [vmem:[%s3726_s10 + $0x70] sm:$0xff]  }
  0x2e   :  { %2552 = vmatpush3.bf16.msra.mxu0 %v2800_v47  ;;  %v2857_v47 = vld [vmem:[%s3726_s10 + $0x30] sm:$0xff]  }
  0x2f   :  { %2553 = vmatprep.subr.bf16.mxu0 %v2802_v49 }
  0x30   :  { %2574 = vmatpush3.bf16.msra.mxu1 %v2801_v48  ;;  %v3363_v48 = vcombine.high %v3350_v44, %v3350_v44 }
  0x31   :  { %2575 = vmatprep.subr.bf16.mxu1 %v2803_v50  ;;  %v94_v50 = vrot.slane %v3350_v44, 7 }
  0x32   :  { %2554 = vmatpush3.bf16.msra.mxu0 %v2804_v51  ;;  %v95_v49 = vrot.slane %v3363_v48, 7  ;;  %v2861_v51 = vld [vmem:[%s3726_s10 + $0x38] sm:$0xff]  }
  0x33   :  { %2555 = vmatprep.subr.bf16.mxu0 %v2806_v53 }
  0x34   :  { %2576 = vmatpush3.bf16.msra.mxu1 %v2805_v52  ;;  %v99_v52 = vsel %vm89_vm1, 0.0, %v95_v49 }
  0x35   :  { %2577 = vmatprep.subr.bf16.mxu1 %v2807_v54  ;;  %v2317_v53 = vpack.c.bf16 %v99_v52, %v99_v52  ;;  %v98_v54 = vsel %vm89_vm1, 0.0, %v94_v50  ;;  %v2832_v52 = vld [vmem:[%s3726_s10 + $0x80] sm:$0xff]  }
  0x36   :  { %2556 = vmatpush3.bf16.msra.mxu0 %v2808_v55  ;;  %v2322_v55 = vpack.c.bf16 %v98_v54, %v98_v54  ;;  %v2834_v54 = vld [vmem:[%s3726_s10 + $0xc8] sm:$0xff]  }
  0x37   :  { %2557 = vmatprep.subr.bf16.mxu0 %v2810_v57  ;;  %v2865_v57 = vld [vmem:[%s3726_s10 + $0x180] sm:$0xff]  }
  0x38   :  { %2578 = vmatpush3.bf16.msra.mxu1 %v2809_v56  ;;  %v2864_v56 = vld [vmem:[%s3726_s10 + $0x1c0] sm:$0xff]  }
  0x39   :  { %2579 = vmatprep.subr.bf16.mxu1 %v2811_v58  ;;  %v2868_v58 = vld [vmem:[%s3726_s10 + $0x1c8] sm:$0xff]  }
  0x3a   :  { %2558 = vmatpush3.bf16.msra.mxu0 %v2812_v59  ;;  %v2869_v59 = vld [vmem:[%s3726_s10 + $0x188] sm:$0xff]  }
  0x3b   :  { %2559 = vmatprep.subr.bf16.mxu0 %v2814_v61  ;;  %v2873_v61 = vld [vmem:[%s3726_s10 + $0x190] sm:$0xff]  }
  0x3c   :  { %2580 = vmatpush3.bf16.msra.mxu1 %v2813_v60  ;;  %v2872_v60 = vld [vmem:[%s3726_s10 + $0x1d0] sm:$0xff]  }
  0x3d   :  { %2581 = vmatprep.subr.bf16.mxu1 %v2815_v62  ;;  %v2876_v62 = vld [vmem:[%s3726_s10 + $0x1d8] sm:$0xff]  }
  0x3e   :  { %2560 = vmatpush3.bf16.msra.mxu0 %v2816_v63  ;;  %v2877_v63 = vld [vmem:[%s3726_s10 + $0x198] sm:$0xff]  }
  0x3f   :  { %2561 = vmatprep.subr.bf16.mxu0 %v2818_v1  ;;  %v2881_v1 = vld [vmem:[%s3726_s10 + $0x1a0] sm:$0xff]  }
  0x40   :  { %2582 = vmatpush3.bf16.msra.mxu1 %v2817_v0  ;;  %v2880_v0 = vld [vmem:[%s3726_s10 + $0x1e0] sm:$0xff]  }
  0x41   :  { %2583 = vmatprep.subr.bf16.mxu1 %v2819_v2  ;;  %v2884_v2 = vld [vmem:[%s3726_s10 + $0x1e8] sm:$0xff]  }
  0x42   :  { %2562 = vmatpush3.bf16.msra.mxu0 %v2820_v3  ;;  %v2885_v3 = vld [vmem:[%s3726_s10 + $0x1a8] sm:$0xff]  }
  0x43   :  { %2563 = vmatprep.subr.bf16.mxu0 %v2822_v5  ;;  %v2889_v5 = vld [vmem:[%s3726_s10 + $0x1b0] sm:$0xff]  }
  0x44   :  { %2584 = vmatpush3.bf16.msra.mxu1 %v2821_v4  ;;  %v2888_v4 = vld [vmem:[%s3726_s10 + $0x1f0] sm:$0xff]  }
  0x45   :  { %2585 = vmatprep.subr.bf16.mxu1 %v2823_v7  ;;  %v2892_v7 = vld [vmem:[%s3726_s10 + $0x1f8] sm:$0xff]  }
  0x46   :  { %2564 = vmatpush3.bf16.msra.mxu0 %v2824_v8  ;;  %v2893_v8 = vld [vmem:[%s3726_s10 + $0x1b8] sm:$0xff]  }
  0x47   :  { %2620 = vmatprep.subr.bf16.mxu0 %v2831_v30 }
  0x48   :  { %2586 = vmatpush3.bf16.msra.mxu1 %v2825_v9 }
  0x49   :  { %2182 = vmatmul.mubr.msk.bf16.vlgmr.msra.gmra.mrb[4].mxu0 %vm3277_vm3, %v3283_v21  ;;  %2735 = vmatprep.subr.bf16.mxu1 %v2931_v23 }
  0x4a   :  { %2621 = vmatpush3.bf16.msra.mxu0 %v2833_v31  ;;  %2318 = vmatprep.mubr.msk.bf16.mxu0 %vm3277_vm3, %v2317_v53 }
  0x4b   :  { %822 = vmatmul.mubr.bf16.vlgmr.msra.gmra.mrb[4].mxu1 %v3255_v13  ;;  %2622 = vmatprep.subr.bf16.mxu0 %v2835_v32 }
  0x4c   :  { %2736 = vmatpush3.bf16.msra.mxu1 %v2826_v24  ;;  %2743 = vmatprep.mubr.msk.bf16.mxu1 %vm2932_vm4, %v2931_v23 }
  0x4d   :  { %2737 = vmatprep.subr.bf16.mxu1 %v2931_v23 }
  0x4e   :  { %2623 = vmatpush3.bf16.msra.mxu0 %v2837_v33 }
  0x4f   :  { %2624 = vmatprep.subr.bf16.mxu0 %v2839_v34 }
  0x50   :  { %2738 = vmatpush3.bf16.msra.mxu1 %v2827_v25 }
  0x51   :  { %2739 = vmatprep.subr.bf16.mxu1 %v2931_v23 }
  0x52   :  { %2625 = vmatpush3.bf16.msra.mxu0 %v2841_v35 }
  0x53   :  { %2626 = vmatprep.subr.bf16.mxu0 %v2843_v36 }
  0x54   :  { %2740 = vmatpush3.bf16.msra.mxu1 %v2828_v26 }
  0x55   :  { %2741 = vmatprep.subr.bf16.mxu1 %v2931_v23 }
  0x56   :  { %2627 = vmatpush3.bf16.msra.mxu0 %v2845_v37 }
  0x57   :  { %2628 = vmatprep.subr.bf16.mxu0 %v2847_v40 }
  0x58   :  { %2742 = vmatpush3.bf16.msra.mxu1 %v2829_v27 }
  0x59   :  { %2598 = vmatprep.subr.bf16.mxu1 %v2830_v28 }
  0x5a   :  { %2629 = vmatpush3.bf16.msra.mxu0 %v2849_v41 }
  0x5b   :  { %2630 = vmatprep.subr.bf16.mxu0 %v2851_v43 }
  0x5e   :  { %2631 = vmatpush3.bf16.msra.mxu0 %v2853_v45 }
  0x5f   :  { %2632 = vmatprep.subr.bf16.mxu0 %v2855_v46 }
  0x62   :  { %2633 = vmatpush3.bf16.msra.mxu0 %v2857_v47 }
  0x63   :  { %2634 = vmatprep.subr.bf16.mxu0 %v2859_v38  ;;  %v2231_v38 = vld [vmem:[%s3729_s5] ss:$0 sm:$0xff] }
  0x66   :  { %2635 = vmatpush3.bf16.msra.mxu0 %v2861_v51 }
  0x67   :  { %2664 = vmatprep.subr.bf16.mxu0 %v2864_v56  ;;  %v2838_v56 = vld [vmem:[%s3726_s10 + $0xd0] sm:$0xff]  }
  0x69   :  { %2323 = vmatmul.mubr.msk.bf16.vlgmr.msra.gmra.mrb[8].mxu0 %vm3277_vm3, %v2322_v55  ;;  %v2836_v55 = vld [vmem:[%s3726_s10 + $0x88] sm:$0xff]  }
  0x6a   :  { %1610 = vmatprep.mubr.bf16.mxu0 %v3263_v15  ;;  %2665 = vmatpush3.bf16.msra.mxu0 %v2865_v57  ;;  %v2092_v15 = vld [vmem:[%s3727_s3] ss:$0 sm:$0xff]  ;;  %v2840_v57 = vld [vmem:[%s3726_s10 + $0x90] sm:$0xff]  }
  0x6b   :  { %2666 = vmatprep.subr.bf16.mxu0 %v2868_v58  ;;  %v2842_v58 = vld [vmem:[%s3726_s10 + $0xd8] sm:$0xff]  }
  0x6e   :  { %2667 = vmatpush3.bf16.msra.mxu0 %v2869_v59  ;;  %v2846_v59 = vld [vmem:[%s3726_s10 + $0xe0] sm:$0xff]  }
  0x6f   :  { %2668 = vmatprep.subr.bf16.mxu0 %v2872_v60  ;;  %v2848_v60 = vld [vmem:[%s3726_s10 + $0xa0] sm:$0xff]  }
  0x72   :  { %2669 = vmatpush3.bf16.msra.mxu0 %v2873_v61  ;;  %v2850_v61 = vld [vmem:[%s3726_s10 + $0xe8] sm:$0xff]  }
  0x73   :  { %2670 = vmatprep.subr.bf16.mxu0 %v2876_v62  ;;  %v2852_v62 = vld [vmem:[%s3726_s10 + $0xa8] sm:$0xff]  }
  0x76   :  { %2671 = vmatpush3.bf16.msra.mxu0 %v2877_v63  ;;  %v2854_v63 = vld [vmem:[%s3726_s10 + $0xf0] sm:$0xff]  }
  0x77   :  { %2672 = vmatprep.subr.bf16.mxu0 %v2880_v0  ;;  %v2856_v0 = vld [vmem:[%s3726_s10 + $0xb0] sm:$0xff]  }
  0x7a   :  { %2673 = vmatpush3.bf16.msra.mxu0 %v2881_v1  ;;  %v2858_v1 = vld [vmem:[%s3726_s10 + $0xf8] sm:$0xff]  }
  0x7b   :  { %2674 = vmatprep.subr.bf16.mxu0 %v2884_v2  ;;  %v2860_v2 = vld [vmem:[%s3726_s10 + $0xb8] sm:$0xff]  }
  0x7e   :  { %2675 = vmatpush3.bf16.msra.mxu0 %v2885_v3  ;;  %v2862_v3 = vld [vmem:[%s3726_s10 + $0x140] sm:$0xff]  }
  0x7f   :  { %2676 = vmatprep.subr.bf16.mxu0 %v2888_v4  ;;  %v2863_v4 = vld [vmem:[%s3726_s10 + $0x100] sm:$0xff]  }
  0x82   :  { %2677 = vmatpush3.bf16.msra.mxu0 %v2889_v5  ;;  %v2866_v5 = vld [vmem:[%s3726_s10 + $0x148] sm:$0xff]  }
  0x83   :  { %2678 = vmatprep.subr.bf16.mxu0 %v2892_v7  ;;  %v2867_v7 = vld [vmem:[%s3726_s10 + $0x108] sm:$0xff]  }
  0x86   :  { %2679 = vmatpush3.bf16.msra.mxu0 %v2893_v8  ;;  %v2870_v8 = vld [vmem:[%s3726_s10 + $0x150] sm:$0xff]  }
  0x87   :  { %2747 = vmatprep.subr.bf16.mxu0 %v2931_v23 }
  0x89   :  { %1611 = vmatmul.mubr.bf16.vlgmr.msra.gmra.mrb[12].mxu0 %v3255_v13 }
  0x8a   :  { %2755 = vmatprep.mubr.msk.bf16.mxu0 %vm2932_vm4, %v2931_v23 }
  0xfc   :  { %v2521_v9 = vpop.f32.mrb[0].mxu0 }
  0xfd   :  { %v2522_v16 = vpop.f32.mrb[1].mxu0 }
  0xfe   :  { %v2543_v10 = vpop.f32.mrb[0].mxu1  ;;  %v2523_v24 = vadd.f32 %v2522_v16, %v2521_v9  ;;  %v2524_v26 = vpop.f32.mrb[2].mxu0  ;;  %v2871_v9 = vld [vmem:[%s3726_s10 + $0x110] sm:$0xff]   ;;  %v2883_v16 = vld [vmem:[%s3726_s10 + $0x128] sm:$0xff]  }
  0xff   :  { %v2544_v17 = vpop.f32.mrb[1].mxu1  ;;  %v2525_v28 = vpop.f32.mrb[3].mxu0  ;;  %v101_v26 = vrot.slane %v3363_v48, 1 }
 0x100   :  { %v2545_v25 = vadd.f32 %v2544_v17, %v2543_v10  ;;  %v2546_v27 = vpop.f32.mrb[2].mxu1  ;;  %v304_v31 = vadd.f32 %v2523_v24, %v2092_v15  ;;  %v2879_v10 = vld [vmem:[%s3726_s10 + $0x120] sm:$0xff]   ;;  %v2882_v15 = vld [vmem:[%s3726_s10 + $0x168] sm:$0xff]   ;;  %v2886_v17 = vld [vmem:[%s3726_s10 + $0x170] sm:$0xff]  }
 0x101   :  { %v2547_v30 = vpop.f32.mrb[3].mxu1  ;;  %v2887_v24 = vld [vmem:[%s3726_s10 + $0x130] sm:$0xff]   ;;  %v2891_v27 = vld [vmem:[%s3726_s10 + $0x138] sm:$0xff]   ;;  %v2894_v28 = vld [vmem:[%s3726_s10 + $0x240] sm:$0xff]  }
 0x102   :  { %v309_v32 = vmax.f32 %v304_v31, 0.0  ;;  %v106_v30 = vsel %vm104_vm6, %v101_v26, 0.0 }
 0x104   :  { %v310_v13 = vpack.c.bf16 %v309_v32, %v309_v32  ;;  %v2895_v32 = vld [vmem:[%s3726_s10 + $0x200] sm:$0xff]  }
 0x106   :  { %311 = vst [vmem:[%s3728_s18] sm:$0x3] %v310_v13  ;;  %v2471_v13 = vpack.c.bf16 %v106_v30, %v106_v30 }
 0x11c   :  { %v2565_v40 = vpop.f32.mrb[4].mxu0 }
 0x11d   :  { %v2566_v41 = vpop.f32.mrb[5].mxu0 }
 0x11e   :  { %v2587_v33 = vpop.f32.mrb[4].mxu1  ;;  %v2567_v43 = vadd.f32 %v2566_v41, %v2565_v40  ;;  %v2568_v45 = vpop.f32.mrb[6].mxu0  ;;  %v2904_v40 = vld [vmem:[%s3726_s10 + $0x268] sm:$0xff]  }
 0x11f   :  { %v2588_v34 = vpop.f32.mrb[5].mxu1  ;;  %v2569_v46 = vpop.f32.mrb[7].mxu0  ;;  %v2905_v41 = vld [vmem:[%s3726_s10 + $0x228] sm:$0xff]   ;;  %v2907_v45 = vld [vmem:[%s3726_s10 + $0x230] sm:$0xff]  }
 0x120   :  { %v2589_v35 = vadd.f32 %v2588_v34, %v2587_v33  ;;  %v2590_v36 = vpop.f32.mrb[6].mxu1  ;;  %v644_v47 = vadd.f32 %v2567_v43, %v2545_v25  ;;  %v2890_v25 = vld [vmem:[%s3726_s10 + $0x178] sm:$0xff]   ;;  %v2896_v33 = vld [vmem:[%s3726_s10 + $0x248] sm:$0xff]   ;;  %v2906_v43 = vld [vmem:[%s3726_s10 + $0x270] sm:$0xff]   ;;  %v100_v46 = vrot.slane %v3350_v44, 1 }
 0x121   :  { %v2591_v37 = vpop.f32.mrb[7].mxu1  ;;  %v2900_v34 = vld [vmem:[%s3726_s10 + $0x258] sm:$0xff]   ;;  %v2902_v36 = vld [vmem:[%s3726_s10 + $0x260] sm:$0xff]  }
 0x122   :  { %v829_v49 = vadd.f32 %v2589_v35, %v644_v47  ;;  %v2901_v35 = vld [vmem:[%s3726_s10 + $0x218] sm:$0xff]   ;;  %v2903_v37 = vld [vmem:[%s3726_s10 + $0x220] sm:$0xff]  }
 0x123   :  { %v2908_v47 = vld [vmem:[%s3726_s10 + $0x278] sm:$0xff]  }
 0x124   :  { %v837_v50 = vadd.f32 %v2231_v38, %v829_v49  ;;  %v2909_v38 = vld [vmem:[%s3726_s10 + $0x238] sm:$0xff]   ;;  %v105_v49 = vsel %vm104_vm6, %v100_v46, 0.0 }
 0x126   :  { %v838_v51 = vmax.f32 %v837_v50, 0.0  ;;  %v2476_v50 = vpack.c.bf16 %v105_v49, %v105_v49  ;;  %v2919_v49 = vld [vmem:[%s3731_s16 + $0x10] sm:$0xff]  }
 0x128   :  { %v839_v53 = vpack.c.bf16 %v838_v51, %v838_v51 }
 0x12a   :  { %2744 = vmatmul.mubr.msk.bf16.vlgmr.msra.gmra.mrb[8].mxu1 %vm879_vm5, %v839_v53 }
 0x12b   :  { %2599 = vmatpush3.bf16.msra.mxu1 %v2832_v52  ;;  %2292 = vmatprep.mubr.msk.bf16.mxu1 %vm3277_vm3, %v3287_v22  ;;  %v2844_v22 = vld [vmem:[%s3726_s10 + $0x98] sm:$0xff]  }
 0x12c   :  { %2600 = vmatprep.subr.bf16.mxu1 %v2834_v54 }
 0x12f   :  { %2601 = vmatpush3.bf16.msra.mxu1 %v2836_v55 }
 0x130   :  { %2602 = vmatprep.subr.bf16.mxu1 %v2838_v56 }
 0x133   :  { %2603 = vmatpush3.bf16.msra.mxu1 %v2840_v57 }
 0x134   :  { %2604 = vmatprep.subr.bf16.mxu1 %v2842_v58 }
 0x137   :  { %2605 = vmatpush3.bf16.msra.mxu1 %v2844_v22 }
 0x138   :  { %2606 = vmatprep.subr.bf16.mxu1 %v2846_v59 }
 0x13b   :  { %2607 = vmatpush3.bf16.msra.mxu1 %v2848_v60  ;;  %v2910_v60 = vld [vmem:[%s3730_s12] sm:$0xff]  }
 0x13c   :  { %2608 = vmatprep.subr.bf16.mxu1 %v2850_v61  ;;  %v2636_v51 = vpop.f32.mrb[8].mxu0  ;;  %2748 = vmatpush3.bf16.msra.mxu0 %v2910_v60  ;;  %v2911_v61 = vld [vmem:[%s3730_s12 + $0x8] sm:$0xff]  }
 0x13d   :  { %v2637_v52 = vpop.f32.mrb[9].mxu0  ;;  %2749 = vmatprep.subr.bf16.mxu0 %v2931_v23 }
 0x13e   :  { %v2638_v53 = vadd.f32 %v2637_v52, %v2636_v51  ;;  %v2639_v54 = vpop.f32.mrb[10].mxu0  ;;  %v2921_v51 = vld [vmem:[%s3731_s16 + $0x18] sm:$0xff]   ;;  %v2922_v52 = vld [vmem:[%s3731_s16 + $0x60] sm:$0xff]  }
 0x13f   :  { %2609 = vmatpush3.bf16.msra.mxu1 %v2852_v62  ;;  %v2640_v55 = vpop.f32.mrb[11].mxu0  ;;  %v2912_v62 = vld [vmem:[%s3730_s12 + $0x10] sm:$0xff]   ;;  %v2924_v54 = vld [vmem:[%s3731_s16 + $0x68] sm:$0xff]  }
 0x140   :  { %2610 = vmatprep.subr.bf16.mxu1 %v2854_v63  ;;  %2750 = vmatpush3.bf16.msra.mxu0 %v2911_v61  ;;  %v2913_v63 = vld [vmem:[%s3730_s12 + $0x18] sm:$0xff]   ;;  %v2925_v55 = vld [vmem:[%s3731_s16 + $0x28] sm:$0xff]  }
 0x141   :  { %2751 = vmatprep.subr.bf16.mxu0 %v2931_v23 }
 0x143   :  { %2611 = vmatpush3.bf16.msra.mxu1 %v2856_v0  ;;  %v2914_v0 = vld [vmem:[%s3731_s16 + $0x40] sm:$0xff]  }
 0x144   :  { %2612 = vmatprep.subr.bf16.mxu1 %v2858_v1  ;;  %2752 = vmatpush3.bf16.msra.mxu0 %v2912_v62  ;;  %v2232_v1 = vld [vmem:[%s3732_s7] ss:$0 sm:$0xff] }
 0x145   :  { %2753 = vmatprep.subr.bf16.mxu0 %v2931_v23  ;;  %v2238_v23 = vld [vmem:[%s3733_s8] ss:$0 sm:$0xff] }
 0x147   :  { %2613 = vmatpush3.bf16.msra.mxu1 %v2860_v2 }
 0x148   :  { %2642 = vmatprep.subr.bf16.mxu1 %v2862_v3  ;;  %2754 = vmatpush3.bf16.msra.mxu0 %v2913_v63 }
 0x149   :  { %2713 = vmatprep.subr.bf16.mxu0 %v2914_v0 }
 0x14a   :  { %2297 = vmatmul.mubr.msk.bf16.vlgmr.msra.gmra.mrb[12].mxu1 %vm3277_vm3, %v3283_v21  ;;  %v2878_v21 = vld [vmem:[%s3726_s10 + $0x160] sm:$0xff]  }
 0x14b   :  { %2643 = vmatpush3.bf16.msra.mxu1 %v2863_v4  ;;  %1440 = vmatprep.mubr.bf16.mxu1 %v3146_v42  ;;  %v2875_v42 = vld [vmem:[%s3726_s10 + $0x118] sm:$0xff]  }
 0x14c   :  { %2644 = vmatprep.subr.bf16.mxu1 %v2866_v5 }
 0x14f   :  { %2645 = vmatpush3.bf16.msra.mxu1 %v2867_v7 }
 0x150   :  { %2646 = vmatprep.subr.bf16.mxu1 %v2870_v8 }
 0x153   :  { %2647 = vmatpush3.bf16.msra.mxu1 %v2871_v9  ;;  %v2239_v9 = vld [vmem:[%s3755_s6] ss:$0 sm:$0xff] }
 0x154   :  { %2648 = vmatprep.subr.bf16.mxu1 %v2874_v20 }
 0x157   :  { %2649 = vmatpush3.bf16.msra.mxu1 %v2875_v42 }
 0x158   :  { %2650 = vmatprep.subr.bf16.mxu1 %v2878_v21 }
 0x15b   :  { %2651 = vmatpush3.bf16.msra.mxu1 %v2879_v10 }
 0x15c   :  { %2652 = vmatprep.subr.bf16.mxu1 %v2882_v15  ;;  %v2680_v56 = vpop.f32.mrb[12].mxu0 }
 0x15d   :  { %v2681_v57 = vpop.f32.mrb[13].mxu0 }
 0x15e   :  { %v2682_v58 = vadd.f32 %v2681_v57, %v2680_v56  ;;  %v2683_v22 = vpop.f32.mrb[14].mxu0  ;;  %v1900_v56 = vsel %vm3248_vm0, -inf, %v3271_v18  ;;  %v2926_v57 = vld [vmem:[%s3731_s16 + $0x70] sm:$0xff]   ;;  %v2929_v18 = vld [vmem:[%s3731_s16 + $0x38] sm:$0xff]  }
 0x15f   :  { %2653 = vmatpush3.bf16.msra.mxu1 %v2883_v16  ;;  %v2684_v59 = vpop.f32.mrb[15].mxu0  ;;  %v2927_v22 = vld [vmem:[%s3731_s16 + $0x30] sm:$0xff]  }
 0x160   :  { %2654 = vmatprep.subr.bf16.mxu1 %v2886_v17  ;;  %v2928_v59 = vld [vmem:[%s3731_s16 + $0x78] sm:$0xff]  }
 0x163   :  { %2655 = vmatpush3.bf16.msra.mxu1 %v2887_v24 }
 0x164   :  { %2656 = vmatprep.subr.bf16.mxu1 %v2890_v25 }
 0x167   :  { %2657 = vmatpush3.bf16.msra.mxu1 %v2891_v27 }
 0x168   :  { %2686 = vmatprep.subr.bf16.mxu1 %v2894_v28 }
 0x16a   :  { %1441 = vmatmul.mubr.bf16.vlgmr.msra.gmra.mrb[16].mxu1 %v3136_v39  ;;  %v2899_v39 = vld [vmem:[%s3726_s10 + $0x210] sm:$0xff]  }
 0x16b   :  { %2687 = vmatpush3.bf16.msra.mxu1 %v2895_v32  ;;  %2472 = vmatprep.mubr.msk.bf16.mxu1 %vm2470_vm8, %v2471_v13 }
 0x16c   :  { %2688 = vmatprep.subr.bf16.mxu1 %v2896_v33  ;;  %v1901_v33 = vsel %vm3248_vm0, -inf, %v3275_v19  ;;  %v2915_v19 = vld [vmem:[%s3731_s16] sm:$0xff]  }
 0x16f   :  { %2689 = vmatpush3.bf16.msra.mxu1 %v2897_v29 }
 0x170   :  { %2690 = vmatprep.subr.bf16.mxu1 %v2898_v6 }
 0x173   :  { %2691 = vmatpush3.bf16.msra.mxu1 %v2899_v39  ;;  %v1904_v39 = vmax.f32 %v1901_v33, %v3363_v48  ;;  %v2916_v48 = vld [vmem:[%s3731_s16 + $0x48] sm:$0xff]  }
 0x174   :  { %2692 = vmatprep.subr.bf16.mxu1 %v2900_v34 }
 0x177   :  { %2693 = vmatpush3.bf16.msra.mxu1 %v2901_v35 }
 0x178   :  { %2694 = vmatprep.subr.bf16.mxu1 %v2902_v36  ;;  %v2478_v36 = vld [vmem:[%s3735_s11] ss:$0 sm:$0xff] }
 0x17b   :  { %2695 = vmatpush3.bf16.msra.mxu1 %v2903_v37 }
 0x17c   :  { %2696 = vmatprep.subr.bf16.mxu1 %v2904_v40 }
 0x17f   :  { %2697 = vmatpush3.bf16.msra.mxu1 %v2905_v41  ;;  %v1907_v41 = vmax.f32 %v1904_v39, %v3259_v14  ;;  %v2918_v14 = vld [vmem:[%s3731_s16 + $0x50] sm:$0xff]  }
 0x180   :  { %2698 = vmatprep.subr.bf16.mxu1 %v2906_v43 }
 0x181   :  { %v1909_v46 = vpack.c.bf16 %v1907_v41, %v1907_v41 }
 0x183   :  { %2699 = vmatpush3.bf16.msra.mxu1 %v2907_v45 }
 0x184   :  { %2700 = vmatprep.subr.bf16.mxu1 %v2908_v47 }
 0x187   :  { %2701 = vmatpush3.bf16.msra.mxu1 %v2909_v38  ;;  %v2917_v38 = vld [vmem:[%s3731_s16 + $0x8] sm:$0xff]  }
 0x18a   :  { %2477 = vmatmul.mubr.msk.bf16.vlgmr.msra.gmra.mrb[20].mxu1 %vm2470_vm8, %v2476_v50  ;;  %v2920_v50 = vld [vmem:[%s3731_s16 + $0x58] sm:$0xff]  }
 0x1fd   :  { %v917_v2 = vpop.f32.mrb[8].mxu1 }
 0x1fe   :  { %v918_v3 = vadd.f32 %v2232_v1, %v917_v2  ;;  %v2745_v4 = vpop.f32.mrb[9].mxu1 }
 0x1ff   :  { %v920_v5 = vpop.f32.mrb[10].mxu1 }
 0x200   :  { %v923_v7 = vmax.f32 %v918_v3, 0.0  ;;  %v2746_v8 = vpop.f32.mrb[11].mxu1  ;;  %v2486_v3 = vld [vmem:[%s3738_s15] ss:$0 sm:$0xff] }
 0x201   :  { %v2487_v8 = vld [vmem:[%s3739_s17] ss:$0 sm:$0xff] }
 0x202   :  { %v931_v20 = vmul.f32 %v2238_v23, %v923_v7 }
 0x204   :  { %v939_v42 = vadd.f32 %v2239_v9, %v931_v20 }
 0x206   :  { %v940_v21 = vpack.c.bf16 %v939_v42, %v939_v42 }
 0x208   :  { %941 = vst [vmem:[%s3728_s18 + $0x2] sm:$0x3] %v940_v21 }
 0x21d   :  { %v2614_v10 = vpop.f32.mrb[12].mxu1 }
 0x21e   :  { %v2615_v15 = vpop.f32.mrb[13].mxu1 }
 0x21f   :  { %v2616_v16 = vadd.f32 %v2615_v15, %v2614_v10  ;;  %v2617_v17 = vpop.f32.mrb[14].mxu1 }
 0x220   :  { %v2618_v24 = vpop.f32.mrb[15].mxu1 }
 0x221   :  { %v1274_v25 = vadd.f32 %v2638_v53, %v2616_v16  ;;  %v2923_v53 = vld [vmem:[%s3731_s16 + $0x20] sm:$0xff]  }
 0x23d   :  { %v2658_v26 = vpop.f32.mrb[16].mxu1 }
 0x23e   :  { %v2659_v27 = vpop.f32.mrb[17].mxu1 }
 0x23f   :  { %v2660_v28 = vadd.f32 %v2659_v27, %v2658_v26  ;;  %v2661_v30 = vpop.f32.mrb[18].mxu1 }
 0x240   :  { %v2662_v31 = vpop.f32.mrb[19].mxu1 }
 0x241   :  { %v1448_v32 = vadd.f32 %v2660_v28, %v1274_v25 }
 0x243   :  { %v1618_v13 = vadd.f32 %v2682_v58, %v1448_v32  ;;  %v1903_v58 = vmax.f32 %v1900_v56, %v3350_v44  ;;  %v2479_v44 = vld [vmem:[%s3736_s13] ss:$0 sm:$0xff] }
 0x245   :  { %v1906_v11 = vmax.f32 %v1903_v58, %v3252_v12  ;;  %v2485_v12 = vld [vmem:[%s3737_s14] ss:$0 sm:$0xff] }
 0x247   :  { %v1908_v60 = vpack.c.bf16 %v1906_v11, %v1906_v11 }
 0x25d   :  { %v2702_v29 = vpop.f32.mrb[20].mxu1 }
 0x25e   :  { %v2703_v6 = vpop.f32.mrb[21].mxu1 }
 0x25f   :  { %v2704_v34 = vadd.f32 %v2703_v6, %v2702_v29  ;;  %v2705_v35 = vpop.f32.mrb[22].mxu1 }
 0x260   :  { %v2706_v37 = vpop.f32.mrb[23].mxu1 }
 0x261   :  { %v1788_v40 = vadd.f32 %v2704_v34, %v1618_v13 }
 0x263   :  { %v1796_v43 = vadd.f32 %v2478_v36, %v1788_v40 }
 0x265   :  { %v1797_v45 = vmax.f32 %v1796_v43, 0.0 }
 0x267   :  { %v1798_v47 = vpack.c.bf16 %v1797_v45, %v1797_v45 }
 0x269   :  { %2756 = vmatmul.mubr.msk.bf16.vlgmr.msra.gmra.mrb[16].mxu0 %vm879_vm5, %v1798_v47 }
 0x26a   :  { %2714 = vmatpush3.bf16.msra.mxu0 %v2915_v19  ;;  %2077 = vmatprep.mubr.bf16.mxu0 %v1909_v46 }
 0x26b   :  { %2715 = vmatprep.subr.bf16.mxu0 %v2916_v48 }
 0x26e   :  { %2716 = vmatpush3.bf16.msra.mxu0 %v2917_v38 }
 0x26f   :  { %2717 = vmatprep.subr.bf16.mxu0 %v2918_v14 }
 0x272   :  { %2718 = vmatpush3.bf16.msra.mxu0 %v2919_v49 }
 0x273   :  { %2719 = vmatprep.subr.bf16.mxu0 %v2920_v50 }
 0x276   :  { %2720 = vmatpush3.bf16.msra.mxu0 %v2921_v51 }
 0x277   :  { %2721 = vmatprep.subr.bf16.mxu0 %v2922_v52 }
 0x27a   :  { %2722 = vmatpush3.bf16.msra.mxu0 %v2923_v53 }
 0x27b   :  { %2723 = vmatprep.subr.bf16.mxu0 %v2924_v54 }
 0x27e   :  { %2724 = vmatpush3.bf16.msra.mxu0 %v2925_v55 }
 0x27f   :  { %2725 = vmatprep.subr.bf16.mxu0 %v2926_v57 }
 0x282   :  { %2726 = vmatpush3.bf16.msra.mxu0 %v2927_v22 }
 0x283   :  { %2727 = vmatprep.subr.bf16.mxu0 %v2928_v59 }
 0x286   :  { %2728 = vmatpush3.bf16.msra.mxu0 %v2929_v18 }
 0x289   :  { %2078 = vmatmul.mubr.bf16.vlgmr.msra.gmra.mrb[20].mxu0 %v1908_v60 }
 0x33c   :  { %v1875_v61 = vpop.f32.mrb[16].mxu0 }
 0x33d   :  { %v1876_v62 = vadd.f32 %v2479_v44, %v1875_v61  ;;  %v2757_v63 = vpop.f32.mrb[17].mxu0 }
 0x33e   :  { %v1878_v0 = vpop.f32.mrb[18].mxu0 }
 0x33f   :  { %v1881_v1 = vmax.f32 %v1876_v62, 0.0  ;;  %v2758_v2 = vpop.f32.mrb[19].mxu0 }
 0x341   :  { %v1889_v4 = vmul.f32 %v2485_v12, %v1881_v1 }
 0x343   :  { %v1897_v23 = vadd.f32 %v2486_v3, %v1889_v4 }
 0x345   :  { %v1898_v5 = vpack.c.bf16 %v1897_v23, %v1897_v23 }
 0x347   :  { %1899 = vst [vmem:[%s3728_s18 + $0x4] sm:$0x3] %v1898_v5 }
 0x35c   :  { %v2729_v7 = vpop.f32.mrb[20].mxu0 }
 0x35d   :  { %v2730_v9 = vpop.f32.mrb[21].mxu0 }
 0x35e   :  { %v2731_v20 = vadd.f32 %v2730_v9, %v2729_v7  ;;  %v2732_v42 = vpop.f32.mrb[22].mxu0 }
 0x35f   :  { %v2733_v21 = vpop.f32.mrb[23].mxu0 }
 0x360   :  { %v2080_v10 = vadd.f32 %v2731_v20, %v2487_v8 }
 0x362   :  { %v2085_v15 = vmax.f32 %v2080_v10, 0.0 }
 0x364   :  { %v2086_v16 = vpack.c.bf16 %v2085_v15, %v2085_v15 }
 0x366   :  { %2087 = vst [vmem:[%s3728_s18 + $0x6] sm:$0x3] %v2086_v16 }

</bundles_post_ra>
